<compile_context>
chip_gen: v7x
topology: tpu7x:2x2x1
jax: 0.10.0
libtpu: 0.0.40
codegen_flags: <defaults>
</compile_context>

<pallas_src>
import functools

import jax
import jax.numpy as jnp
from jax.experimental import pallas as pl
from jax.experimental.pallas import tpu as pltpu

NEG_SLOPE = 0.2


def _leaky(x):
    return jnp.where(x > 0, x, NEG_SLOPE * x)


def _round_up(n, m):
    return ((n + m - 1) // m) * m


# ----------------------------------------------------------------------------
# Kernel 1: MLP_Res(3, 64, 128) on pos, fused with max over points per batch.
#   grid = (B, nsplit, nt_inner); inner point axis is the reduction axis.
#   Activations are channel-major (C, TN); the K=3 input matmul runs on the
#   VPU as 3 outer-product multiply-adds.
# ----------------------------------------------------------------------------
def mlp_res1_max_kernel(pos_ref, wcp_ref, w2a_ref, w2b_ref, bias_ref, omax_ref):
    i = pl.program_id(2)

    @pl.when(i == 0)
    def _():
        omax_ref[...] = jnp.full(omax_ref.shape, -jnp.inf, omax_ref.dtype)

    c_out = w2b_ref.shape[0]            # 128
    c_hid = w2a_ref.shape[1]            # 64
    fused = c_out + c_hid               # 192

    p = pos_ref[0].astype(jnp.float32)                      # (3, TN)
    bc = bias_ref[0:fused, :]                               # (192, 1)
    b2a = bias_ref[fused:fused + c_out, :]                  # (128, 1)
    b2b = bias_ref[fused + c_out:fused + 2 * c_out, :]      # (128, 1)

    # fused [shortcut(128) | conv1(64)]: K=3 on the VPU (MXU stays free)
    xc = (wcp_ref[0] * p[0:1, :]
          + wcp_ref[1] * p[1:2, :]
          + wcp_ref[2] * p[2:3, :]) + bc                    # (192, TN) f32

    s = xc[0:c_out, :]                                      # shortcut (128, TN)
    h = _leaky(xc[c_out:fused, :]).astype(w2a_ref.dtype)    # (64, TN)

    h2 = _leaky(jnp.dot(w2a_ref[...], h,
                        preferred_element_type=jnp.float32) + b2a)
    h2 = h2.astype(w2b_ref.dtype)
    y = jnp.dot(w2b_ref[...], h2,
                preferred_element_type=jnp.float32) + b2b + s   # (128, TN)

    tile_max = jnp.max(y, axis=1, keepdims=True)            # (128, 1)
    omax_ref[...] = jnp.maximum(omax_ref[...], tile_max[None, None])


# ----------------------------------------------------------------------------
# Kernel 2: MLP_Res(fd+3, 128, 64) on cat([pos, pooled, x]) + LeakyReLU
#           + Conv1d(64, 3).  Concat is decomposed: x via MXU, pos via VPU
#           outer products, pooled via a per-batch (192, 1) precomputed term.
#           Output stays channel-major -> lane-dense (1, 3, TN) stores.
# ----------------------------------------------------------------------------
def mlp_res2_head_kernel(pos_ref, x_ref, pterm_ref, wcp_ref, wcx_ref,
                         w2a_ref, w2b_ref, w3_ref, bias_ref, o_ref):
    c_hid = w2a_ref.shape[1]            # 128
    c_out = w2b_ref.shape[0]            # 64
    fused = c_out + c_hid               # 192
    c3 = w3_ref.shape[0]                # 3

    p = pos_ref[0].astype(jnp.float32)                      # (3, TN)
    xx = x_ref[0]                                           # (Cx, TN)
    pt = pterm_ref[0]                                       # (192, 1)

    # fused [shortcut(64) | conv1(128)]: pos part on VPU, x part on MXU
    xc = (wcp_ref[0] * p[0:1, :]
          + wcp_ref[1] * p[1:2, :]
          + wcp_ref[2] * p[2:3, :]) + pt                    # (192, TN) f32
    xc = xc + jnp.dot(wcx_ref[...], xx,
                      preferred_element_type=jnp.float32)

    s = xc[0:c_out, :]                                      # shortcut (64, TN)
    h = _leaky(xc[c_out:fused, :]).astype(w2a_ref.dtype)    # (128, TN)

    b2a = bias_ref[0:c_out, :]
    b2b = bias_ref[c_out:2 * c_out, :]
    b3 = bias_ref[2 * c_out:2 * c_out + c3, :]

    h2 = _leaky(jnp.dot(w2a_ref[...], h,
                        preferred_element_type=jnp.float32) + b2a)
    h2 = h2.astype(w2b_ref.dtype)
    y = jnp.dot(w2b_ref[...], h2,
                preferred_element_type=jnp.float32) + b2b + s   # (64, TN)

    feat = _leaky(y).astype(w3_ref.dtype)                   # outer self.act
    out = jnp.dot(w3_ref[...], feat,                        # (3, TN), M=3 only
                  preferred_element_type=jnp.float32) + b3
    o_ref[0] = out.astype(o_ref.dtype)                      # lane-dense store


# ----------------------------------------------------------------------------
# Wrapper
# ----------------------------------------------------------------------------
def pos_displace_forward(pos, x, params, *, tile_n=1024,
                         compute_dtype=jnp.float32):
    """pos: (B, 3, N), x: (B, feature_dim-128, N) -> (B, 3, N)."""
    mlp1, mlp2, (w3, b3) = params
    ws1, bs1, w11, b11, w2a1, b2a1, w2b1, b2b1 = mlp1
    ws2, bs2, w12, b12, w2a2, b2a2, w2b2, b2b2 = mlp2

    B, cp, N = pos.shape
    assert cp == 3
    cx = x.shape[1]
    assert x.shape == (B, cx, N)

    c1_out, c1_hid = ws1.shape[1], w11.shape[1]        # 128, 64
    c2_out, c2_hid = ws2.shape[1], w12.shape[1]        # 64, 128
    c2_in = ws2.shape[0]                               # feature_dim + 3
    c3_out = w3.shape[1]                               # 3
    assert c2_in == 3 + c1_out + cx, "x channels must be feature_dim - 128"
    fused1 = c1_out + c1_hid                           # 192
    fused2 = c2_out + c2_hid                           # 192

    f32 = jnp.float32
    cd = compute_dtype
    itemsize = jnp.dtype(cd).itemsize
    out_itemsize = jnp.dtype(pos.dtype).itemsize

    # --- point tiling: point axis on lanes, tile a multiple of 128 ---------
    tile = _round_up(min(tile_n, _round_up(N, 128)), 128)

    def _k2_vmem_bytes(t):
        stream = 2 * t * ((3 + cx) * itemsize + c3_out * out_itemsize)
        weights = 2 * (3 * fused2 * 4 + cx * fused2 * itemsize
                       + (c2_hid * c2_out + c2_out * c2_out
                          + c2_out * c3_out) * itemsize)
        small = 2 * (fused2 + 2 * c2_out + c3_out) * 4 * 128
        return stream + weights + small

    vmem_budget = 24 << 20           # keep well under v7x's 64 MiB physical
    while tile > 128 and _k2_vmem_bytes(tile) > vmem_budget:
        tile = _round_up(tile // 2, 128)
    vmem_limit = int(min(max(2 * _k2_vmem_bytes(tile), 16 << 20), 48 << 20))

    # split kernel-1's point-reduction axis so both v7x TensorCores get work
    nsplit = 2 if N > tile else 1
    n_pad = _round_up(N, tile * nsplit)
    nt = n_pad // tile
    nt_inner = nt // nsplit

    pad = n_pad - N
    if pad:
        # edge padding: duplicated points cannot change the max-pool result
        pos_p = jnp.pad(pos, ((0, 0), (0, 0), (0, pad)), mode="edge")
        x_p = jnp.pad(x, ((0, 0), (0, 0), (0, pad)), mode="edge")
    else:
        pos_p, x_p = pos, x
    pos_pad = pos_p.astype(cd)               # (B, 3, n_pad)  channel-major
    x_pad = x_p.astype(cd)                   # (B, Cx, n_pad)

    # --- channel-major weights, MLP_Res #1: rows = [shortcut(128)|hid(64)] --
    wc1T = jnp.concatenate([ws1.T, w11.T], axis=0).astype(f32)      # (192, 3)
    wc1_pos = wc1T.T[:, :, None]                                    # (3, 192, 1)
    w2a1T = w2a1.T.astype(cd)                                       # (128, 64)
    w2b1T = w2b1.T.astype(cd)                                       # (128, 128)
    bias1 = jnp.concatenate([bs1, b11, b2a1, b2b1]).astype(f32)[:, None]  # (448,1)

    # --- MLP_Res #2: rows = [shortcut(64)|hid(128)], cols split [pos|feat|x]
    wc2T = jnp.concatenate([ws2.T, w12.T], axis=0)                  # (192, C2in)
    wc2_pos = wc2T[:, :3].astype(f32).T[:, :, None]                 # (3, 192, 1)
    wc2_feat = wc2T[:, 3:3 + c1_out].astype(f32)                    # (192, 128)
    wc2_x = wc2T[:, 3 + c1_out:].astype(cd)                         # (192, Cx)
    bc2 = jnp.concatenate([bs2, b12]).astype(f32)[:, None]          # (192, 1)
    w2a2T = w2a2.T.astype(cd)                                       # (64, 128)
    w2b2T = w2b2.T.astype(cd)                                       # (64, 64)
    w3T = w3.T.astype(cd)                                           # (3, 64)
    bias2 = jnp.concatenate([b2a2, b2b2, b3]).astype(f32)[:, None]  # (131, 1)

    # ===== kernel 1: MLP_Res(pos) fused with per-batch/per-split max ========
    flops1 = 2 * B * n_pad * (3 * fused1 + c1_hid * c1_out + c1_out * c1_out)
    bytes1 = int(pos_pad.size * itemsize
                 + (fused1 * 3 + c1_out * c1_hid + c1_out * c1_out) * itemsize
                 + bias1.size * 4 + B * nsplit * c1_out * 4)

    part_max = pl.pallas_call(
        mlp_res1_max_kernel,
        out_shape=jax.ShapeDtypeStruct((B, nsplit, c1_out, 1), f32),
        grid_spec=pltpu.PrefetchScalarGridSpec(
            num_scalar_prefetch=0,
            grid=(B, nsplit, nt_inner),
            in_specs=[
                pl.BlockSpec((1, 3, tile),
                             lambda b, s, i: (b, 0, s * nt_inner + i)),
                pl.BlockSpec((3, fused1, 1), lambda b, s, i: (0, 0, 0)),
                pl.BlockSpec((c1_out, c1_hid), lambda b, s, i: (0, 0)),
                pl.BlockSpec((c1_out, c1_out), lambda b, s, i: (0, 0)),
                pl.BlockSpec((bias1.shape[0], 1), lambda b, s, i: (0, 0)),
            ],
            out_specs=pl.BlockSpec((1, 1, c1_out, 1),
                                   lambda b, s, i: (b, s, 0, 0)),
        ),
        compiler_params=pltpu.CompilerParams(
            dimension_semantics=("parallel", "parallel", "arbitrary"),
            vmem_limit_bytes=vmem_limit),
        cost_estimate=pl.CostEstimate(flops=flops1, transcendentals=0,
                                      bytes_accessed=bytes1),
    )(pos_pad, wc1_pos, w2a1T, w2b1T, bias1)

    # combine per-split maxes + pooled-feature contribution (tiny, O(B*192*128))
    feat_max = jnp.max(part_max, axis=1)                            # (B, 128, 1)
    pterm = (jnp.einsum("oc,bcd->bod", wc2_feat, feat_max,
                        precision=jax.lax.Precision.HIGHEST)
             + bc2[None])                                           # (B, 192, 1)

    # ===== kernel 2: MLP_Res#2 + LeakyReLU + Conv1d(64,3), concat-free ======
    flops2 = 2 * B * n_pad * ((3 + cx) * fused2 + c2_hid * c2_out
                              + c2_out * c2_out + c2_out * c3_out)
    bytes2 = int((pos_pad.size + x_pad.size) * itemsize
                 + (fused2 * (3 + cx) + c2_hid * c2_out + c2_out * c2_out
                    + c2_out * c3_out) * itemsize
                 + (pterm.size + bias2.size) * 4
                 + B * n_pad * c3_out * out_itemsize)

    out_pad = pl.pallas_call(
        mlp_res2_head_kernel,
        out_shape=jax.ShapeDtypeStruct((B, c3_out, n_pad), pos.dtype),
        grid_spec=pltpu.PrefetchScalarGridSpec(
            num_scalar_prefetch=0,
            grid=(B, nt),
            in_specs=[
                pl.BlockSpec((1, 3, tile), lambda b, i: (b, 0, i)),
                pl.BlockSpec((1, cx, tile), lambda b, i: (b, 0, i)),
                pl.BlockSpec((1, fused2, 1), lambda b, i: (b, 0, 0)),
                pl.BlockSpec((3, fused2, 1), lambda b, i: (0, 0, 0)),
                pl.BlockSpec((fused2, cx), lambda b, i: (0, 0)),
                pl.BlockSpec((c2_out, c2_hid), lambda b, i: (0, 0)),
                pl.BlockSpec((c2_out, c2_out), lambda b, i: (0, 0)),
                pl.BlockSpec((c3_out, c2_out), lambda b, i: (0, 0)),
                pl.BlockSpec((bias2.shape[0], 1), lambda b, i: (0, 0)),
            ],
            out_specs=pl.BlockSpec((1, c3_out, tile), lambda b, i: (b, 0, i)),
        ),
        compiler_params=pltpu.CompilerParams(
            dimension_semantics=("parallel", "parallel"),
            vmem_limit_bytes=vmem_limit),
        cost_estimate=pl.CostEstimate(flops=flops2, transcendentals=0,
                                      bytes_accessed=bytes2),
    )(pos_pad, x_pad, pterm, wc2_pos, wc2_x, w2a2T, w2b2T, w3T, bias2)

    return out_pad[:, :, :N] if pad else out_pad            # (B, 3, N)


# ----------------------------------------------------------------------------
# Parameter init (Conv1d(k=1) weights stored as (in, out) matrices)
# ----------------------------------------------------------------------------
def _mlp_res_params(key, cin, chid, cout, dtype=jnp.float32):
    ks = jax.random.split(key, 8)

    def u(k, shape, fan_in):
        bound = 1.0 / (fan_in ** 0.5)
        return jax.random.uniform(k, shape, dtype, -bound, bound)

    ws = u(ks[0], (cin, cout), cin)
    bs = u(ks[1], (cout,), cin)
    w1 = u(ks[2], (cin, chid), cin)
    b1 = u(ks[3], (chid,), cin)
    w2a = u(ks[4], (chid, cout), chid)
    b2a = u(ks[5], (cout,), chid)
    w2b = u(ks[6], (cout, cout), cout)
    b2b = u(ks[7], (cout,), cout)
    return (ws, bs, w1, b1, w2a, b2a, w2b, b2b)


def init_pos_displace_params(key, feature_dim, dtype=jnp.float32):
    k1, k2, k3 = jax.random.split(key, 3)
    mlp1 = _mlp_res_params(k1, 3, 64, 128, dtype)
    mlp2 = _mlp_res_params(k2, feature_dim + 3, 128, 64, dtype)
    kw, kb = jax.random.split(k3)
    bound = 1.0 / (64 ** 0.5)
    w3 = jax.random.uniform(kw, (64, 3), dtype, -bound, bound)
    b3 = jax.random.uniform(kb, (3,), dtype, -bound, bound)
    return (mlp1, mlp2, (w3, b3))


# ----------------------------------------------------------------------------
# Pure-JAX reference mirroring the PyTorch module
# ----------------------------------------------------------------------------
def reference_forward(pos, x, params):
    mlp1, mlp2, (w3, b3) = params
    hp = jax.lax.Precision.HIGHEST

    def mlp_res(a, p):
        ws, bs, w1, b1, w2a, b2a, w2b, b2b = p
        s = jnp.dot(a, ws, precision=hp) + bs
        h = _leaky(jnp.dot(a, w1, precision=hp) + b1)
        h2 = _leaky(jnp.dot(h, w2a, precision=hp) + b2a)
        return jnp.dot(h2, w2b, precision=hp) + b2b + s

    pos_nlc = jnp.transpose(pos, (0, 2, 1))            # (B, N, 3)
    x_nlc = jnp.transpose(x, (0, 2, 1))                # (B, N, Cx)
    feat = mlp_res(pos_nlc, mlp1)                      # (B, N, 128)
    pooled = jnp.max(feat, axis=1, keepdims=True)      # (B, 1, 128)
    pooled = jnp.broadcast_to(
        pooled, (feat.shape[0], pos_nlc.shape[1], feat.shape[2]))
    c = jnp.concatenate([pos_nlc, pooled, x_nlc], axis=-1)
    f2 = _leaky(mlp_res(c, mlp2))
    out = jnp.dot(f2, w3, precision=hp) + b3
    return jnp.transpose(out, (0, 2, 1))               # (B, 3, N)


if __name__ == "__main__":
    key = jax.random.PRNGKey(0)
    k_pos, k_x, k_p = jax.random.split(key, 3)

    # Small shapes consistent with the module: conv2 takes feature_dim+3
    # channels = 3 (pos) + 128 (pooled feat) + Cx, so Cx = feature_dim - 128.
    B = 2
    feature_dim = 192
    N = 64
    Cx = feature_dim - 128

    pos = jax.random.normal(k_pos, (B, 3, N), jnp.float32)
    x = jax.random.normal(k_x, (B, Cx, N), jnp.float32)
    params = init_pos_displace_params(k_p, feature_dim)

    fwd = jax.jit(functools.partial(pos_displace_forward, tile_n=1024))
    out = jax.block_until_ready(fwd(pos, x, params))

    ref = reference_forward(pos, x, params)
    assert out.shape == (B, 3, N), out.shape
    err = float(jnp.max(jnp.abs(out - ref)))
    assert jnp.allclose(out, ref, atol=1e-4, rtol=1e-4), f"mismatch: {err}"

    print("KERNEL_OK")
</pallas_src>

<mosaic_0001>
module attributes {stable_mosaic.version = 11 : i64} {
  func.func @mlp_res1_max_kernel(%arg0: i32, %arg1: i32, %arg2: i32, %arg3: memref<1x3x128xf32, #tpu.memory_space<vmem>>, %arg4: memref<3x192x1xf32, #tpu.memory_space<vmem>>, %arg5: memref<128x64xf32, #tpu.memory_space<vmem>>, %arg6: memref<128x128xf32, #tpu.memory_space<vmem>>, %arg7: memref<448x1xf32, #tpu.memory_space<vmem>>, %arg8: memref<1x1x128x1xf32, #tpu.memory_space<vmem>>) attributes {dimension_semantics = [#tpu.dimension_semantics<parallel>, #tpu.dimension_semantics<parallel>, #tpu.dimension_semantics<arbitrary>], iteration_bounds = array<i64: 2, 1, 1>, scalar_prefetch = 0 : i64, scratch_operands = 0 : i64, tpu.core_type = #tpu.core_type<tc>, window_params = [{transform_indices = @transform_0, window_bounds = array<i64: 1, 3, 128>}, {pipeline_mode = #tpu.pipeline_mode<synchronous>, transform_indices = @transform_1, window_bounds = array<i64: 3, 192, 1>}, {pipeline_mode = #tpu.pipeline_mode<synchronous>, transform_indices = @transform_2, window_bounds = array<i64: 128, 64>}, {pipeline_mode = #tpu.pipeline_mode<synchronous>, transform_indices = @transform_3, window_bounds = array<i64: 128, 128>}, {pipeline_mode = #tpu.pipeline_mode<synchronous>, transform_indices = @transform_4, window_bounds = array<i64: 448, 1>}, {transform_indices = @transform_5, window_bounds = array<i64: 1, 1, 128, 1>}]} {
    %c0_i32 = arith.constant 0 : i32
    %0 = arith.cmpi eq, %arg2, %c0_i32 : i32
    %1 = arith.extui %0 : i1 to i32
    %c0_i32_0 = arith.constant 0 : i32
    %2 = arith.cmpi ne, %1, %c0_i32_0 : i32
    scf.if %2 {
      %cst_32 = arith.constant 0xFF800000 : f32
      %57 = vector.broadcast %cst_32 : f32 to vector<1x1x128x1xf32>
      %c0_33 = arith.constant 0 : index
      %c0_34 = arith.constant 0 : index
      %c0_35 = arith.constant 0 : index
      %c0_36 = arith.constant 0 : index
      %58 = vector.load %arg8[%c0_33, %c0_34, %c0_35, %c0_36] : memref<1x1x128x1xf32, #tpu.memory_space<vmem>>, vector<1x1x128x1xf32>
      tpu.vector_store %arg8[%c0_33, %c0_34, %c0_35, %c0_36], %57 {strides = array<i32>} : memref<1x1x128x1xf32, #tpu.memory_space<vmem>>, vector<1x1x128x1xf32>,
    } else {
    }
    %c0 = arith.constant 0 : index
    %c0_1 = arith.constant 0 : index
    %c0_2 = arith.constant 0 : index
    %3 = vector.load %arg3[%c0, %c0_1, %c0_2] : memref<1x3x128xf32, #tpu.memory_space<vmem>>, vector<1x3x128xf32>
    %4 = vector.shape_cast %3 : vector<1x3x128xf32> to vector<3x128xf32>
    %c0_3 = arith.constant 0 : index
    %c0_4 = arith.constant 0 : index
    %5 = vector.load %arg7[%c0_3, %c0_4] : memref<448x1xf32, #tpu.memory_space<vmem>>, vector<192x1xf32>
    %c192 = arith.constant 192 : index
    %c0_5 = arith.constant 0 : index
    %6 = vector.load %arg7[%c192, %c0_5] : memref<448x1xf32, #tpu.memory_space<vmem>>, vector<128x1xf32>
    %c320 = arith.constant 320 : index
    %c0_6 = arith.constant 0 : index
    %7 = vector.load %arg7[%c320, %c0_6] : memref<448x1xf32, #tpu.memory_space<vmem>>, vector<128x1xf32>
    %c0_7 = arith.constant 0 : index
    %c0_8 = arith.constant 0 : index
    %c0_9 = arith.constant 0 : index
    %8 = vector.load %arg4[%c0_7, %c0_8, %c0_9] : memref<3x192x1xf32, #tpu.memory_space<vmem>>, vector<1x192x1xf32>
    %9 = vector.shape_cast %8 : vector<1x192x1xf32> to vector<192x1xf32>
    %10 = vector.extract_strided_slice %4 {offsets = [0, 0], sizes = [1, 128], strides = [1, 1]} : vector<3x128xf32> to vector<1x128xf32>
    %11 = vector.broadcast %9 : vector<192x1xf32> to vector<192x128xf32>
    %12 = vector.broadcast %10 : vector<1x128xf32> to vector<192x128xf32>
    %13 = arith.mulf %11, %12 : vector<192x128xf32>
    %c1 = arith.constant 1 : index
    %c0_10 = arith.constant 0 : index
    %c0_11 = arith.constant 0 : index
    %14 = vector.load %arg4[%c1, %c0_10, %c0_11] : memref<3x192x1xf32, #tpu.memory_space<vmem>>, vector<1x192x1xf32>
    %15 = vector.shape_cast %14 : vector<1x192x1xf32> to vector<192x1xf32>
    %16 = vector.extract_strided_slice %4 {offsets = [1, 0], sizes = [1, 128], strides = [1, 1]} : vector<3x128xf32> to vector<1x128xf32>
    %17 = vector.broadcast %15 : vector<192x1xf32> to vector<192x128xf32>
    %18 = vector.broadcast %16 : vector<1x128xf32> to vector<192x128xf32>
    %19 = arith.mulf %17, %18 : vector<192x128xf32>
    %20 = arith.addf %13, %19 : vector<192x128xf32>
    %c2 = arith.constant 2 : index
    %c0_12 = arith.constant 0 : index
    %c0_13 = arith.constant 0 : index
    %21 = vector.load %arg4[%c2, %c0_12, %c0_13] : memref<3x192x1xf32, #tpu.memory_space<vmem>>, vector<1x192x1xf32>
    %22 = vector.shape_cast %21 : vector<1x192x1xf32> to vector<192x1xf32>
    %23 = vector.extract_strided_slice %4 {offsets = [2, 0], sizes = [1, 128], strides = [1, 1]} : vector<3x128xf32> to vector<1x128xf32>
    %24 = vector.broadcast %22 : vector<192x1xf32> to vector<192x128xf32>
    %25 = vector.broadcast %23 : vector<1x128xf32> to vector<192x128xf32>
    %26 = arith.mulf %24, %25 : vector<192x128xf32>
    %27 = arith.addf %20, %26 : vector<192x128xf32>
    %28 = vector.broadcast %5 : vector<192x1xf32> to vector<192x128xf32>
    %29 = arith.addf %27, %28 : vector<192x128xf32>
    %30 = vector.extract_strided_slice %29 {offsets = [0, 0], sizes = [128, 128], strides = [1, 1]} : vector<192x128xf32> to vector<128x128xf32>
    %31 = vector.extract_strided_slice %29 {offsets = [128, 0], sizes = [64, 128], strides = [1, 1]} : vector<192x128xf32> to vector<64x128xf32>
    %cst = arith.constant 0.000000e+00 : f32
    %32 = vector.broadcast %cst : f32 to vector<64x128xf32>
    %33 = arith.cmpf ogt, %31, %32 : vector<64x128xf32>
    %cst_14 = arith.constant 2.000000e-01 : f32
    %34 = vector.broadcast %cst_14 : f32 to vector<64x128xf32>
    %35 = arith.mulf %34, %31 : vector<64x128xf32>
    %36 = arith.select %33, %31, %35 : vector<64x128xi1>, vector<64x128xf32>
    %c0_15 = arith.constant 0 : index
    %c0_16 = arith.constant 0 : index
    %37 = vector.load %arg5[%c0_15, %c0_16] : memref<128x64xf32, #tpu.memory_space<vmem>>, vector<128x64xf32>
    %cst_17 = arith.constant dense<0.000000e+00> : vector<128x128xf32>
    %38 = tpu.matmul %37, %36, %cst_17 {dimension_numbers = #tpu.dot_dimension_numbers<[1], [0], [0], [1], [0, 0, 1, 1], [], []>} : vector<128x64xf32>, vector<64x128xf32>, vector<128x128xf32> -> vector<128x128xf32>
    %39 = vector.broadcast %6 : vector<128x1xf32> to vector<128x128xf32>
    %40 = arith.addf %38, %39 : vector<128x128xf32>
    %cst_18 = arith.constant 0.000000e+00 : f32
    %41 = vector.broadcast %cst_18 : f32 to vector<128x128xf32>
    %42 = arith.cmpf ogt, %40, %41 : vector<128x128xf32>
    %cst_19 = arith.constant 2.000000e-01 : f32
    %43 = vector.broadcast %cst_19 : f32 to vector<128x128xf32>
    %44 = arith.mulf %43, %40 : vector<128x128xf32>
    %45 = arith.select %42, %40, %44 : vector<128x128xi1>, vector<128x128xf32>
    %c0_20 = arith.constant 0 : index
    %c0_21 = arith.constant 0 : index
    %46 = vector.load %arg6[%c0_20, %c0_21] : memref<128x128xf32, #tpu.memory_space<vmem>>, vector<128x128xf32>
    %cst_22 = arith.constant dense<0.000000e+00> : vector<128x128xf32>
    %47 = tpu.matmul %46, %45, %cst_22 {dimension_numbers = #tpu.dot_dimension_numbers<[1], [0], [0], [1], [0, 0, 1, 1], [], []>} : vector<128x128xf32>, vector<128x128xf32>, vector<128x128xf32> -> vector<128x128xf32>
    %48 = vector.broadcast %7 : vector<128x1xf32> to vector<128x128xf32>
    %49 = arith.addf %47, %48 : vector<128x128xf32>
    %50 = arith.addf %49, %30 : vector<128x128xf32>
    %cst_23 = arith.constant dense<0xFF800000> : vector<128xf32>
    %51 = vector.multi_reduction <maximumf>, %50, %cst_23 [1] : vector<128x128xf32> to vector<128xf32>
    %52 = vector.shape_cast %51 : vector<128xf32> to vector<128x1xf32>
    %c0_24 = arith.constant 0 : index
    %c0_25 = arith.constant 0 : index
    %c0_26 = arith.constant 0 : index
    %c0_27 = arith.constant 0 : index
    %53 = vector.load %arg8[%c0_24, %c0_25, %c0_26, %c0_27] : memref<1x1x128x1xf32, #tpu.memory_space<vmem>>, vector<1x1x128x1xf32>
    %54 = vector.shape_cast %52 : vector<128x1xf32> to vector<1x1x128x1xf32>
    %55 = arith.maximumf %53, %54 : vector<1x1x128x1xf32>
    %c0_28 = arith.constant 0 : index
    %c0_29 = arith.constant 0 : index
    %c0_30 = arith.constant 0 : index
    %c0_31 = arith.constant 0 : index
    %56 = vector.load %arg8[%c0_28, %c0_29, %c0_30, %c0_31] : memref<1x1x128x1xf32, #tpu.memory_space<vmem>>, vector<1x1x128x1xf32>
    tpu.vector_store %arg8[%c0_28, %c0_29, %c0_30, %c0_31], %55 {strides = array<i32>} : memref<1x1x128x1xf32, #tpu.memory_space<vmem>>, vector<1x1x128x1xf32>,
    return
  }
  func.func @transform_0(%arg0: i32, %arg1: i32, %arg2: i32) -> (i32, i32, i32) {
    %c1_i32 = arith.constant 1 : i32
    %0 = arith.muli %arg1, %c1_i32 : i32
    %1 = arith.addi %0, %arg2 : i32
    %c0_i32 = arith.constant 0 : i32
    %c0_i32_0 = arith.constant 0 : i32
    return %arg0, %c0_i32, %1 : i32, i32, i32
  }
  func.func @transform_1(%arg0: i32, %arg1: i32, %arg2: i32) -> (i32, i32, i32) {
    %c0_i32 = arith.constant 0 : i32
    %c0_i32_0 = arith.constant 0 : i32
    %c0_i32_1 = arith.constant 0 : i32
    %c0_i32_2 = arith.constant 0 : i32
    return %c0_i32, %c0_i32_0, %c0_i32_1 : i32, i32, i32
  }
  func.func @transform_2(%arg0: i32, %arg1: i32, %arg2: i32) -> (i32, i32) {
    %c0_i32 = arith.constant 0 : i32
    %c0_i32_0 = arith.constant 0 : i32
    %c0_i32_1 = arith.constant 0 : i32
    return %c0_i32, %c0_i32_0 : i32, i32
  }
  func.func @transform_3(%arg0: i32, %arg1: i32, %arg2: i32) -> (i32, i32) {
    %c0_i32 = arith.constant 0 : i32
    %c0_i32_0 = arith.constant 0 : i32
    %c0_i32_1 = arith.constant 0 : i32
    return %c0_i32, %c0_i32_0 : i32, i32
  }
  func.func @transform_4(%arg0: i32, %arg1: i32, %arg2: i32) -> (i32, i32) {
    %c0_i32 = arith.constant 0 : i32
    %c0_i32_0 = arith.constant 0 : i32
    %c0_i32_1 = arith.constant 0 : i32
    return %c0_i32, %c0_i32_0 : i32, i32
  }
  func.func @transform_5(%arg0: i32, %arg1: i32, %arg2: i32) -> (i32, i32, i32, i32) {
    %c0_i32 = arith.constant 0 : i32
    %c0_i32_0 = arith.constant 0 : i32
    %c0_i32_1 = arith.constant 0 : i32
    return %arg0, %arg1, %c0_i32, %c0_i32_0 : i32, i32, i32, i32
  }
}

module attributes {stable_mosaic.version = 11 : i64} {
  func.func @mlp_res2_head_kernel(%arg0: i32, %arg1: i32, %arg2: memref<1x3x128xf32, #tpu.memory_space<vmem>>, %arg3: memref<1x64x128xf32, #tpu.memory_space<vmem>>, %arg4: memref<1x192x1xf32, #tpu.memory_space<vmem>>, %arg5: memref<3x192x1xf32, #tpu.memory_space<vmem>>, %arg6: memref<192x64xf32, #tpu.memory_space<vmem>>, %arg7: memref<64x128xf32, #tpu.memory_space<vmem>>, %arg8: memref<64x64xf32, #tpu.memory_space<vmem>>, %arg9: memref<3x64xf32, #tpu.memory_space<vmem>>, %arg10: memref<131x1xf32, #tpu.memory_space<vmem>>, %arg11: memref<1x3x128xf32, #tpu.memory_space<vmem>>) attributes {dimension_semantics = [#tpu.dimension_semantics<parallel>, #tpu.dimension_semantics<parallel>], iteration_bounds = array<i64: 2, 1>, scalar_prefetch = 0 : i64, scratch_operands = 0 : i64, tpu.core_type = #tpu.core_type<tc>, window_params = [{transform_indices = @transform_0, window_bounds = array<i64: 1, 3, 128>}, {transform_indices = @transform_1, window_bounds = array<i64: 1, 64, 128>}, {transform_indices = @transform_2, window_bounds = array<i64: 1, 192, 1>}, {pipeline_mode = #tpu.pipeline_mode<synchronous>, transform_indices = @transform_3, window_bounds = array<i64: 3, 192, 1>}, {pipeline_mode = #tpu.pipeline_mode<synchronous>, transform_indices = @transform_4, window_bounds = array<i64: 192, 64>}, {pipeline_mode = #tpu.pipeline_mode<synchronous>, transform_indices = @transform_5, window_bounds = array<i64: 64, 128>}, {pipeline_mode = #tpu.pipeline_mode<synchronous>, transform_indices = @transform_6, window_bounds = array<i64: 64, 64>}, {pipeline_mode = #tpu.pipeline_mode<synchronous>, transform_indices = @transform_7, window_bounds = array<i64: 3, 64>}, {pipeline_mode = #tpu.pipeline_mode<synchronous>, transform_indices = @transform_8, window_bounds = array<i64: 131, 1>}, {transform_indices = @transform_9, window_bounds = array<i64: 1, 3, 128>}]} {
    %c0 = arith.constant 0 : index
    %c0_0 = arith.constant 0 : index
    %c0_1 = arith.constant 0 : index
    %0 = vector.load %arg2[%c0, %c0_0, %c0_1] : memref<1x3x128xf32, #tpu.memory_space<vmem>>, vector<1x3x128xf32>
    %1 = vector.shape_cast %0 : vector<1x3x128xf32> to vector<3x128xf32>
    %c0_2 = arith.constant 0 : index
    %c0_3 = arith.constant 0 : index
    %c0_4 = arith.constant 0 : index
    %2 = vector.load %arg3[%c0_2, %c0_3, %c0_4] : memref<1x64x128xf32, #tpu.memory_space<vmem>>, vector<1x64x128xf32>
    %3 = vector.shape_cast %2 : vector<1x64x128xf32> to vector<64x128xf32>
    %c0_5 = arith.constant 0 : index
    %c0_6 = arith.constant 0 : index
    %c0_7 = arith.constant 0 : index
    %4 = vector.load %arg4[%c0_5, %c0_6, %c0_7] : memref<1x192x1xf32, #tpu.memory_space<vmem>>, vector<1x192x1xf32>
    %5 = vector.shape_cast %4 : vector<1x192x1xf32> to vector<192x1xf32>
    %c0_8 = arith.constant 0 : index
    %c0_9 = arith.constant 0 : index
    %c0_10 = arith.constant 0 : index
    %6 = vector.load %arg5[%c0_8, %c0_9, %c0_10] : memref<3x192x1xf32, #tpu.memory_space<vmem>>, vector<1x192x1xf32>
    %7 = vector.shape_cast %6 : vector<1x192x1xf32> to vector<192x1xf32>
    %8 = vector.extract_strided_slice %1 {offsets = [0, 0], sizes = [1, 128], strides = [1, 1]} : vector<3x128xf32> to vector<1x128xf32>
    %9 = vector.broadcast %7 : vector<192x1xf32> to vector<192x128xf32>
    %10 = vector.broadcast %8 : vector<1x128xf32> to vector<192x128xf32>
    %11 = arith.mulf %9, %10 : vector<192x128xf32>
    %c1 = arith.constant 1 : index
    %c0_11 = arith.constant 0 : index
    %c0_12 = arith.constant 0 : index
    %12 = vector.load %arg5[%c1, %c0_11, %c0_12] : memref<3x192x1xf32, #tpu.memory_space<vmem>>, vector<1x192x1xf32>
    %13 = vector.shape_cast %12 : vector<1x192x1xf32> to vector<192x1xf32>
    %14 = vector.extract_strided_slice %1 {offsets = [1, 0], sizes = [1, 128], strides = [1, 1]} : vector<3x128xf32> to vector<1x128xf32>
    %15 = vector.broadcast %13 : vector<192x1xf32> to vector<192x128xf32>
    %16 = vector.broadcast %14 : vector<1x128xf32> to vector<192x128xf32>
    %17 = arith.mulf %15, %16 : vector<192x128xf32>
    %18 = arith.addf %11, %17 : vector<192x128xf32>
    %c2 = arith.constant 2 : index
    %c0_13 = arith.constant 0 : index
    %c0_14 = arith.constant 0 : index
    %19 = vector.load %arg5[%c2, %c0_13, %c0_14] : memref<3x192x1xf32, #tpu.memory_space<vmem>>, vector<1x192x1xf32>
    %20 = vector.shape_cast %19 : vector<1x192x1xf32> to vector<192x1xf32>
    %21 = vector.extract_strided_slice %1 {offsets = [2, 0], sizes = [1, 128], strides = [1, 1]} : vector<3x128xf32> to vector<1x128xf32>
    %22 = vector.broadcast %20 : vector<192x1xf32> to vector<192x128xf32>
    %23 = vector.broadcast %21 : vector<1x128xf32> to vector<192x128xf32>
    %24 = arith.mulf %22, %23 : vector<192x128xf32>
    %25 = arith.addf %18, %24 : vector<192x128xf32>
    %26 = vector.broadcast %5 : vector<192x1xf32> to vector<192x128xf32>
    %27 = arith.addf %25, %26 : vector<192x128xf32>
    %c0_15 = arith.constant 0 : index
    %c0_16 = arith.constant 0 : index
    %28 = vector.load %arg6[%c0_15, %c0_16] : memref<192x64xf32, #tpu.memory_space<vmem>>, vector<192x64xf32>
    %cst = arith.constant dense<0.000000e+00> : vector<192x128xf32>
    %29 = tpu.matmul %28, %3, %cst {dimension_numbers = #tpu.dot_dimension_numbers<[1], [0], [0], [1], [0, 0, 1, 1], [], []>} : vector<192x64xf32>, vector<64x128xf32>, vector<192x128xf32> -> vector<192x128xf32>
    %30 = arith.addf %27, %29 : vector<192x128xf32>
    %31 = vector.extract_strided_slice %30 {offsets = [0, 0], sizes = [64, 128], strides = [1, 1]} : vector<192x128xf32> to vector<64x128xf32>
    %32 = vector.extract_strided_slice %30 {offsets = [64, 0], sizes = [128, 128], strides = [1, 1]} : vector<192x128xf32> to vector<128x128xf32>
    %cst_17 = arith.constant 0.000000e+00 : f32
    %33 = vector.broadcast %cst_17 : f32 to vector<128x128xf32>
    %34 = arith.cmpf ogt, %32, %33 : vector<128x128xf32>
    %cst_18 = arith.constant 2.000000e-01 : f32
    %35 = vector.broadcast %cst_18 : f32 to vector<128x128xf32>
    %36 = arith.mulf %35, %32 : vector<128x128xf32>
    %37 = arith.select %34, %32, %36 : vector<128x128xi1>, vector<128x128xf32>
    %c0_19 = arith.constant 0 : index
    %c0_20 = arith.constant 0 : index
    %38 = vector.load %arg10[%c0_19, %c0_20] : memref<131x1xf32, #tpu.memory_space<vmem>>, vector<64x1xf32>
    %c64 = arith.constant 64 : index
    %c0_21 = arith.constant 0 : index
    %39 = vector.load %arg10[%c64, %c0_21] : memref<131x1xf32, #tpu.memory_space<vmem>>, vector<64x1xf32>
    %c128 = arith.constant 128 : index
    %c0_22 = arith.constant 0 : index
    %40 = vector.load %arg10[%c128, %c0_22] : memref<131x1xf32, #tpu.memory_space<vmem>>, vector<3x1xf32>
    %c0_23 = arith.constant 0 : index
    %c0_24 = arith.constant 0 : index
    %41 = vector.load %arg7[%c0_23, %c0_24] : memref<64x128xf32, #tpu.memory_space<vmem>>, vector<64x128xf32>
    %cst_25 = arith.constant dense<0.000000e+00> : vector<64x128xf32>
    %42 = tpu.matmul %41, %37, %cst_25 {dimension_numbers = #tpu.dot_dimension_numbers<[1], [0], [0], [1], [0, 0, 1, 1], [], []>} : vector<64x128xf32>, vector<128x128xf32>, vector<64x128xf32> -> vector<64x128xf32>
    %43 = vector.broadcast %38 : vector<64x1xf32> to vector<64x128xf32>
    %44 = arith.addf %42, %43 : vector<64x128xf32>
    %cst_26 = arith.constant 0.000000e+00 : f32
    %45 = vector.broadcast %cst_26 : f32 to vector<64x128xf32>
    %46 = arith.cmpf ogt, %44, %45 : vector<64x128xf32>
    %cst_27 = arith.constant 2.000000e-01 : f32
    %47 = vector.broadcast %cst_27 : f32 to vector<64x128xf32>
    %48 = arith.mulf %47, %44 : vector<64x128xf32>
    %49 = arith.select %46, %44, %48 : vector<64x128xi1>, vector<64x128xf32>
    %c0_28 = arith.constant 0 : index
    %c0_29 = arith.constant 0 : index
    %50 = vector.load %arg8[%c0_28, %c0_29] : memref<64x64xf32, #tpu.memory_space<vmem>>, vector<64x64xf32>
    %cst_30 = arith.constant dense<0.000000e+00> : vector<64x128xf32>
    %51 = tpu.matmul %50, %49, %cst_30 {dimension_numbers = #tpu.dot_dimension_numbers<[1], [0], [0], [1], [0, 0, 1, 1], [], []>} : vector<64x64xf32>, vector<64x128xf32>, vector<64x128xf32> -> vector<64x128xf32>
    %52 = vector.broadcast %39 : vector<64x1xf32> to vector<64x128xf32>
    %53 = arith.addf %51, %52 : vector<64x128xf32>
    %54 = arith.addf %53, %31 : vector<64x128xf32>
    %cst_31 = arith.constant 0.000000e+00 : f32
    %55 = vector.broadcast %cst_31 : f32 to vector<64x128xf32>
    %56 = arith.cmpf ogt, %54, %55 : vector<64x128xf32>
    %cst_32 = arith.constant 2.000000e-01 : f32
    %57 = vector.broadcast %cst_32 : f32 to vector<64x128xf32>
    %58 = arith.mulf %57, %54 : vector<64x128xf32>
    %59 = arith.select %56, %54, %58 : vector<64x128xi1>, vector<64x128xf32>
    %c0_33 = arith.constant 0 : index
    %c0_34 = arith.constant 0 : index
    %60 = vector.load %arg9[%c0_33, %c0_34] : memref<3x64xf32, #tpu.memory_space<vmem>>, vector<3x64xf32>
    %cst_35 = arith.constant dense<0.000000e+00> : vector<3x128xf32>
    %61 = tpu.matmul %60, %59, %cst_35 {dimension_numbers = #tpu.dot_dimension_numbers<[1], [0], [0], [1], [0, 0, 1, 1], [], []>} : vector<3x64xf32>, vector<64x128xf32>, vector<3x128xf32> -> vector<3x128xf32>
    %62 = vector.broadcast %40 : vector<3x1xf32> to vector<3x128xf32>
    %63 = arith.addf %61, %62 : vector<3x128xf32>
    %c0_36 = arith.constant 0 : index
    %c0_37 = arith.constant 0 : index
    %c0_38 = arith.constant 0 : index
    %64 = vector.load %arg11[%c0_36, %c0_37, %c0_38] : memref<1x3x128xf32, #tpu.memory_space<vmem>>, vector<1x3x128xf32>
    %65 = vector.shape_cast %64 : vector<1x3x128xf32> to vector<3x128xf32>
    %66 = vector.shape_cast %63 : vector<3x128xf32> to vector<1x3x128xf32>
    tpu.vector_store %arg11[%c0_36, %c0_37, %c0_38], %66 {strides = array<i32>} : memref<1x3x128xf32, #tpu.memory_space<vmem>>, vector<1x3x128xf32>,
    return
  }
  func.func @transform_0(%arg0: i32, %arg1: i32) -> (i32, i32, i32) {
    %c0_i32 = arith.constant 0 : i32
    %c0_i32_0 = arith.constant 0 : i32
    return %arg0, %c0_i32, %arg1 : i32, i32, i32
  }
  func.func @transform_1(%arg0: i32, %arg1: i32) -> (i32, i32, i32) {
    %c0_i32 = arith.constant 0 : i32
    %c0_i32_0 = arith.constant 0 : i32
    return %arg0, %c0_i32, %arg1 : i32, i32, i32
  }
  func.func @transform_2(%arg0: i32, %arg1: i32) -> (i32, i32, i32) {
    %c0_i32 = arith.constant 0 : i32
    %c0_i32_0 = arith.constant 0 : i32
    %c0_i32_1 = arith.constant 0 : i32
    return %arg0, %c0_i32, %c0_i32_0 : i32, i32, i32
  }
  func.func @transform_3(%arg0: i32, %arg1: i32) -> (i32, i32, i32) {
    %c0_i32 = arith.constant 0 : i32
    %c0_i32_0 = arith.constant 0 : i32
    %c0_i32_1 = arith.constant 0 : i32
    %c0_i32_2 = arith.constant 0 : i32
    return %c0_i32, %c0_i32_0, %c0_i32_1 : i32, i32, i32
  }
  func.func @transform_4(%arg0: i32, %arg1: i32) -> (i32, i32) {
    %c0_i32 = arith.constant 0 : i32
    %c0_i32_0 = arith.constant 0 : i32
    %c0_i32_1 = arith.constant 0 : i32
    return %c0_i32, %c0_i32_0 : i32, i32
  }
  func.func @transform_5(%arg0: i32, %arg1: i32) -> (i32, i32) {
    %c0_i32 = arith.constant 0 : i32
    %c0_i32_0 = arith.constant 0 : i32
    %c0_i32_1 = arith.constant 0 : i32
    return %c0_i32, %c0_i32_0 : i32, i32
  }
  func.func @transform_6(%arg0: i32, %arg1: i32) -> (i32, i32) {
    %c0_i32 = arith.constant 0 : i32
    %c0_i32_0 = arith.constant 0 : i32
    %c0_i32_1 = arith.constant 0 : i32
    return %c0_i32, %c0_i32_0 : i32, i32
  }
  func.func @transform_7(%arg0: i32, %arg1: i32) -> (i32, i32) {
    %c0_i32 = arith.constant 0 : i32
    %c0_i32_0 = arith.constant 0 : i32
    %c0_i32_1 = arith.constant 0 : i32
    return %c0_i32, %c0_i32_0 : i32, i32
  }
  func.func @transform_8(%arg0: i32, %arg1: i32) -> (i32, i32) {
    %c0_i32 = arith.constant 0 : i32
    %c0_i32_0 = arith.constant 0 : i32
    %c0_i32_1 = arith.constant 0 : i32
    return %c0_i32, %c0_i32_0 : i32, i32
  }
  func.func @transform_9(%arg0: i32, %arg1: i32) -> (i32, i32, i32) {
    %c0_i32 = arith.constant 0 : i32
    %c0_i32_0 = arith.constant 0 : i32
    return %arg0, %c0_i32, %arg1 : i32, i32, i32
  }
}

</mosaic_0001>

<bundles_post_ra>
// kernel: pos_displace_forward.2
= control target key start
LH: loop header
LB: loop body
LE: loop exit
PB: predicated region body
PF: predicated region fallthrough
CT: control target
= control target key end

     0   :  { %s2221_s18 = smov 0   ;;  %s2223_s19 = smov 0   ;;  %s3071_s0 = inlined_call_operand.vmem [shape: f32[2,3,128], index: 0, kind: input, shape index: {}]   ;;  %s3072_s1 = inlined_call_operand.vmem [shape: f32[3,192,1], index: 1, kind: input, shape index: {}]   ;;  %s3073_s2 = inlined_call_operand.vmem [shape: f32[128,64], index: 2, kind: input, shape index: {}]   ;;  %s3074_s3 = inlined_call_operand.vmem [shape: f32[128,128], index: 3, kind: input, shape index: {}]   ;;  %s3075_s4 = inlined_call_operand.vmem [shape: f32[448,1], index: 4, kind: input, shape index: {}]   ;;  %s3076_s5 = inlined_call_operand.vmem [shape: f32[2,1,128,1], index: 5, kind: output, shape index: {}]  }
   0x1   :  { %s2225_s20 = smov 0  }
   0x2 LB: > { %s34_s21 = sadd.s32 1, %s2183_s19  ;;  %p1850_p0 = scmp.ge.s32.totalorder %s2187_s20, 1  ;;  %s2187_s20 = sphi %s2225_s20, %s15_s20   ;;  %s2183_s19 = sphi %s2223_s19, %s3078_s19   ;;  %s2179_s18 = sphi %s2221_s18, %s3077_s18  }
   0x3   : > { %p36_p1 = scmp.ge.s32.totalorder %s34_s21, 2  ;;  %p216_p2 = scmp.lt.s32.totalorder %s2187_s20, 3 }
   0x5   : > { %s3080_s21 = smov (%p36_p1, %s34_s21), 0  ;;  %p217_p3 = pnand %p1850_p0, %p216_p2 }
   0x6   : > { %v1870_v0 = vld [vmem:[%s3072_s1 + $0x140] sm:$0xff] (!%p217_p3)  ;;  %v2189_v2 = vmov (!%p217_p3), 0   ;;  %v1871_v3 = vld [vmem:[%s3072_s1 + $0x148] sm:$0xff] (!%p217_p3)  ;;  %v366_v7 = vld [vmem:[%s3072_s1 + $0x98] sm:$0xff] (!%p217_p3)  ;;  %vm1177_vm0 = vcmask (!%p217_p3), 523264   ;;  %p252_p4 = scmp.lt.s32.totalorder (!%p217_p3), %s2179_s18, 1 }
   0x7   : > { %220 = sbr.rel (%p217_p3) target bundleno = 852 (0x354), region = 40  ;;  %v363_v1 = vld [vmem:[%s3072_s1 + $0x80] sm:$0xff] (!%p217_p3)  ;;  %2164 = vset.pattern.permute.xlu1 (!%p217_p3), %v2189_v2  ;;  %2163 = vset.pattern.permute.xlu0 (!%p217_p3), %v2189_v2  ;;  %v364_v4 = vld [vmem:[%s3072_s1 + $0x88] sm:$0xff] (!%p217_p3)  ;;  %v365_v8 = vld [vmem:[%s3072_s1 + $0x90] sm:$0xff] (!%p217_p3) }
   0x8   : > { %626 = vperm.xlu1 (!%p217_p3), %2164, %v1870_v0   ;;  %453 = vperm.xlu0 (!%p217_p3), %2163, %v363_v1   ;;  %v1895_v5 = vld [vmem:[%s3072_s1 + $0x208] sm:$0xff] (!%p217_p3)  ;;  %v1894_v6 = vld [vmem:[%s3072_s1 + $0x200] sm:$0xff] (!%p217_p3)  ;;  %v1873_v9 = vld [vmem:[%s3072_s1 + $0x158] sm:$0xff] (!%p217_p3) }
   0x9   : > { %v1872_v10 = vld [vmem:[%s3072_s1 + $0x150] sm:$0xff] (!%p217_p3)  ;;  %v1897_v11 = vld [vmem:[%s3072_s1 + $0x218] sm:$0xff] (!%p217_p3)  ;;  %v308_v13 = vld [vmem:[%s3075_s4 + $0x88] sm:$0xff] (!%p217_p3) }
   0xa   : > { %v1896_v12 = vld [vmem:[%s3072_s1 + $0x210] sm:$0xff] (!%p217_p3)  ;;  %v307_v14 = vld [vmem:[%s3075_s4 + $0x80] sm:$0xff] (!%p217_p3)  ;;  %v368_v15 = vld [vmem:[%s3072_s1 + $0xa8] sm:$0xff] (!%p217_p3) }
   0xb   : > { %v367_v16 = vld [vmem:[%s3072_s1 + $0xa0] sm:$0xff] (!%p217_p3)  ;;  %v1875_v17 = vld [vmem:[%s3072_s1 + $0x168] sm:$0xff] (!%p217_p3)  ;;  %v310_v21 = vld [vmem:[%s3075_s4 + $0x98] sm:$0xff] (!%p217_p3) }
   0xc   : > { %631 = vperm.xlu1 (!%p217_p3), %2164, %v1871_v3   ;;  %458 = vperm.xlu0 (!%p217_p3), %2163, %v364_v4   ;;  %v1874_v18 = vld [vmem:[%s3072_s1 + $0x160] sm:$0xff] (!%p217_p3)  ;;  %v1899_v19 = vld [vmem:[%s3072_s1 + $0x228] sm:$0xff] (!%p217_p3)  ;;  %v309_v22 = vld [vmem:[%s3075_s4 + $0x90] sm:$0xff] (!%p217_p3)  ;;  %v491_v4 = vlaneseq (!%p217_p3) }
   0xd   : > { %v1898_v20 = vld [vmem:[%s3072_s1 + $0x220] sm:$0xff] (!%p217_p3)  ;;  %v370_v23 = vld [vmem:[%s3072_s1 + $0xb8] sm:$0xff] (!%p217_p3)  ;;  %v369_v24 = vld [vmem:[%s3072_s1 + $0xb0] sm:$0xff] (!%p217_p3) }
   0xe   : > { %v1877_v25 = vld [vmem:[%s3072_s1 + $0x178] sm:$0xff]  ;;  %v1876_v26 = vld [vmem:[%s3072_s1 + $0x170] sm:$0xff]  ;;  %v312_v29 = vld [vmem:[%s3075_s4 + $0xa8] sm:$0xff]  ;;  %s3082_s18 = smov (!%p252_p4, %s2179_s18), 1 }
   0xf   : > { %v1901_v27 = vld [vmem:[%s3072_s1 + $0x238] sm:$0xff]  ;;  %v1900_v28 = vld [vmem:[%s3072_s1 + $0x230] sm:$0xff]  ;;  %v311_v30 = vld [vmem:[%s3075_s4 + $0xa0] sm:$0xff]  ;;  %s1851_s9 = sshll.u32 %s3082_s18, 2  ;;  %s1920_s6 = sshll.u32 %s3082_s18, 7 }
  0x10   : > { %828 = vperm.xlu1 %2164, %v1895_v5   ;;  %823 = vperm.xlu0 %2163, %v1894_v6   ;;  %v314_v31 = vld [vmem:[%s3075_s4 + $0xb8] sm:$0xff]  ;;  %v313_v32 = vld [vmem:[%s3075_s4 + $0xb0] sm:$0xff]  ;;  %v348_v33 = vld [vmem:[%s3072_s1 + $0x8] sm:$0xff]  ;;  %s258_s12 = scalar_lea.vmem %s3071_s0, %s1851_s9  ;;  %s2920_s9 = scalar_lea.vmem %s3076_s5, %s1920_s6 }
  0x11   : > { %v347_v34 = vld [vmem:[%s3072_s1] sm:$0xff]  ;;  %v350_v35 = vld [vmem:[%s3072_s1 + $0x18] sm:$0xff]  ;;  %v349_v36 = vld [vmem:[%s3072_s1 + $0x10] sm:$0xff] }
  0x12   : > { %v316_v37 = vld [vmem:[%s3075_s4 + $0xc8] sm:$0xff]  ;;  %v315_v38 = vld [vmem:[%s3075_s4 + $0xc0] sm:$0xff]  ;;  %v318_v40 = vld [vmem:[%s3075_s4 + $0xd8] sm:$0xff] }
  0x13   : > { %v1081_v39 = vld [vmem:[%s3073_s2] sm:$0xff]  ;;  %v317_v41 = vld [vmem:[%s3075_s4 + $0xd0] sm:$0xff]  ;;  %v320_v42 = vld [vmem:[%s3075_s4 + $0xe8] sm:$0xff] }
  0x14   : > { %468 = vperm.xlu1 %2164, %v366_v7   ;;  %463 = vperm.xlu0 %2163, %v365_v8   ;;  %v319_v43 = vld [vmem:[%s3075_s4 + $0xe0] sm:$0xff]  ;;  %v322_v44 = vld [vmem:[%s3075_s4 + $0xf8] sm:$0xff]  ;;  %v321_v45 = vld [vmem:[%s3075_s4 + $0xf0] sm:$0xff] }
  0x15   : > { %1993 = vmatprep.mubr.msk.f32.mxu0 %vm1177_vm0, %v1081_v39  ;;  %v324_v46 = vld [vmem:[%s3075_s4 + $0x108] sm:$0xff]  ;;  %v323_v47 = vld [vmem:[%s3075_s4 + $0x100] sm:$0xff]  ;;  %v326_v48 = vld [vmem:[%s3075_s4 + $0x118] sm:$0xff] }
  0x16   : > { %v325_v49 = vld [vmem:[%s3075_s4 + $0x110] sm:$0xff]  ;;  %v328_v50 = vld [vmem:[%s3075_s4 + $0x128] sm:$0xff]  ;;  %v327_v51 = vld [vmem:[%s3075_s4 + $0x120] sm:$0xff] }
  0x17   : > { %v330_v52 = vld [vmem:[%s3075_s4 + $0x138] sm:$0xff]  ;;  %v329_v53 = vld [vmem:[%s3075_s4 + $0x130] sm:$0xff]  ;;  %v352_v54 = vld [vmem:[%s3072_s1 + $0x28] sm:$0xff] }
  0x18   : > { %641 = vperm.xlu1 %2164, %v1873_v9   ;;  %636 = vperm.xlu0 %2163, %v1872_v10   ;;  %v351_v55 = vld [vmem:[%s3072_s1 + $0x20] sm:$0xff]  ;;  %v354_v56 = vld [vmem:[%s3072_s1 + $0x38] sm:$0xff]  ;;  %v353_v57 = vld [vmem:[%s3072_s1 + $0x30] sm:$0xff]  ;;  %v492_v9 = vshrl.u32 %v491_v4, 7 }
  0x19   : > { %v356_v58 = vld [vmem:[%s3072_s1 + $0x48] sm:$0xff]  ;;  %v355_v59 = vld [vmem:[%s3072_s1 + $0x40] sm:$0xff]  ;;  %v358_v60 = vld [vmem:[%s3072_s1 + $0x58] sm:$0xff] }
  0x1a   : > { %v357_v61 = vld [vmem:[%s3072_s1 + $0x50] sm:$0xff]  ;;  %v360_v62 = vld [vmem:[%s3072_s1 + $0x68] sm:$0xff]  ;;  %v359_v63 = vld [vmem:[%s3072_s1 + $0x60] sm:$0xff] }
  0x1b   : > { %v362_v0 = vld [vmem:[%s3072_s1 + $0x78] sm:$0xff]  ;;  %v361_v1 = vld [vmem:[%s3072_s1 + $0x70] sm:$0xff]  ;;  %v1855_v2 = vld [vmem:[%s3072_s1 + $0xc8] sm:$0xff] }
  0x1c   : > { %838 = vperm.xlu1 %2164, %v1897_v11   ;;  %833 = vperm.xlu0 %2163, %v1896_v12   ;;  %v1854_v3 = vld [vmem:[%s3072_s1 + $0xc0] sm:$0xff]  ;;  %v1857_v7 = vld [vmem:[%s3072_s1 + $0xd8] sm:$0xff]  ;;  %v1856_v8 = vld [vmem:[%s3072_s1 + $0xd0] sm:$0xff] }
  0x1d   : > { %v1859_v12 = vld [vmem:[%s3072_s1 + $0xe8] sm:$0xff] }
  0x20   : > { %1000 = vperm.xlu1 %2164, %v308_v13   ;;  %995 = vperm.xlu0 %2163, %v307_v14   ;;  %v1858_v13 = vld [vmem:[%s3072_s1 + $0xe0] sm:$0xff]  ;;  %v666_v14 = vsub.s32 1, %v492_v9 }
  0x24   : > { %478 = vperm.xlu1 %2164, %v368_v15   ;;  %473 = vperm.xlu0 %2163, %v367_v16  }
  0x28   : > { %651 = vperm.xlu1 %2164, %v1875_v17   ;;  %646 = vperm.xlu0 %2163, %v1874_v18   ;;  %v290_v17 = vld [vmem:[%s258_s12] sm:$0x7]  ;;  %v493_v18 = vsub.s32 0, %v492_v9 }
  0x2c   : > { %848 = vperm.xlu1 %2164, %v1899_v19   ;;  %843 = vperm.xlu0 %2163, %v1898_v20   ;;  %v1861_v19 = vld [vmem:[%s3072_s1 + $0xf8] sm:$0xff]  ;;  %v1860_v20 = vld [vmem:[%s3072_s1 + $0xf0] sm:$0xff] }
  0x30   : > { %1010 = vperm.xlu1 %2164, %v310_v21   ;;  %1005 = vperm.xlu0 %2163, %v309_v22   ;;  %v863_v21 = vsub.s32 2, %v492_v9  ;;  %v2469_v22 = vrot.slane %v290_v17, %v666_v14 }
  0x34   : > { %488 = vperm.xlu1 %2164, %v370_v23   ;;  %483 = vperm.xlu0 %2163, %v369_v24  }
  0x38   : > { %661 = vperm.xlu1 %2164, %v1877_v25   ;;  %656 = vperm.xlu0 %2163, %v1876_v26   ;;  %v2471_v25 = vrot.slane %v290_v17, %v493_v18  ;;  %v1863_v26 = vld [vmem:[%s3072_s1 + $0x108] sm:$0xff] }
  0x3c   : > { %858 = vperm.xlu1 %2164, %v1901_v27   ;;  %853 = vperm.xlu0 %2163, %v1900_v28   ;;  %v1862_v27 = vld [vmem:[%s3072_s1 + $0x100] sm:$0xff]  ;;  %v2479_v28 = vrot.slane %v290_v17, %v863_v21  ;;  %v1884_v21 = vld [vmem:[%s3072_s1 + $0x1b0] sm:$0xff] }
  0x40   : > { %1020 = vperm.xlu1 %2164, %v312_v29   ;;  %1015 = vperm.xlu0 %2163, %v311_v30  }
  0x44   : > { %1030 = vperm.xlu1 %2164, %v314_v31   ;;  %1025 = vperm.xlu0 %2163, %v313_v32  }
  0x48   : > { %378 = vperm.xlu1 %2164, %v348_v33   ;;  %373 = vperm.xlu0 %2163, %v347_v34  }
  0x4c   : > { %388 = vperm.xlu1 %2164, %v350_v35   ;;  %383 = vperm.xlu0 %2163, %v349_v36   ;;  %v1865_v35 = vld [vmem:[%s3072_s1 + $0x118] sm:$0xff]  ;;  %v1864_v36 = vld [vmem:[%s3072_s1 + $0x110] sm:$0xff] }
  0x50   : > { %1104 = vperm.xlu1 %2164, %v316_v37   ;;  %1099 = vperm.xlu0 %2163, %v315_v38  }
  0x54   : > { %1114 = vperm.xlu1 %2164, %v318_v40   ;;  %1109 = vperm.xlu0 %2163, %v317_v41  }
  0x58   : > { %1124 = vperm.xlu1 %2164, %v320_v42   ;;  %1119 = vperm.xlu0 %2163, %v319_v43   ;;  %v1867_v43 = vld [vmem:[%s3072_s1 + $0x128] sm:$0xff] }
  0x5c   : > { %1134 = vperm.xlu1 %2164, %v322_v44   ;;  %1129 = vperm.xlu0 %2163, %v321_v45   ;;  %v1866_v44 = vld [vmem:[%s3072_s1 + $0x120] sm:$0xff] }
  0x60   : > { %1144 = vperm.xlu1 %2164, %v324_v46   ;;  %1139 = vperm.xlu0 %2163, %v323_v47  }
  0x64   : > { %1154 = vperm.xlu1 %2164, %v326_v48   ;;  %1149 = vperm.xlu0 %2163, %v325_v49  }
  0x68   : > { %1164 = vperm.xlu1 %2164, %v328_v50   ;;  %1159 = vperm.xlu0 %2163, %v327_v51   ;;  %v1869_v51 = vld [vmem:[%s3072_s1 + $0x138] sm:$0xff] }
  0x6c   : > { %1174 = vperm.xlu1 %2164, %v330_v52   ;;  %1169 = vperm.xlu0 %2163, %v329_v53   ;;  %v1868_v52 = vld [vmem:[%s3072_s1 + $0x130] sm:$0xff] }
  0x70   : > { %398 = vperm.xlu1 %2164, %v352_v54   ;;  %393 = vperm.xlu0 %2163, %v351_v55  }
  0x74   : > { %408 = vperm.xlu1 %2164, %v354_v56   ;;  %403 = vperm.xlu0 %2163, %v353_v57  }
  0x78   : > { %418 = vperm.xlu1 %2164, %v356_v58   ;;  %413 = vperm.xlu0 %2163, %v355_v59   ;;  %v1879_v59 = vld [vmem:[%s3072_s1 + $0x188] sm:$0xff] }
  0x7c   : > { %428 = vperm.xlu1 %2164, %v358_v60   ;;  %423 = vperm.xlu0 %2163, %v357_v61   ;;  %v1878_v61 = vld [vmem:[%s3072_s1 + $0x180] sm:$0xff] }
  0x80   : > { %438 = vperm.xlu1 %2164, %v360_v62   ;;  %433 = vperm.xlu0 %2163, %v359_v63  }
  0x84   : > { %448 = vperm.xlu1 %2164, %v362_v0   ;;  %443 = vperm.xlu0 %2163, %v361_v1  }
  0x87   : > { %v627_v5 = vpop.permute.xlu1 %626  ;;  %v454_v6 = vpop.permute.xlu0 %453 }
  0x88   : > { %551 = vperm.xlu1 %2164, %v1855_v2   ;;  %546 = vperm.xlu0 %2163, %v1854_v3   ;;  %v684_v29 = vmul.f32 %v2469_v22, %v627_v5  ;;  %v511_v32 = vmul.f32 %v2471_v25, %v454_v6  ;;  %v1881_v2 = vld [vmem:[%s3072_s1 + $0x198] sm:$0xff] }
  0x8a   : > { %v708_v41 = vadd.f32 %v684_v29, %v511_v32  ;;  %v1887_v32 = vld [vmem:[%s3072_s1 + $0x1c8] sm:$0xff] }
  0x8b   : > { %v632_v10 = vpop.permute.xlu1 %631  ;;  %v459_v11 = vpop.permute.xlu0 %458 }
  0x8c   : > { %561 = vperm.xlu1 %2164, %v1857_v7   ;;  %556 = vperm.xlu0 %2163, %v1856_v8   ;;  %v685_v33 = vmul.f32 %v2469_v22, %v632_v10  ;;  %v512_v34 = vmul.f32 %v2471_v25, %v459_v11  ;;  %v1880_v7 = vld [vmem:[%s3072_s1 + $0x190] sm:$0xff] }
  0x8e   : > { %v709_v42 = vadd.f32 %v685_v33, %v512_v34  ;;  %v1886_v33 = vld [vmem:[%s3072_s1 + $0x1c0] sm:$0xff] }
  0x8f   : > { %v829_v15 = vpop.permute.xlu1 %828  ;;  %v824_v16 = vpop.permute.xlu0 %823 }
  0x90   : > { %571 = vperm.xlu1 %2164, %v1859_v12   ;;  %566 = vperm.xlu0 %2163, %v1858_v13   ;;  %v882_v37 = vmul.f32 %v2479_v28, %v829_v15  ;;  %v881_v38 = vmul.f32 %v2479_v28, %v824_v16  ;;  %v1883_v12 = vld [vmem:[%s3072_s1 + $0x1a8] sm:$0xff]  ;;  %v1882_v15 = vld [vmem:[%s3072_s1 + $0x1a0] sm:$0xff] }
  0x92   : > { %v906_v45 = vadd.f32 %v882_v37, %v709_v42  ;;  %v905_v46 = vadd.f32 %v881_v38, %v708_v41  ;;  %v1889_v38 = vld [vmem:[%s3072_s1 + $0x1d8] sm:$0xff] }
  0x93   : > { %v469_v23 = vpop.permute.xlu1 %468  ;;  %v464_v24 = vpop.permute.xlu0 %463 }
  0x94   : > { %581 = vperm.xlu1 %2164, %v1861_v19   ;;  %576 = vperm.xlu0 %2163, %v1860_v20   ;;  %v514_v3 = vmul.f32 %v2471_v25, %v469_v23  ;;  %v513_v4 = vmul.f32 %v2471_v25, %v464_v24  ;;  %v1885_v20 = vld [vmem:[%s3072_s1 + $0x1b8] sm:$0xff] }
  0x97   : > { %v642_v30 = vpop.permute.xlu1 %641  ;;  %v637_v31 = vpop.permute.xlu0 %636 }
  0x98   : > { %591 = vperm.xlu1 %2164, %v1863_v26   ;;  %586 = vperm.xlu0 %2163, %v1862_v27   ;;  %v687_v0 = vmul.f32 %v2469_v22, %v642_v30  ;;  %v686_v1 = vmul.f32 %v2469_v22, %v637_v31 }
  0x9a   : > { %v711_v10 = vadd.f32 %v687_v0, %v514_v3  ;;  %v710_v11 = vadd.f32 %v686_v1, %v513_v4  ;;  %v1892_v3 = vld [vmem:[%s3072_s1 + $0x1f0] sm:$0xff] }
  0x9b   : > { %v839_v39 = vpop.permute.xlu1 %838  ;;  %v834_v40 = vpop.permute.xlu0 %833 }
  0x9c   : > { %601 = vperm.xlu1 %2164, %v1865_v35   ;;  %596 = vperm.xlu0 %2163, %v1864_v36   ;;  %v884_v5 = vmul.f32 %v2479_v28, %v839_v39  ;;  %v883_v6 = vmul.f32 %v2479_v28, %v834_v40 }
  0x9e   : > { %v908_v13 = vadd.f32 %v884_v5, %v711_v10  ;;  %v907_v14 = vadd.f32 %v883_v6, %v710_v11 }
  0x9f   : > { %v1001_v47 = vpop.permute.xlu1 %1000  ;;  %v996_v48 = vpop.permute.xlu0 %995 }
  0xa0   : > { %v1050_v49 = vadd.f32 %v1001_v47, %v906_v45  ;;  %v1049_v50 = vadd.f32 %v996_v48, %v905_v46  ;;  %611 = vperm.xlu1 %2164, %v1867_v43   ;;  %606 = vperm.xlu0 %2163, %v1866_v44   ;;  %v1888_v43 = vld [vmem:[%s3072_s1 + $0x1d0] sm:$0xff] }
  0xa2   : > { %v1066_v53 = vmul.f32 0.2, %v1050_v49  ;;  %v1065_v54 = vmul.f32 0.2, %v1049_v50  ;;  %vm1057_vm1 = vcmp.gt.f32.partialorder %v1049_v50, 0.0  ;;  %vm1058_vm2 = vcmp.gt.f32.partialorder %v1050_v49, 0.0 }
  0xa3   : > { %v2505_v55 = vpop.permute.xlu1 %478  ;;  %v2507_v56 = vpop.permute.xlu0 %473 }
  0xa4   : > { %621 = vperm.xlu1 %2164, %v1869_v51   ;;  %616 = vperm.xlu0 %2163, %v1868_v52   ;;  %v1073_v57 = vsel %vm1057_vm1, %v1049_v50, %v1065_v54  ;;  %v1074_v58 = vsel %vm1058_vm2, %v1050_v49, %v1066_v53  ;;  %v516_v39 = vmul.f32 %v2471_v25, %v2505_v55  ;;  %v1891_v54 = vld [vmem:[%s3072_s1 + $0x1e8] sm:$0xff] }
  0xa5   : > { %v2073_v60 = vpack.c.bf16 %v1074_v58, %v1073_v57  ;;  %v515_v40 = vmul.f32 %v2471_v25, %v2507_v56  ;;  %v1890_v57 = vld [vmem:[%s3072_s1 + $0x1e0] sm:$0xff] }
  0xa7   : > { %v652_v62 = vpop.permute.xlu1 %651  ;;  %v647_v63 = vpop.permute.xlu0 %646  ;;  %2074 = vmatprep.subr.bf16.mxu0 %v2073_v60 }
  0xa8   : > { %748 = vperm.xlu1 %2164, %v1879_v59   ;;  %743 = vperm.xlu0 %2163, %v1878_v61   ;;  %v689_v36 = vmul.f32 %v2469_v22, %v652_v62  ;;  %v688_v37 = vmul.f32 %v2469_v22, %v647_v63 }
  0xa9   : > { %2076 = vmatpush3.bf16.msra.mxu0 %v2073_v60 }
  0xaa   : > { %v713_v48 = vadd.f32 %v689_v36, %v516_v39  ;;  %v712_v49 = vadd.f32 %v688_v37, %v515_v40  ;;  %v298_v36 = vld [vmem:[%s3075_s4 + $0x38] sm:$0xff]  ;;  %v297_v37 = vld [vmem:[%s3075_s4 + $0x30] sm:$0xff] }
  0xab   : > { %v849_v8 = vpop.permute.xlu1 %848  ;;  %v844_v9 = vpop.permute.xlu0 %843 }
  0xac   : > { %758 = vperm.xlu1 %2164, %v1881_v2   ;;  %753 = vperm.xlu0 %2163, %v1880_v7   ;;  %v886_v41 = vmul.f32 %v2479_v28, %v849_v8  ;;  %v885_v42 = vmul.f32 %v2479_v28, %v844_v9  ;;  %v1893_v2 = vld [vmem:[%s3072_s1 + $0x1f8] sm:$0xff] }
  0xae   : > { %v910_v55 = vadd.f32 %v886_v41, %v713_v48  ;;  %v909_v56 = vadd.f32 %v885_v42, %v712_v49  ;;  %v1086_v41 = vld [vmem:[%s3073_s2 + $0x28] sm:$0xff]  ;;  %v302_v48 = vld [vmem:[%s3075_s4 + $0x58] sm:$0xff]  ;;  %v301_v49 = vld [vmem:[%s3075_s4 + $0x50] sm:$0xff] }
  0xaf   : > { %v1011_v16 = vpop.permute.xlu1 %1010  ;;  %v1006_v17 = vpop.permute.xlu0 %1005  ;;  %v300_v42 = vld [vmem:[%s3075_s4 + $0x48] sm:$0xff] }
  0xb0   : > { %v1052_v18 = vadd.f32 %v1011_v16, %v908_v13  ;;  %v1051_v19 = vadd.f32 %v1006_v17, %v907_v14  ;;  %768 = vperm.xlu1 %2164, %v1883_v12   ;;  %763 = vperm.xlu0 %2163, %v1882_v15   ;;  %v292_v13 = vld [vmem:[%s3075_s4 + $0x8] sm:$0xff]  ;;  %v291_v14 = vld [vmem:[%s3075_s4] sm:$0xff] }
  0xb2   : > { %vm1060_vm3 = vcmp.gt.f32.partialorder %v1052_v18, 0.0  ;;  %v1068_v23 = vmul.f32 0.2, %v1052_v18  ;;  %vm1059_vm4 = vcmp.gt.f32.partialorder %v1051_v19, 0.0  ;;  %v1067_v24 = vmul.f32 0.2, %v1051_v19 }
  0xb3   : > { %v489_v26 = vpop.permute.xlu1 %488  ;;  %v484_v27 = vpop.permute.xlu0 %483 }
  0xb4   : > { %778 = vperm.xlu1 %2164, %v1885_v20   ;;  %v1075_v29 = vsel %vm1059_vm4, %v1051_v19, %v1067_v24  ;;  %v1076_v30 = vsel %vm1060_vm3, %v1052_v18, %v1068_v23  ;;  %773 = vperm.xlu0 %2163, %v1884_v21   ;;  %v518_v50 = vmul.f32 %v2471_v25, %v489_v26  ;;  %v294_v21 = vld [vmem:[%s3075_s4 + $0x18] sm:$0xff]  ;;  %v293_v24 = vld [vmem:[%s3075_s4 + $0x10] sm:$0xff] }
  0xb5   : > { %v2077_v31 = vpack.c.bf16 %v1076_v30, %v1075_v29  ;;  %v517_v51 = vmul.f32 %v2471_v25, %v484_v27  ;;  %v1082_v29 = vld [vmem:[%s3073_s2 + $0x8] sm:$0xff] }
  0xb6   : > { %v296_v30 = vld [vmem:[%s3075_s4 + $0x28] sm:$0xff] }
  0xb7   : > { %v662_v34 = vpop.permute.xlu1 %661  ;;  %v657_v35 = vpop.permute.xlu0 %656  ;;  %2078 = vmatprep.subr.bf16.mxu0 %v2077_v31 }
  0xb8   : > { %788 = vperm.xlu1 %2164, %v1887_v32   ;;  %2080 = vmatpush3.bf16.msra.mxu0 %v2077_v31  ;;  %v691_v44 = vmul.f32 %v2469_v22, %v662_v34  ;;  %v690_v45 = vmul.f32 %v2469_v22, %v657_v35  ;;  %v295_v31 = vld [vmem:[%s3075_s4 + $0x20] sm:$0xff]  ;;  %v1083_v32 = vld [vmem:[%s3073_s2 + $0x10] sm:$0xff]  ;;  %v1084_v35 = vld [vmem:[%s3073_s2 + $0x18] sm:$0xff] }
  0xb9   : > { %783 = vperm.xlu0 %2163, %v1886_v33  }
  0xba   : > { %v715_v58 = vadd.f32 %v691_v44, %v518_v50  ;;  %v714_v59 = vadd.f32 %v690_v45, %v517_v51  ;;  %v1087_v44 = vld [vmem:[%s3073_s2 + $0x30] sm:$0xff]  ;;  %v1089_v50 = vld [vmem:[%s3073_s2 + $0x40] sm:$0xff] }
  0xbb   : > { %v859_v46 = vpop.permute.xlu1 %858  ;;  %v854_v47 = vpop.permute.xlu0 %853 }
  0xbc   : > { %798 = vperm.xlu1 %2164, %v1889_v38   ;;  %v888_v52 = vmul.f32 %v2479_v28, %v859_v46  ;;  %v887_v53 = vmul.f32 %v2479_v28, %v854_v47  ;;  %v1085_v38 = vld [vmem:[%s3073_s2 + $0x20] sm:$0xff]  ;;  %v1088_v47 = vld [vmem:[%s3073_s2 + $0x38] sm:$0xff] }
  0xbd   : > { %793 = vperm.xlu0 %2163, %v1888_v43   ;;  %v299_v43 = vld [vmem:[%s3075_s4 + $0x40] sm:$0xff] }
  0xbe   : > { %v912_v0 = vadd.f32 %v888_v52, %v715_v58  ;;  %v911_v1 = vadd.f32 %v887_v53, %v714_v59  ;;  %v1090_v53 = vld [vmem:[%s3073_s2 + $0x48] sm:$0xff]  ;;  %v1092_v59 = vld [vmem:[%s3073_s2 + $0x58] sm:$0xff] }
  0xbf   : > { %v1021_v60 = vpop.permute.xlu1 %1020  ;;  %v1016_v61 = vpop.permute.xlu0 %1015 }
  0xc0   : > { %v1054_v62 = vadd.f32 %v1021_v60, %v910_v55  ;;  %v1053_v63 = vadd.f32 %v1016_v61, %v909_v56  ;;  %808 = vperm.xlu1 %2164, %v1891_v54   ;;  %v304_v54 = vld [vmem:[%s3075_s4 + $0x68] sm:$0xff]  ;;  %v303_v55 = vld [vmem:[%s3075_s4 + $0x60] sm:$0xff]  ;;  %v1091_v56 = vld [vmem:[%s3073_s2 + $0x50] sm:$0xff] }
  0xc1   : > { %803 = vperm.xlu0 %2163, %v1890_v57   ;;  %v306_v60 = vld [vmem:[%s3075_s4 + $0x78] sm:$0xff]  ;;  %v305_v61 = vld [vmem:[%s3075_s4 + $0x70] sm:$0xff] }
  0xc2   : > { %vm1062_vm5 = vcmp.gt.f32.partialorder %v1054_v62, 0.0  ;;  %v1070_v4 = vmul.f32 0.2, %v1054_v62  ;;  %vm1061_vm6 = vcmp.gt.f32.partialorder %v1053_v63, 0.0  ;;  %v1069_v5 = vmul.f32 0.2, %v1053_v63 }
  0xc3   : > { %v1031_v6 = vpop.permute.xlu1 %1030  ;;  %v1026_v7 = vpop.permute.xlu0 %1025 }
  0xc4   : > { %v1056_v8 = vadd.f32 %v1031_v6, %v912_v0  ;;  %v1055_v9 = vadd.f32 %v1026_v7, %v911_v1  ;;  %818 = vperm.xlu1 %2164, %v1893_v2   ;;  %v1077_v10 = vsel %vm1061_vm6, %v1053_v63, %v1069_v5  ;;  %v1078_v11 = vsel %vm1062_vm5, %v1054_v62, %v1070_v4  ;;  %v1093_v62 = vld [vmem:[%s3073_s2 + $0x60] sm:$0xff]  ;;  %v1094_v1 = vld [vmem:[%s3073_s2 + $0x68] sm:$0xff]  ;;  %v1095_v4 = vld [vmem:[%s3073_s2 + $0x70] sm:$0xff] }
  0xc5   : > { %813 = vperm.xlu0 %2163, %v1892_v3   ;;  %v2081_v12 = vpack.c.bf16 %v1078_v11, %v1077_v10  ;;  %v332_v2 = vld [vmem:[%s3075_s4 + $0x148] sm:$0xff]  ;;  %v331_v3 = vld [vmem:[%s3075_s4 + $0x140] sm:$0xff]  ;;  %v1096_v7 = vld [vmem:[%s3073_s2 + $0x78] sm:$0xff] }
  0xc6   : > { %vm1064_vm7 = vcmp.gt.f32.partialorder %v1056_v8, 0.0  ;;  %v1072_v15 = vmul.f32 0.2, %v1056_v8  ;;  %vm1063_vm8 = vcmp.gt.f32.partialorder %v1055_v9, 0.0  ;;  %v1071_v16 = vmul.f32 0.2, %v1055_v9 }
  0xc7   : > { %v2583_v17 = vpop.permute.xlu1 %378  ;;  %v2585_v18 = vpop.permute.xlu0 %373  ;;  %2082 = vmatprep.subr.bf16.mxu0 %v2081_v12 }
  0xc8   : > { %920 = vperm.xlu1 %2164, %v292_v13   ;;  %2084 = vmatpush3.bf16.msra.mxu0 %v2081_v12  ;;  %v1079_v19 = vsel %vm1063_vm8, %v1055_v9, %v1071_v16  ;;  %v1080_v20 = vsel %vm1064_vm7, %v1056_v8, %v1072_v15  ;;  %v334_v8 = vld [vmem:[%s3075_s4 + $0x158] sm:$0xff]  ;;  %v333_v9 = vld [vmem:[%s3075_s4 + $0x150] sm:$0xff]  ;;  %v336_v12 = vld [vmem:[%s3075_s4 + $0x168] sm:$0xff] }
  0xc9   : > { %915 = vperm.xlu0 %2163, %v291_v14   ;;  %v2085_v23 = vpack.c.bf16 %v1080_v20, %v1079_v19  ;;  %v335_v13 = vld [vmem:[%s3075_s4 + $0x160] sm:$0xff]  ;;  %v338_v16 = vld [vmem:[%s3075_s4 + $0x178] sm:$0xff]  ;;  %v337_v19 = vld [vmem:[%s3075_s4 + $0x170] sm:$0xff] }
  0xcb   : > { %v2593_v26 = vpop.permute.xlu1 %388  ;;  %v2595_v27 = vpop.permute.xlu0 %383  ;;  %2086 = vmatprep.subr.bf16.mxu0 %v2085_v23 }
  0xcc   : > { %930 = vperm.xlu1 %2164, %v294_v21   ;;  %2088 = vmatpush3.bf16.msra.mxu0 %v2085_v23  ;;  %v340_v23 = vld [vmem:[%s3075_s4 + $0x188] sm:$0xff] }
  0xcd   : > { %925 = vperm.xlu0 %2163, %v293_v24   ;;  %v339_v24 = vld [vmem:[%s3075_s4 + $0x180] sm:$0xff] }
  0xcf   : > { %v2609_v33 = vpop.permute.xlu1 %1104  ;;  %v2611_v34 = vpop.permute.xlu0 %1099  ;;  %1994 = vmatmul.mubr.msk.f32.vlgmr.msra.gmra.mrb[0].mxu0 %vm1177_vm0, %v1082_v29 }
  0xd0   : > { %940 = vperm.xlu1 %2164, %v296_v30   ;;  %1996 = vmatprep.mubr.msk.f32.mxu0 %vm1177_vm0, %v1083_v32  ;;  %v341_v32 = vld [vmem:[%s3075_s4 + $0x190] sm:$0xff] }
  0xd1   : > { %935 = vperm.xlu0 %2163, %v295_v31   ;;  %v342_v31 = vld [vmem:[%s3075_s4 + $0x198] sm:$0xff] }
  0xd3   : > { %v2627_v39 = vpop.permute.xlu1 %1114  ;;  %v2629_v40 = vpop.permute.xlu0 %1109  ;;  %1997 = vmatmul.mubr.msk.f32.gmra.mrb[2].mxu0 %vm1177_vm0, %v1084_v35 }
  0xd4   : > { %950 = vperm.xlu1 %2164, %v298_v36   ;;  %1999 = vmatprep.mubr.msk.f32.mxu0 %vm1177_vm0, %v1085_v38  ;;  %v343_v38 = vld [vmem:[%s3075_s4 + $0x1a0] sm:$0xff] }
  0xd5   : > { %945 = vperm.xlu0 %2163, %v297_v37   ;;  %v344_v37 = vld [vmem:[%s3075_s4 + $0x1a8] sm:$0xff] }
  0xd7   : > { %v2645_v45 = vpop.permute.xlu1 %1124  ;;  %v2647_v46 = vpop.permute.xlu0 %1119  ;;  %2000 = vmatmul.mubr.msk.f32.gmra.mrb[4].mxu0 %vm1177_vm0, %v1086_v41 }
  0xd8   : > { %960 = vperm.xlu1 %2164, %v300_v42   ;;  %2002 = vmatprep.mubr.msk.f32.mxu0 %vm1177_vm0, %v1087_v44  ;;  %v345_v44 = vld [vmem:[%s3075_s4 + $0x1b0] sm:$0xff] }
  0xd9   : > { %955 = vperm.xlu0 %2163, %v299_v43   ;;  %v346_v43 = vld [vmem:[%s3075_s4 + $0x1b8] sm:$0xff] }
  0xdb   : > { %v2663_v51 = vpop.permute.xlu1 %1134  ;;  %v2665_v52 = vpop.permute.xlu0 %1129  ;;  %2003 = vmatmul.mubr.msk.f32.gmra.mrb[6].mxu0 %vm1177_vm0, %v1088_v47 }
  0xdc   : > { %970 = vperm.xlu1 %2164, %v302_v48   ;;  %2005 = vmatprep.mubr.msk.f32.mxu0 %vm1177_vm0, %v1089_v50 }
  0xdd   : > { %965 = vperm.xlu0 %2163, %v301_v49  }
  0xdf   : > { %v2681_v57 = vpop.permute.xlu1 %1144  ;;  %v2683_v58 = vpop.permute.xlu0 %1139  ;;  %2006 = vmatmul.mubr.msk.f32.gmra.mrb[8].mxu0 %vm1177_vm0, %v1090_v53 }
  0xe0   : > { %980 = vperm.xlu1 %2164, %v304_v54   ;;  %2008 = vmatprep.mubr.msk.f32.mxu0 %vm1177_vm0, %v1091_v56 }
  0xe1   : > { %975 = vperm.xlu0 %2163, %v303_v55  }
  0xe3   : > { %v2699_v63 = vpop.permute.xlu1 %1154  ;;  %v2701_v0 = vpop.permute.xlu0 %1149  ;;  %2009 = vmatmul.mubr.msk.f32.gmra.mrb[10].mxu0 %vm1177_vm0, %v1092_v59 }
  0xe4   : > { %990 = vperm.xlu1 %2164, %v306_v60   ;;  %2011 = vmatprep.mubr.msk.f32.mxu0 %vm1177_vm0, %v1093_v62 }
  0xe5   : > { %985 = vperm.xlu0 %2163, %v305_v61  }
  0xe7   : > { %v2717_v5 = vpop.permute.xlu1 %1164  ;;  %v2719_v6 = vpop.permute.xlu0 %1159  ;;  %2012 = vmatmul.mubr.msk.f32.gmra.mrb[12].mxu0 %vm1177_vm0, %v1094_v1 }
  0xe8   : > { %1442 = vperm.xlu1 %2164, %v332_v2   ;;  %2014 = vmatprep.mubr.msk.f32.mxu0 %vm1177_vm0, %v1095_v4 }
  0xe9   : > { %1437 = vperm.xlu0 %2163, %v331_v3  }
  0xeb   : > { %v2732_v10 = vpop.permute.xlu1 %1174  ;;  %v2734_v11 = vpop.permute.xlu0 %1169  ;;  %2015 = vmatmul.mubr.msk.f32.gmra.mrb[14].mxu0 %vm1177_vm0, %v1096_v7 }
  0xec   : > { %1452 = vperm.xlu1 %2164, %v334_v8  }
  0xed   : > { %1447 = vperm.xlu0 %2163, %v333_v9  }
  0xef   : > { %v399_v14 = vpop.permute.xlu1 %398  ;;  %v394_v15 = vpop.permute.xlu0 %393 }
  0xf0   : > { %1462 = vperm.xlu1 %2164, %v336_v12   ;;  %v500_v59 = vmul.f32 %v2471_v25, %v399_v14  ;;  %v499_v60 = vmul.f32 %v2471_v25, %v394_v15 }
  0xf1   : > { %1457 = vperm.xlu0 %2163, %v335_v13  }
  0xf3   : > { %v409_v20 = vpop.permute.xlu1 %408  ;;  %v404_v21 = vpop.permute.xlu0 %403 }
  0xf4   : > { %1472 = vperm.xlu1 %2164, %v338_v16   ;;  %v502_v7 = vmul.f32 %v2471_v25, %v409_v20  ;;  %v501_v8 = vmul.f32 %v2471_v25, %v404_v21 }
  0xf5   : > { %1467 = vperm.xlu0 %2163, %v337_v19  }
  0xf7   : > { %v419_v29 = vpop.permute.xlu1 %418  ;;  %v414_v30 = vpop.permute.xlu0 %413 }
  0xf8   : > { %1482 = vperm.xlu1 %2164, %v340_v23   ;;  %v504_v19 = vmul.f32 %v2471_v25, %v419_v29  ;;  %v503_v23 = vmul.f32 %v2471_v25, %v414_v30 }
  0xf9   : > { %1477 = vperm.xlu0 %2163, %v339_v24  }
  0xfb   : > { %v429_v35 = vpop.permute.xlu1 %428  ;;  %v424_v36 = vpop.permute.xlu0 %423 }
  0xfc   : > { %1492 = vperm.xlu1 %2164, %v342_v31  }
  0xfd   : > { %1487 = vperm.xlu0 %2163, %v341_v32  }
  0xff   : > { %v439_v41 = vpop.permute.xlu1 %438  ;;  %v434_v42 = vpop.permute.xlu0 %433 }
 0x100   : > { %1502 = vperm.xlu1 %2164, %v344_v37  }
 0x101   : > { %1497 = vperm.xlu0 %2163, %v343_v38   ;;  %v506_v38 = vmul.f32 %v2471_v25, %v429_v35 }
 0x103   : > { %v449_v47 = vpop.permute.xlu1 %448  ;;  %v444_v48 = vpop.permute.xlu0 %443 }
 0x104   : > { %1512 = vperm.xlu1 %2164, %v346_v43   ;;  %v505_v43 = vmul.f32 %v2471_v25, %v424_v36  ;;  %v510_v36 = vmul.f32 %v2471_v25, %v449_v47  ;;  %v495_v47 = vmul.f32 %v2471_v25, %v2585_v18  ;;  %v497_v18 = vmul.f32 %v2471_v25, %v2595_v27 }
 0x105   : > { %1507 = vperm.xlu0 %2163, %v345_v44  }
 0x107   : > { %v552_v49 = vpop.permute.xlu1 %551  ;;  %v547_v50 = vpop.permute.xlu0 %546 }
 0x10b   : > { %v562_v53 = vpop.permute.xlu1 %561  ;;  %v557_v54 = vpop.permute.xlu0 %556 }
 0x10f   : > { %v572_v55 = vpop.permute.xlu1 %571  ;;  %v567_v56 = vpop.permute.xlu0 %566 }
 0x110   : > { %v673_v61 = vmul.f32 %v2469_v22, %v572_v55  ;;  %v672_v62 = vmul.f32 %v2469_v22, %v567_v56 }
 0x112   : > { %v2777_v1 = vadd.f32 %v673_v61, %v500_v59  ;;  %v2779_v2 = vadd.f32 %v672_v62, %v499_v60  ;;  %v508_v60 = vmul.f32 %v2471_v25, %v439_v41  ;;  %v507_v61 = vmul.f32 %v2471_v25, %v434_v42 }
 0x113   : > { %v582_v3 = vpop.permute.xlu1 %581  ;;  %v577_v4 = vpop.permute.xlu0 %576  ;;  %v668_v42 = vmul.f32 %v2469_v22, %v547_v50 }
 0x114   : > { %v675_v9 = vmul.f32 %v2469_v22, %v582_v3  ;;  %v674_v12 = vmul.f32 %v2469_v22, %v577_v4 }
 0x116   : > { %v699_v13 = vadd.f32 %v675_v9, %v502_v7  ;;  %v2785_v14 = vadd.f32 %v674_v12, %v501_v8  ;;  %v509_v9 = vmul.f32 %v2471_v25, %v444_v48  ;;  %v669_v12 = vmul.f32 %v2469_v22, %v552_v49 }
 0x117   : > { %v592_v15 = vpop.permute.xlu1 %591  ;;  %v587_v16 = vpop.permute.xlu0 %586  ;;  %v671_v48 = vmul.f32 %v2469_v22, %v562_v53 }
 0x118   : > { %v677_v24 = vmul.f32 %v2469_v22, %v592_v15  ;;  %v676_v31 = vmul.f32 %v2469_v22, %v587_v16  ;;  %v496_v16 = vmul.f32 %v2471_v25, %v2583_v17  ;;  %v498_v17 = vmul.f32 %v2471_v25, %v2593_v26 }
 0x11a   : > { %v701_v20 = vadd.f32 %v677_v24, %v504_v19  ;;  %v2791_v32 = vadd.f32 %v676_v31, %v503_v23  ;;  %v693_v31 = vadd.f32 %v669_v12, %v496_v16  ;;  %v695_v53 = vadd.f32 %v671_v48, %v498_v17 }
 0x11b   : > { %v602_v21 = vpop.permute.xlu1 %601  ;;  %v597_v37 = vpop.permute.xlu0 %596 }
 0x11c   : > { %v679_v44 = vmul.f32 %v2469_v22, %v602_v21  ;;  %v678_v55 = vmul.f32 %v2469_v22, %v597_v37  ;;  %v692_v37 = vadd.f32 %v668_v42, %v495_v47 }
 0x11e   : > { %v703_v29 = vadd.f32 %v679_v44, %v506_v38  ;;  %v2797_v56 = vadd.f32 %v678_v55, %v505_v43  ;;  %v670_v38 = vmul.f32 %v2469_v22, %v557_v54 }
 0x11f   : > { %v612_v30 = vpop.permute.xlu1 %611  ;;  %v607_v59 = vpop.permute.xlu0 %606 }
 0x120   : > { %v681_v62 = vmul.f32 %v2469_v22, %v612_v30  ;;  %v680_v3 = vmul.f32 %v2469_v22, %v607_v59 }
 0x122   : > { %v705_v35 = vadd.f32 %v681_v62, %v508_v60  ;;  %v2803_v4 = vadd.f32 %v680_v3, %v507_v61  ;;  %v694_v60 = vadd.f32 %v670_v38, %v497_v18 }
 0x123   : > { %v622_v7 = vpop.permute.xlu1 %621  ;;  %v617_v8 = vpop.permute.xlu0 %616 }
 0x124   : > { %v683_v15 = vmul.f32 %v2469_v22, %v622_v7  ;;  %v682_v41 = vmul.f32 %v2469_v22, %v617_v8 }
 0x126   : > { %v707_v19 = vadd.f32 %v683_v15, %v510_v36  ;;  %v2813_v23 = vadd.f32 %v682_v41, %v509_v9 }
 0x127   : > { %v749_v24 = vpop.permute.xlu1 %748  ;;  %v744_v21 = vpop.permute.xlu0 %743 }
 0x128   : > { %v866_v49 = vmul.f32 %v2479_v28, %v749_v24  ;;  %v865_v50 = vmul.f32 %v2479_v28, %v744_v21  ;;  %v1423_v24 = vld [vmem:[%s3074_s3 + $0x20] sm:$0xff] }
 0x129   : > { %2055 = vmatprep.mubr.f32.mxu1 %v1423_v24 }
 0x12a   : > { %v2823_v43 = vadd.f32 %v866_v49, %v693_v31  ;;  %v2827_v55 = vadd.f32 %v865_v50, %v692_v37 }
 0x12b   : > { %v759_v44 = vpop.permute.xlu1 %758  ;;  %v754_v59 = vpop.permute.xlu0 %753 }
 0x12c   : > { %v868_v30 = vmul.f32 %v2479_v28, %v759_v44  ;;  %v867_v22 = vmul.f32 %v2479_v28, %v754_v59 }
 0x12e   : > { %v2831_v54 = vadd.f32 %v868_v30, %v695_v53  ;;  %v2835_v26 = vadd.f32 %v867_v22, %v694_v60 }
 0x12f   : > { %v2833_v61 = vpop.permute.xlu1 %768 }
 0x133   : > { %v779_v62 = vpop.permute.xlu1 %778 }
 0x134   : > { %v872_v3 = vmul.f32 %v2479_v28, %v779_v62 }
 0x136   : > { %v2838_v25 = vadd.f32 %v872_v3, %v699_v13 }
 0x137   : > { %v789_v27 = vpop.permute.xlu1 %788 }
 0x138   : > { %v874_v36 = vmul.f32 %v2479_v28, %v789_v27 }
 0x13a   : > { %v2841_v7 = vadd.f32 %v874_v36, %v701_v20  ;;  %v1419_v20 = vld [vmem:[%s3074_s3] sm:$0xff] }
 0x13b   : > { %v799_v8 = vpop.permute.xlu1 %798  ;;  %2049 = vmatprep.mubr.f32.mxu0 %v1419_v20 }
 0x13c   : > { %v876_v9 = vmul.f32 %v2479_v28, %v799_v8 }
 0x13e   : > { %v2844_v12 = vadd.f32 %v876_v9, %v703_v29 }
 0x13f   : > { %v809_v15 = vpop.permute.xlu1 %808 }
 0x140   : > { %v878_v41 = vmul.f32 %v2479_v28, %v809_v15 }
 0x142   : > { %v2847_v42 = vadd.f32 %v878_v41, %v705_v35 }
 0x143   : > { %v819_v16 = vpop.permute.xlu1 %818 }
 0x144   : > { %v880_v47 = vmul.f32 %v2479_v28, %v819_v16 }
 0x146   : > { %v2850_v13 = vadd.f32 %v880_v47, %v707_v19 }
 0x1a2   : > { %v1995_v29 = vpop.f32.mrb[0].mxu0 }
 0x1a3   : > { %v1298_v31 = vadd.f32 %v1995_v29, %v2609_v33  ;;  %v1292_v35 = vpop.f32.mrb[1].mxu0 }
 0x1a4   : > { %v1293_v48 = vadd.f32 %v1292_v35, %v2611_v34 }
 0x1a5   : > { %vm1372_vm9 = vcmp.gt.f32.partialorder %v1298_v31, 0.0  ;;  %v1388_v49 = vmul.f32 0.2, %v1298_v31 }
 0x1a6   : > { %vm1371_vm10 = vcmp.gt.f32.partialorder %v1293_v48, 0.0  ;;  %v1387_v19 = vmul.f32 0.2, %v1293_v48  ;;  %v1998_v21 = vpop.f32.mrb[2].mxu0 }
 0x1a7   : > { %v1404_v37 = vsel %vm1372_vm9, %v1298_v31, %v1388_v49  ;;  %v1308_v38 = vadd.f32 %v1998_v21, %v2627_v39  ;;  %v1302_v50 = vpop.f32.mrb[3].mxu0  ;;  %vm273_vm9 = vcmask 7168  }
 0x1a8   : > { %v1403_v17 = vsel %vm1371_vm10, %v1293_v48, %v1387_v19  ;;  %v1303_v18 = vadd.f32 %v1302_v50, %v2629_v40 }
 0x1a9   : > { %v2089_v44 = vpack.c.bf16 %v1404_v37, %v1403_v17  ;;  %vm1374_vm11 = vcmp.gt.f32.partialorder %v1308_v38, 0.0  ;;  %v1390_v53 = vmul.f32 0.2, %v1308_v38 }
 0x1aa   : > { %vm1373_vm12 = vcmp.gt.f32.partialorder %v1303_v18, 0.0  ;;  %v1389_v33 = vmul.f32 0.2, %v1303_v18  ;;  %v2001_v30 = vpop.f32.mrb[4].mxu0 }
 0x1ab   : > { %v1406_v59 = vsel %vm1374_vm11, %v1308_v38, %v1390_v53  ;;  %v1318_v34 = vadd.f32 %v2001_v30, %v2645_v45  ;;  %v1312_v60 = vpop.f32.mrb[5].mxu0  ;;  %2090 = vmatprep.subr.bf16.mxu0 %v2089_v44  ;;  %2121 = vmatprep.subr.bf16.mxu1 %v2089_v44 }
 0x1ac   : > { %v1405_v22 = vsel %vm1373_vm12, %v1303_v18, %v1389_v33  ;;  %v1313_v62 = vadd.f32 %v1312_v60, %v2647_v46  ;;  %2092 = vmatpush3.bf16.msra.mxu0 %v2089_v44  ;;  %2129 = vmatpush3.bf16.msra.mxu1 %v2089_v44 }
 0x1ad   : > { %v2093_v39 = vpack.c.bf16 %v1406_v59, %v1405_v22  ;;  %vm1376_vm13 = vcmp.gt.f32.partialorder %v1318_v34, 0.0  ;;  %v1392_v40 = vmul.f32 0.2, %v1318_v34 }
 0x1ae   : > { %vm1375_vm14 = vcmp.gt.f32.partialorder %v1313_v62, 0.0  ;;  %v1391_v3 = vmul.f32 0.2, %v1313_v62  ;;  %v2004_v27 = vpop.f32.mrb[6].mxu0 }
 0x1af   : > { %v1408_v36 = vsel %vm1376_vm13, %v1318_v34, %v1392_v40  ;;  %v1328_v8 = vadd.f32 %v2004_v27, %v2663_v51  ;;  %v1322_v9 = vpop.f32.mrb[7].mxu0  ;;  %2094 = vmatprep.subr.bf16.mxu0 %v2093_v39  ;;  %2122 = vmatprep.subr.bf16.mxu1 %v2093_v39 }
 0x1b0   : > { %v1407_v45 = vsel %vm1375_vm14, %v1313_v62, %v1391_v3  ;;  %v1323_v15 = vadd.f32 %v1322_v9, %v2665_v52  ;;  %2096 = vmatpush3.bf16.msra.mxu0 %v2093_v39  ;;  %2130 = vmatpush3.bf16.msra.mxu1 %v2093_v39  ;;  %v1424_v9 = vld [vmem:[%s3074_s3 + $0x28] sm:$0xff] }
 0x1b1   : > { %v2097_v46 = vpack.c.bf16 %v1408_v36, %v1407_v45  ;;  %vm1378_vm15 = vcmp.gt.f32.partialorder %v1328_v8, 0.0  ;;  %v1394_v41 = vmul.f32 0.2, %v1328_v8  ;;  %v1421_v45 = vld [vmem:[%s3074_s3 + $0x10] sm:$0xff] }
 0x1b2   : > { %vm1377_vm0 = vcmp.gt.f32.partialorder %v1323_v15, 0.0  ;;  %v1393_v16 = vmul.f32 0.2, %v1323_v15  ;;  %v2007_v47 = vpop.f32.mrb[8].mxu0 }
 0x1b3   : > { %v1410_v20 = vsel %vm1378_vm15, %v1328_v8, %v1394_v41  ;;  %v1338_v24 = vadd.f32 %v2007_v47, %v2681_v57  ;;  %v1332_v29 = vpop.f32.mrb[9].mxu0  ;;  %2098 = vmatprep.subr.bf16.mxu0 %v2097_v46  ;;  %2123 = vmatprep.subr.bf16.mxu1 %v2097_v46  ;;  %v1426_v41 = vld [vmem:[%s3074_s3 + $0x38] sm:$0xff]  ;;  %v1428_v47 = vld [vmem:[%s3074_s3 + $0x48] sm:$0xff] }
 0x1b4   : > { %v1409_v51 = vsel %vm1377_vm0, %v1323_v15, %v1393_v16  ;;  %v1333_v31 = vadd.f32 %v1332_v29, %v2683_v58  ;;  %2100 = vmatpush3.bf16.msra.mxu0 %v2097_v46  ;;  %2131 = vmatpush3.bf16.msra.mxu1 %v2097_v46  ;;  %v1425_v15 = vld [vmem:[%s3074_s3 + $0x30] sm:$0xff]  ;;  %v1422_v46 = vld [vmem:[%s3074_s3 + $0x18] sm:$0xff]  ;;  %v1427_v16 = vld [vmem:[%s3074_s3 + $0x40] sm:$0xff] }
 0x1b5   : > { %v2101_v52 = vpack.c.bf16 %v1410_v20, %v1409_v51  ;;  %vm1380_vm1 = vcmp.gt.f32.partialorder %v1338_v24, 0.0  ;;  %v1396_v35 = vmul.f32 0.2, %v1338_v24  ;;  %v1429_v20 = vld [vmem:[%s3074_s3 + $0x50] sm:$0xff]  ;;  %v1431_v29 = vld [vmem:[%s3074_s3 + $0x60] sm:$0xff]  ;;  %v1432_v51 = vld [vmem:[%s3074_s3 + $0x68] sm:$0xff] }
 0x1b6   : > { %vm1379_vm2 = vcmp.gt.f32.partialorder %v1333_v31, 0.0  ;;  %v1395_v48 = vmul.f32 0.2, %v1333_v31  ;;  %v2010_v49 = vpop.f32.mrb[10].mxu0 }
 0x1b7   : > { %v1412_v19 = vsel %vm1380_vm1, %v1338_v24, %v1396_v35  ;;  %v1348_v21 = vadd.f32 %v2010_v49, %v2699_v63  ;;  %v1342_v37 = vpop.f32.mrb[11].mxu0  ;;  %2102 = vmatprep.subr.bf16.mxu0 %v2101_v52  ;;  %2124 = vmatprep.subr.bf16.mxu1 %v2101_v52  ;;  %v1430_v24 = vld [vmem:[%s3074_s3 + $0x58] sm:$0xff]  ;;  %v764_v35 = vpop.permute.xlu0 %763 }
 0x1b8   : > { %v1411_v57 = vsel %vm1379_vm2, %v1333_v31, %v1395_v48  ;;  %v1343_v38 = vadd.f32 %v1342_v37, %v2701_v0  ;;  %2104 = vmatpush3.bf16.msra.mxu0 %v2101_v52  ;;  %2132 = vmatpush3.bf16.msra.mxu1 %v2101_v52  ;;  %v1433_v31 = vld [vmem:[%s3074_s3 + $0x70] sm:$0xff]  ;;  %v1434_v52 = vld [vmem:[%s3074_s3 + $0x78] sm:$0xff] }
 0x1b9   : > { %v2105_v58 = vpack.c.bf16 %v1412_v19, %v1411_v57  ;;  %vm1382_vm3 = vcmp.gt.f32.partialorder %v1348_v21, 0.0  ;;  %v1398_v50 = vmul.f32 0.2, %v1348_v21  ;;  %v2190_v19 = vmov -inf  }
 0x1ba   : > { %vm1381_vm4 = vcmp.gt.f32.partialorder %v1343_v38, 0.0  ;;  %v1397_v17 = vmul.f32 0.2, %v1343_v38  ;;  %v2013_v18 = vpop.f32.mrb[12].mxu0  ;;  %279 = vst.msk [vmem:[%s2920_s9 + $0x28] sm:$0xff] %vm273_vm9, %v2190_v19  ;;  %274 = vst.msk [vmem:[%s2920_s9] sm:$0xff] %vm273_vm9, %v2190_v19 }
 0x1bb   : > { %v1414_v44 = vsel %vm1382_vm3, %v1348_v21, %v1398_v50  ;;  %v1358_v53 = vadd.f32 %v2013_v18, %v2717_v5  ;;  %v1352_v33 = vpop.f32.mrb[13].mxu0  ;;  %2106 = vmatprep.subr.bf16.mxu0 %v2105_v58  ;;  %2125 = vmatprep.subr.bf16.mxu1 %v2105_v58  ;;  %v774_v48 = vpop.permute.xlu0 %773  ;;  %275 = vst.msk [vmem:[%s2920_s9 + $0x8] sm:$0xff] %vm273_vm9, %v2190_v19  ;;  %276 = vst.msk [vmem:[%s2920_s9 + $0x10] sm:$0xff] %vm273_vm9, %v2190_v19 }
 0x1bc   : > { %v1413_v63 = vsel %vm1381_vm4, %v1343_v38, %v1397_v17  ;;  %v1353_v30 = vadd.f32 %v1352_v33, %v2719_v6  ;;  %2108 = vmatpush3.bf16.msra.mxu0 %v2105_v58  ;;  %2133 = vmatpush3.bf16.msra.mxu1 %v2105_v58  ;;  %277 = vst.msk [vmem:[%s2920_s9 + $0x18] sm:$0xff] %vm273_vm9, %v2190_v19  ;;  %278 = vst.msk [vmem:[%s2920_s9 + $0x20] sm:$0xff] %vm273_vm9, %v2190_v19  ;;  %v921_v38 = vpop.permute.xlu1 %920 }
 0x1bd   : > { %v2109_v0 = vpack.c.bf16 %v1414_v44, %v1413_v63  ;;  %vm1384_vm5 = vcmp.gt.f32.partialorder %v1358_v53, 0.0  ;;  %v1400_v59 = vmul.f32 0.2, %v1358_v53  ;;  %280 = vst.msk [vmem:[%s2920_s9 + $0x30] sm:$0xff] %vm273_vm9, %v2190_v19  ;;  %281 = vst.msk [vmem:[%s2920_s9 + $0x38] sm:$0xff] %vm273_vm9, %v2190_v19 }
 0x1be   : > { %vm1383_vm6 = vcmp.gt.f32.partialorder %v1353_v30, 0.0  ;;  %v1399_v34 = vmul.f32 0.2, %v1353_v30  ;;  %v2016_v60 = vpop.f32.mrb[14].mxu0  ;;  %282 = vst.msk [vmem:[%s2920_s9 + $0x40] sm:$0xff] %vm273_vm9, %v2190_v19  ;;  %283 = vst.msk [vmem:[%s2920_s9 + $0x48] sm:$0xff] %vm273_vm9, %v2190_v19 }
 0x1bf   : > { %v1416_v22 = vsel %vm1384_vm5, %v1358_v53, %v1400_v59  ;;  %v1368_v62 = vadd.f32 %v2016_v60, %v2732_v10  ;;  %v1362_v39 = vpop.f32.mrb[15].mxu0  ;;  %2110 = vmatprep.subr.bf16.mxu0 %v2109_v0  ;;  %2126 = vmatprep.subr.bf16.mxu1 %v2109_v0  ;;  %v2922_v49 = vpop.permute.xlu0 %783  ;;  %284 = vst.msk [vmem:[%s2920_s9 + $0x50] sm:$0xff] %vm273_vm9, %v2190_v19  ;;  %285 = vst.msk [vmem:[%s2920_s9 + $0x58] sm:$0xff] %vm273_vm9, %v2190_v19 }
 0x1c0   : > { %v1415_v5 = vsel %vm1383_vm6, %v1353_v30, %v1399_v34  ;;  %v1363_v40 = vadd.f32 %v1362_v39, %v2734_v11  ;;  %2112 = vmatpush3.bf16.msra.mxu0 %v2109_v0  ;;  %2134 = vmatpush3.bf16.msra.mxu1 %v2109_v0  ;;  %v1420_v11 = vld [vmem:[%s3074_s3 + $0x8] sm:$0xff]  ;;  %286 = vst.msk [vmem:[%s2920_s9 + $0x60] sm:$0xff] %vm273_vm9, %v2190_v19  ;;  %287 = vst.msk [vmem:[%s2920_s9 + $0x68] sm:$0xff] %vm273_vm9, %v2190_v19  ;;  %v931_v50 = vpop.permute.xlu1 %930 }
 0x1c1   : > { %v2113_v6 = vpack.c.bf16 %v1416_v22, %v1415_v5  ;;  %vm1386_vm7 = vcmp.gt.f32.partialorder %v1368_v62, 0.0  ;;  %v1402_v3 = vmul.f32 0.2, %v1368_v62  ;;  %288 = vst.msk [vmem:[%s2920_s9 + $0x70] sm:$0xff] %vm273_vm9, %v2190_v19  ;;  %289 = vst.msk [vmem:[%s2920_s9 + $0x78] sm:$0xff] %vm273_vm9, %v2190_v19 }
 0x1c2   : > { %vm1385_vm8 = vcmp.gt.f32.partialorder %v1363_v40, 0.0  ;;  %v1401_v27 = vmul.f32 0.2, %v1363_v40 }
 0x1c3   : > { %v1418_v36 = vsel %vm1386_vm7, %v1368_v62, %v1402_v3  ;;  %2114 = vmatprep.subr.bf16.mxu0 %v2113_v6  ;;  %2127 = vmatprep.subr.bf16.mxu1 %v2113_v6  ;;  %v2956_v21 = vpop.permute.xlu0 %793 }
 0x1c4   : > { %v1417_v8 = vsel %vm1385_vm8, %v1363_v40, %v1401_v27  ;;  %2116 = vmatpush3.bf16.msra.mxu0 %v2113_v6  ;;  %2135 = vmatpush3.bf16.msra.mxu1 %v2113_v6  ;;  %v941_v18 = vpop.permute.xlu1 %940 }
 0x1c5   : > { %v2117_v10 = vpack.c.bf16 %v1418_v36, %v1417_v8  ;;  %v870_v36 = vmul.f32 %v2479_v28, %v2833_v61  ;;  %v869_v8 = vmul.f32 %v2479_v28, %v764_v35 }
 0x1c7   : > { %2118 = vmatprep.subr.bf16.mxu0 %v2117_v10  ;;  %2128 = vmatprep.subr.bf16.mxu1 %v2117_v10  ;;  %v2958_v37 = vpop.permute.xlu0 %803 }
 0x1c8   : > { %2120 = vmatpush3.bf16.msra.mxu0 %v2117_v10  ;;  %2136 = vmatpush3.bf16.msra.mxu1 %v2117_v10  ;;  %v951_v53 = vpop.permute.xlu1 %950 }
 0x1cb   : > { %2050 = vmatmul.mubr.f32.vlgmr.msra.gmra.mrb[16].mxu0 %v1420_v11  ;;  %2056 = vmatmul.mubr.f32.vlgmr.msra.gmra.mrb[0].mxu1 %v1424_v9  ;;  %v2960_v57 = vpop.permute.xlu0 %813  ;;  %v871_v9 = vmul.f32 %v2479_v28, %v774_v48 }
 0x1cc   : > { %2052 = vmatprep.mubr.f32.mxu0 %v1421_v45  ;;  %2058 = vmatprep.mubr.f32.mxu1 %v1425_v15  ;;  %v2962_v63 = vpop.permute.xlu1 %960  ;;  %v894_v45 = vadd.f32 %v870_v36, %v2777_v1  ;;  %v893_v15 = vadd.f32 %v869_v8, %v2779_v2  ;;  %v873_v8 = vmul.f32 %v2479_v28, %v2922_v49 }
 0x1cd   : > { %v895_v48 = vadd.f32 %v871_v9, %v2785_v14 }
 0x1cf   : > { %2053 = vmatmul.mubr.f32.gmra.mrb[18].mxu0 %v1422_v46  ;;  %2059 = vmatmul.mubr.f32.gmra.mrb[2].mxu1 %v1426_v41  ;;  %v916_v58 = vpop.permute.xlu0 %915 }
 0x1d0   : > { %2061 = vmatprep.mubr.f32.mxu1 %v1427_v16  ;;  %v2966_v0 = vpop.permute.xlu1 %970  ;;  %v1034_v16 = vadd.f32 %v921_v38, %v2823_v43  ;;  %v1033_v61 = vadd.f32 %v916_v58, %v2827_v55  ;;  %v1036_v43 = vadd.f32 %v931_v50, %v2831_v54  ;;  %v1040_v55 = vadd.f32 %v951_v53, %v2838_v25 }
 0x1d1   : > { %v875_v54 = vmul.f32 %v2479_v28, %v2956_v21  ;;  %v897_v50 = vadd.f32 %v873_v8, %v2791_v32  ;;  %v877_v21 = vmul.f32 %v2479_v28, %v2958_v37  ;;  %v879_v37 = vmul.f32 %v2479_v28, %v2960_v57 }
 0x1d3   : > { %2062 = vmatmul.mubr.f32.gmra.mrb[4].mxu1 %v1428_v47  ;;  %v926_v17 = vpop.permute.xlu0 %925  ;;  %v1038_v47 = vadd.f32 %v941_v18, %v894_v45  ;;  %v899_v32 = vadd.f32 %v875_v54, %v2797_v56  ;;  %v901_v56 = vadd.f32 %v877_v21, %v2803_v4  ;;  %v1720_v21 = vld [vmem:[%s2920_s9 + $0x60] sm:$0xff] }
 0x1d4   : > { %2064 = vmatprep.mubr.f32.mxu1 %v1429_v20  ;;  %v2970_v34 = vpop.permute.xlu1 %980  ;;  %v1035_v14 = vadd.f32 %v926_v17, %v2835_v26 }
 0x1d7   : > { %2065 = vmatmul.mubr.f32.gmra.mrb[6].mxu1 %v1430_v24  ;;  %v936_v44 = vpop.permute.xlu0 %935 }
 0x1d8   : > { %2067 = vmatprep.mubr.f32.mxu1 %v1431_v29  ;;  %v2974_v22 = vpop.permute.xlu1 %990 }
 0x1d9   : > { %v1048_v4 = vadd.f32 %v2974_v22, %v2850_v13  ;;  %v1713_v13 = vld [vmem:[%s2920_s9 + $0x28] sm:$0xff] }
 0x1da   : > { %v1709_v22 = vld [vmem:[%s2920_s9 + $0x8] sm:$0xff] }
 0x1db   : > { %2068 = vmatmul.mubr.f32.gmra.mrb[8].mxu1 %v1432_v51  ;;  %v946_v33 = vpop.permute.xlu0 %945 }
 0x1dc   : > { %2070 = vmatprep.mubr.f32.mxu1 %v1433_v31  ;;  %v1443_v39 = vpop.permute.xlu1 %1442  ;;  %v1037_v31 = vadd.f32 %v936_v44, %v893_v15  ;;  %v1039_v9 = vadd.f32 %v946_v33, %v895_v48 }
 0x1df   : > { %2071 = vmatmul.mubr.f32.gmra.mrb[10].mxu1 %v1434_v52  ;;  %v2964_v30 = vpop.permute.xlu0 %955 }
 0x1e0   : > { %v1453_v40 = vpop.permute.xlu1 %1452  ;;  %v1041_v17 = vadd.f32 %v2964_v30, %v897_v50  ;;  %v1716_v50 = vld [vmem:[%s2920_s9 + $0x40] sm:$0xff] }
 0x1e3   : > { %v2968_v59 = vpop.permute.xlu0 %965 }
 0x1e4   : > { %v1463_v3 = vpop.permute.xlu1 %1462 }
 0x1e7   : > { %v2972_v60 = vpop.permute.xlu0 %975 }
 0x1e8   : > { %v1473_v10 = vpop.permute.xlu1 %1472 }
 0x1eb   : > { %v2976_v62 = vpop.permute.xlu0 %985 }
 0x1ec   : > { %v1483_v52 = vpop.permute.xlu1 %1482 }
 0x1ef   : > { %v1438_v5 = vpop.permute.xlu0 %1437 }
 0x1f3   : > { %v1448_v6 = vpop.permute.xlu0 %1447 }
 0x1f7   : > { %v1458_v27 = vpop.permute.xlu0 %1457 }
 0x1fb   : > { %v1468_v11 = vpop.permute.xlu0 %1467 }
 0x1ff   : > { %v1478_v1 = vpop.permute.xlu0 %1477 }
 0x29e   : > { %v2051_v46 = vpop.f32.mrb[16].mxu0  ;;  %v2057_v41 = vpop.f32.mrb[0].mxu1 }
 0x29f   : > { %v1587_v20 = vadd.f32 %v2051_v46, %v1443_v39  ;;  %v1607_v24 = vadd.f32 %v2057_v41, %v1463_v3  ;;  %v1581_v29 = vpop.f32.mrb[17].mxu0  ;;  %v1601_v51 = vpop.f32.mrb[1].mxu1 }
 0x2a0   : > { %v1582_v35 = vadd.f32 %v1581_v29, %v1438_v5  ;;  %v1602_v19 = vadd.f32 %v1601_v51, %v1458_v27  ;;  %v1493_v41 = vpop.permute.xlu1 %1492  ;;  %v1043_v29 = vadd.f32 %v2968_v59, %v899_v32  ;;  %v1045_v59 = vadd.f32 %v2972_v60, %v901_v56  ;;  %v1717_v32 = vld [vmem:[%s2920_s9 + $0x48] sm:$0xff] }
 0x2a1   : > { %v1661_v36 = vadd.f32 %v1587_v20, %v1034_v16  ;;  %v1665_v2 = vadd.f32 %v1607_v24, %v1038_v47  ;;  %v1488_v16 = vpop.permute.xlu0 %1487  ;;  %v1044_v24 = vadd.f32 %v2966_v0, %v2844_v12  ;;  %v1046_v12 = vadd.f32 %v2970_v34, %v2847_v42 }
 0x2a2   : > { %v1660_v38 = vadd.f32 %v1582_v35, %v1033_v61  ;;  %v1664_v18 = vadd.f32 %v1602_v19, %v1037_v31  ;;  %v2054_v39 = vpop.f32.mrb[18].mxu0  ;;  %v2060_v3 = vpop.f32.mrb[2].mxu1 }
 0x2a3   : > { %v1597_v58 = vadd.f32 %v2054_v39, %v1453_v40  ;;  %v1617_v44 = vadd.f32 %v2060_v3, %v1473_v10  ;;  %v1591_v5 = vpop.f32.mrb[19].mxu0  ;;  %v1611_v27 = vpop.f32.mrb[3].mxu1  ;;  %1686 = vmax.xlane.f32.xlu0 %v1665_v2  ;;  %1678 = vmax.xlane.f32.xlu1 %v1661_v36  ;;  %v1042_v10 = vadd.f32 %v2962_v63, %v2841_v7 }
 0x2a4   : > { %v1592_v45 = vadd.f32 %v1591_v5, %v1448_v6  ;;  %v1612_v15 = vadd.f32 %v1611_v27, %v1468_v11  ;;  %v1503_v51 = vpop.permute.xlu1 %1502  ;;  %v903_v36 = vadd.f32 %v879_v37, %v2813_v23  ;;  %v1721_v37 = vld [vmem:[%s2920_s9 + $0x68] sm:$0xff] }
 0x2a5   : > { %v1663_v49 = vadd.f32 %v1597_v58, %v1036_v43  ;;  %v1667_v46 = vadd.f32 %v1617_v44, %v1040_v55  ;;  %v1498_v61 = vpop.permute.xlu0 %1497  ;;  %v1712_v55 = vld [vmem:[%s2920_s9 + $0x20] sm:$0xff] }
 0x2a6   : > { %v1662_v25 = vadd.f32 %v1592_v45, %v1035_v14  ;;  %v1666_v53 = vadd.f32 %v1612_v15, %v1039_v9  ;;  %v2063_v40 = vpop.f32.mrb[4].mxu1  ;;  %v1047_v43 = vadd.f32 %v2976_v62, %v903_v36  ;;  %v1708_v58 = vld [vmem:[%s2920_s9] sm:$0xff]  ;;  %v1714_v9 = vld [vmem:[%s2920_s9 + $0x30] sm:$0xff]  ;;  %v1711_v45 = vld [vmem:[%s2920_s9 + $0x18] sm:$0xff] }
 0x2a7   : > { %v1627_v47 = vadd.f32 %v2063_v40, %v1483_v52  ;;  %v1621_v26 = vpop.f32.mrb[5].mxu1  ;;  %1684 = vmax.xlane.f32.xlu1 %v1664_v18  ;;  %1676 = vmax.xlane.f32.xlu0 %v1660_v38 }
 0x2a8   : > { %v1622_v33 = vadd.f32 %v1621_v26, %v1478_v1  ;;  %v1513_v2 = vpop.permute.xlu1 %1512 }
 0x2a9   : > { %v1669_v6 = vadd.f32 %v1627_v47, %v1042_v10  ;;  %v1508_v57 = vpop.permute.xlu0 %1507  ;;  %v1710_v47 = vld [vmem:[%s2920_s9 + $0x10] sm:$0xff] }
 0x2aa   : > { %v1668_v11 = vadd.f32 %v1622_v33, %v1041_v17  ;;  %v2066_v20 = vpop.f32.mrb[6].mxu1 }
 0x2ab   : > { %v1637_v7 = vadd.f32 %v2066_v20, %v1493_v41  ;;  %v1631_v63 = vpop.f32.mrb[7].mxu1  ;;  %1688 = vmax.xlane.f32.xlu1 %v1666_v53  ;;  %1682 = vmax.xlane.f32.xlu0 %v1663_v49  ;;  %v1715_v41 = vld [vmem:[%s2920_s9 + $0x38] sm:$0xff] }
 0x2ac   : > { %v1632_v30 = vadd.f32 %v1631_v63, %v1488_v16  ;;  %v1718_v16 = vld [vmem:[%s2920_s9 + $0x50] sm:$0xff] }
 0x2ad   : > { %v1671_v31 = vadd.f32 %v1637_v7, %v1044_v24  ;;  %v1722_v63 = vld [vmem:[%s2920_s9 + $0x70] sm:$0xff] }
 0x2ae   : > { %v1670_v52 = vadd.f32 %v1632_v30, %v1043_v29  ;;  %v2069_v35 = vpop.f32.mrb[8].mxu1  ;;  %v1719_v29 = vld [vmem:[%s2920_s9 + $0x58] sm:$0xff] }
 0x2af   : > { %v1647_v0 = vadd.f32 %v2069_v35, %v1503_v51  ;;  %v1641_v19 = vpop.f32.mrb[9].mxu1  ;;  %1692 = vmax.xlane.f32.xlu1 %v1668_v11  ;;  %1690 = vmax.xlane.f32.xlu0 %v1667_v46  ;;  %v1723_v35 = vld [vmem:[%s2920_s9 + $0x78] sm:$0xff] }
 0x2b0   : > { %v1642_v48 = vadd.f32 %v1641_v19, %v1498_v61 }
 0x2b1   : > { %v1673_v1 = vadd.f32 %v1647_v0, %v1046_v12 }
 0x2b2   : > { %v1672_v8 = vadd.f32 %v1642_v48, %v1045_v59  ;;  %v2072_v28 = vpop.f32.mrb[10].mxu1 }
 0x2b3   : > { %v1657_v42 = vadd.f32 %v2072_v28, %v1513_v2  ;;  %v1651_v34 = vpop.f32.mrb[11].mxu1  ;;  %1696 = vmax.xlane.f32.xlu1 %v1670_v52  ;;  %1680 = vmax.xlane.f32.xlu0 %v1662_v25 }
 0x2b4   : > { %v1652_v60 = vadd.f32 %v1651_v34, %v1508_v57 }
 0x2b5   : > { %v1675_v38 = vadd.f32 %v1657_v42, %v1048_v4 }
 0x2b6   : > { %v1674_v23 = vadd.f32 %v1652_v60, %v1047_v43 }
 0x2b7   : > { %1700 = vmax.xlane.f32.xlu1 %v1672_v8  ;;  %1694 = vmax.xlane.f32.xlu0 %v1669_v6 }
 0x2bb   : > { %1704 = vmax.xlane.f32.xlu1 %v1674_v23  ;;  %1698 = vmax.xlane.f32.xlu0 %v1671_v31 }
 0x2bf   : > { %1702 = vmax.xlane.f32.xlu0 %v1673_v1 }
 0x2c3   : > { %1706 = vmax.xlane.f32.xlu0 %v1675_v38 }
 0x330   : > { %v1687_v62 = vpop.xlane.xlu0 %1686  ;;  %v1679_v18 = vpop.xlane.xlu1 %1678 }
 0x331   : > { %v1729_v39 = vmax.f32 %v1713_v13, %v1687_v62  ;;  %v1725_v3 = vmax.f32 %v1709_v22, %v1679_v18 }
 0x333   : > { %1746 = vst.msk [vmem:[%s2920_s9 + $0x28] sm:$0xff] %vm273_vm9, %v1729_v39  ;;  %1742 = vst.msk [vmem:[%s2920_s9 + $0x8] sm:$0xff] %vm273_vm9, %v1725_v3 }
 0x334   : > { %v1685_v44 = vpop.xlane.xlu1 %1684  ;;  %v1677_v5 = vpop.xlane.xlu0 %1676 }
 0x335   : > { %v1728_v27 = vmax.f32 %v1712_v55, %v1685_v44  ;;  %v1724_v14 = vmax.f32 %v1708_v58, %v1677_v5 }
 0x337   : > { %1745 = vst.msk [vmem:[%s2920_s9 + $0x20] sm:$0xff] %vm273_vm9, %v1728_v27  ;;  %1741 = vst.msk [vmem:[%s2920_s9] sm:$0xff] %vm273_vm9, %v1724_v14 }
 0x338   : > { %v1689_v15 = vpop.xlane.xlu1 %1688  ;;  %v1683_v49 = vpop.xlane.xlu0 %1682 }
 0x339   : > { %v1730_v46 = vmax.f32 %v1714_v9, %v1689_v15  ;;  %v1727_v54 = vmax.f32 %v1711_v45, %v1683_v49 }
 0x33b   : > { %1747 = vst.msk [vmem:[%s2920_s9 + $0x30] sm:$0xff] %vm273_vm9, %v1730_v46  ;;  %1744 = vst.msk [vmem:[%s2920_s9 + $0x18] sm:$0xff] %vm273_vm9, %v1727_v54 }
 0x33c   : > { %v1693_v25 = vpop.xlane.xlu1 %1692  ;;  %v1691_v53 = vpop.xlane.xlu0 %1690 }
 0x33d   : > { %v1732_v40 = vmax.f32 %v1716_v50, %v1693_v25  ;;  %v1731_v10 = vmax.f32 %v1715_v41, %v1691_v53 }
 0x33f   : > { %1749 = vst.msk [vmem:[%s2920_s9 + $0x40] sm:$0xff] %vm273_vm9, %v1732_v40  ;;  %1748 = vst.msk [vmem:[%s2920_s9 + $0x38] sm:$0xff] %vm273_vm9, %v1731_v10 }
 0x340   : > { %v1697_v26 = vpop.xlane.xlu1 %1696  ;;  %v1681_v17 = vpop.xlane.xlu0 %1680 }
 0x341   : > { %v1734_v33 = vmax.f32 %v1718_v16, %v1697_v26  ;;  %v1726_v6 = vmax.f32 %v1710_v47, %v1681_v17 }
 0x343   : > { %1751 = vst.msk [vmem:[%s2920_s9 + $0x50] sm:$0xff] %vm273_vm9, %v1734_v33  ;;  %1743 = vst.msk [vmem:[%s2920_s9 + $0x10] sm:$0xff] %vm273_vm9, %v1726_v6 }
 0x344   : > { %v1701_v11 = vpop.xlane.xlu1 %1700  ;;  %v1695_v20 = vpop.xlane.xlu0 %1694 }
 0x345   : > { %v1736_v24 = vmax.f32 %v1720_v21, %v1701_v11  ;;  %v1733_v7 = vmax.f32 %v1717_v32, %v1695_v20 }
 0x347   : > { %1753 = vst.msk [vmem:[%s2920_s9 + $0x60] sm:$0xff] %vm273_vm9, %v1736_v24  ;;  %1750 = vst.msk [vmem:[%s2920_s9 + $0x48] sm:$0xff] %vm273_vm9, %v1733_v7 }
 0x348   : > { %v1705_v51 = vpop.xlane.xlu1 %1704  ;;  %v1699_v30 = vpop.xlane.xlu0 %1698 }
 0x349   : > { %v1738_v61 = vmax.f32 %v1722_v63, %v1705_v51  ;;  %v1735_v31 = vmax.f32 %v1719_v29, %v1699_v30 }
 0x34b   : > { %1755 = vst.msk [vmem:[%s2920_s9 + $0x70] sm:$0xff] %vm273_vm9, %v1738_v61  ;;  %1752 = vst.msk [vmem:[%s2920_s9 + $0x58] sm:$0xff] %vm273_vm9, %v1735_v31 }
 0x34c   : > { %v1703_v56 = vpop.xlane.xlu0 %1702 }
 0x34d   : > { %v1737_v52 = vmax.f32 %v1721_v37, %v1703_v56 }
 0x34f   : > { %1754 = vst.msk [vmem:[%s2920_s9 + $0x68] sm:$0xff] %vm273_vm9, %v1737_v52 }
 0x350   : > { %v1707_v12 = vpop.xlane.xlu0 %1706 }
 0x351   : > { %v1739_v0 = vmax.f32 %v1723_v35, %v1707_v12 }
 0x353   : > { %1756 = vst.msk [vmem:[%s2920_s9 + $0x78] sm:$0xff] %vm273_vm9, %v1739_v0 }
 0x354 PF: > { %s15_s20 = sadd.s32 1, %s2187_s20   ;;  %s3077_s18 = smov %s2183_s19 }
 0x355   : > { %p12_p5 = scmp.ge.s32.totalorder %s15_s20, 4   ;;  %s3078_s19 = smov %s3080_s21 }
 0x357   :  { %14 = sbr.rel (!%p12_p5) target bundleno = 2 (0x2), region = 76 }

// kernel: pos_displace_forward.3
= control target key start
LH: loop header
LB: loop body
LE: loop exit
PB: predicated region body
PF: predicated region fallthrough
CT: control target
= control target key end

     0   :  { %s2629_s30 = smov 0   ;;  %s2631_s10 = smov 0   ;;  %s3367_s0 = inlined_call_operand.vmem [shape: f32[2,3,128], index: 0, kind: input, shape index: {}]   ;;  %s3368_s1 = inlined_call_operand.vmem [shape: f32[2,64,128], index: 1, kind: input, shape index: {}]   ;;  %s3369_s2 = inlined_call_operand.vmem [shape: f32[2,192,1], index: 2, kind: input, shape index: {}]   ;;  %s3370_s3 = inlined_call_operand.vmem [shape: f32[3,192,1], index: 3, kind: input, shape index: {}]   ;;  %s3371_s4 = inlined_call_operand.vmem [shape: f32[192,64], index: 4, kind: input, shape index: {}]   ;;  %s3372_s5 = inlined_call_operand.vmem [shape: f32[64,128], index: 5, kind: input, shape index: {}]   ;;  %s3373_s6 = inlined_call_operand.vmem [shape: f32[64,64], index: 6, kind: input, shape index: {}]   ;;  %s3374_s7 = inlined_call_operand.vmem [shape: f32[3,64], index: 7, kind: input, shape index: {}]   ;;  %s3375_s8 = inlined_call_operand.vmem [shape: f32[131,1], index: 8, kind: input, shape index: {}]   ;;  %s3376_s9 = inlined_call_operand.vmem [shape: f32[2,3,128], index: 9, kind: output, shape index: {}]  }
   0x1   :  { %s2633_s11 = smov 0  }
   0x2 LB: > { %s31_s12 = sadd.s32 1, %s2569_s10  ;;  %p2098_p0 = scmp.ge.s32.totalorder %s2573_s11, 1  ;;  %s2573_s11 = sphi %s2633_s11, %s19_s11   ;;  %s2569_s10 = sphi %s2631_s10, %s3378_s10   ;;  %s2565_s30 = sphi %s2629_s30, %s3377_s30  }
   0x3   : > { %p33_p1 = scmp.ge.s32.totalorder %s31_s12, 2  ;;  %p330_p2 = scmp.lt.s32.totalorder %s2573_s11, 3 }
   0x5   : > { %s3380_s12 = smov (%p33_p1, %s31_s12), 0  ;;  %p331_p3 = pnand %p2098_p0, %p330_p2 }
   0x6   : > { %v2112_v0 = vld [vmem:[%s3370_s3 + $0x100] sm:$0xff] (!%p331_p3)  ;;  %p383_p4 = scmp.lt.s32.totalorder (!%p331_p3), %s2565_s30, 1  ;;  %v2575_v2 = vmov (!%p331_p3), 0   ;;  %vm1177_vm0 = vcmask (!%p331_p3), 523264   ;;  %v2113_v3 = vld [vmem:[%s3370_s3 + $0x108] sm:$0xff] (!%p331_p3)  ;;  %v454_v16 = vld [vmem:[%s3370_s3 + $0x58] sm:$0xff] (!%p331_p3) }
   0x7   : > { %334 = sbr.rel (%p331_p3) target bundleno = 974 (0x3ce), region = 56  ;;  %v451_v1 = vld [vmem:[%s3370_s3 + $0x40] sm:$0xff] (!%p331_p3)  ;;  %2550 = vset.pattern.permute.xlu1 (!%p331_p3), %v2575_v2  ;;  %2549 = vset.pattern.permute.xlu0 (!%p331_p3), %v2575_v2  ;;  %v452_v4 = vld [vmem:[%s3370_s3 + $0x48] sm:$0xff] (!%p331_p3)  ;;  %v453_v17 = vld [vmem:[%s3370_s3 + $0x50] sm:$0xff] (!%p331_p3) }
   0x8   : > { %682 = vperm.xlu1 (!%p331_p3), %2550, %v2112_v0   ;;  %509 = vperm.xlu0 (!%p331_p3), %2549, %v451_v1   ;;  %v1161_v5 = vld [vmem:[%s3371_s4 + $0x40] sm:$0xff] (!%p331_p3)  ;;  %v2137_v8 = vld [vmem:[%s3370_s3 + $0x1c8] sm:$0xff] (!%p331_p3)  ;;  %v2115_v21 = vld [vmem:[%s3370_s3 + $0x118] sm:$0xff] (!%p331_p3) }
   0x9   : > { %2297 = vmatprep.mubr.msk.f32.mxu1 (!%p331_p3), %vm1177_vm0, %v1161_v5  ;;  %v2136_v10 = vld [vmem:[%s3370_s3 + $0x1c0] sm:$0xff] (!%p331_p3)  ;;  %v2114_v22 = vld [vmem:[%s3370_s3 + $0x110] sm:$0xff] (!%p331_p3)  ;;  %v2139_v24 = vld [vmem:[%s3370_s3 + $0x1d8] sm:$0xff] (!%p331_p3) }
   0xa   : > { %v2138_v25 = vld [vmem:[%s3370_s3 + $0x1d0] sm:$0xff] (!%p331_p3)  ;;  %v1162_v26 = vld [vmem:[%s3371_s4 + $0x48] sm:$0xff] (!%p331_p3)  ;;  %v1164_v30 = vld [vmem:[%s3371_s4 + $0x58] sm:$0xff] (!%p331_p3) }
   0xb   : > { %v1163_v29 = vld [vmem:[%s3371_s4 + $0x50] sm:$0xff] (!%p331_p3)  ;;  %v456_v31 = vld [vmem:[%s3370_s3 + $0x68] sm:$0xff] (!%p331_p3)  ;;  %v455_v32 = vld [vmem:[%s3370_s3 + $0x60] sm:$0xff] (!%p331_p3) }
   0xc   : > { %687 = vperm.xlu1 (!%p331_p3), %2550, %v2113_v3   ;;  %514 = vperm.xlu0 (!%p331_p3), %2549, %v452_v4   ;;  %v1165_v33 = vld [vmem:[%s3371_s4 + $0x60] sm:$0xff] (!%p331_p3)  ;;  %v1166_v34 = vld [vmem:[%s3371_s4 + $0x68] sm:$0xff] (!%p331_p3)  ;;  %v1167_v37 = vld [vmem:[%s3371_s4 + $0x70] sm:$0xff] (!%p331_p3) }
   0xd   : > { %v2117_v35 = vld [vmem:[%s3370_s3 + $0x128] sm:$0xff] (!%p331_p3)  ;;  %v2116_v36 = vld [vmem:[%s3370_s3 + $0x120] sm:$0xff] (!%p331_p3)  ;;  %v1168_v38 = vld [vmem:[%s3371_s4 + $0x78] sm:$0xff] (!%p331_p3) }
   0xe   : > { %s3382_s30 = smov (!%p383_p4, %s2565_s30), 1  ;;  %v2141_v39 = vld [vmem:[%s3370_s3 + $0x1e8] sm:$0xff]  ;;  %v2140_v40 = vld [vmem:[%s3370_s3 + $0x1e0] sm:$0xff]  ;;  %v1171_v45 = vld [vmem:[%s3371_s4 + $0x90] sm:$0xff] }
   0xf   : > { %s2187_s21 = sshll.u32 %s3382_s30, 6  ;;  %s2520_s22 = smul.u32 192, %s3382_s30  ;;  %v1169_v41 = vld [vmem:[%s3371_s4 + $0x80] sm:$0xff]  ;;  %v1170_v42 = vld [vmem:[%s3371_s4 + $0x88] sm:$0xff]  ;;  %v1172_v46 = vld [vmem:[%s3371_s4 + $0x98] sm:$0xff] }
  0x10   : > { %s397_s26 = scalar_lea.vmem %s3368_s1, %s2187_s21  ;;  %884 = vperm.xlu1 %2550, %v2137_v8   ;;  %879 = vperm.xlu0 %2549, %v2136_v10   ;;  %v458_v47 = vld [vmem:[%s3370_s3 + $0x78] sm:$0xff]  ;;  %v457_v48 = vld [vmem:[%s3370_s3 + $0x70] sm:$0xff]  ;;  %v1173_v49 = vld [vmem:[%s3371_s4 + $0xa0] sm:$0xff]  ;;  %s2099_s13 = sshll.u32 %s3382_s30, 2 }
  0x11   : > { %v411_v6 = vld [vmem:[%s397_s26] sm:$0xff]  ;;  %v412_v7 = vld [vmem:[%s397_s26 + $0x8] sm:$0xff]  ;;  %v413_v11 = vld [vmem:[%s397_s26 + $0x10] sm:$0xff]  ;;  %s2697_s29 = scalar_lea.vmem %s3369_s2, %s2520_s22  ;;  %s389_s20 = scalar_lea.vmem %s3367_s0, %s2099_s13 }
  0x12   : > { %v2412_v9 = vpack.c.bf16 %v412_v7, %v411_v6  ;;  %v414_v12 = vld [vmem:[%s397_s26 + $0x18] sm:$0xff]  ;;  %v415_v14 = vld [vmem:[%s397_s26 + $0x20] sm:$0xff]  ;;  %v416_v15 = vld [vmem:[%s397_s26 + $0x28] sm:$0xff]  ;;  %s409_s16 = scalar_lea.vmem %s3376_s9, %s2099_s13 }
  0x13   : > { %v2416_v13 = vpack.c.bf16 %v414_v12, %v413_v11  ;;  %v2420_v18 = vpack.c.bf16 %v416_v15, %v415_v14  ;;  %v417_v19 = vld [vmem:[%s397_s26 + $0x30] sm:$0xff]  ;;  %v418_v20 = vld [vmem:[%s397_s26 + $0x38] sm:$0xff]  ;;  %v428_v27 = vld [vmem:[%s2697_s29 + $0x48] sm:$0xff] }
  0x14   : > { %2488 = vmatprep.subr.bf16.mxu1 %v2412_v9  ;;  %2413 = vmatprep.subr.bf16.mxu0 %v2412_v9  ;;  %v2424_v23 = vpack.c.bf16 %v418_v20, %v417_v19  ;;  %v427_v28 = vld [vmem:[%s2697_s29 + $0x40] sm:$0xff]  ;;  %v430_v43 = vld [vmem:[%s2697_s29 + $0x58] sm:$0xff]  ;;  %v429_v44 = vld [vmem:[%s2697_s29 + $0x50] sm:$0xff] }
  0x15   : > { %2492 = vmatpush3.bf16.msra.mxu1 %v2412_v9  ;;  %2415 = vmatpush3.bf16.msra.mxu0 %v2412_v9  ;;  %v1174_v50 = vld [vmem:[%s3371_s4 + $0xa8] sm:$0xff]  ;;  %v2119_v51 = vld [vmem:[%s3370_s3 + $0x138] sm:$0xff]  ;;  %v2118_v52 = vld [vmem:[%s3370_s3 + $0x130] sm:$0xff] }
  0x16   : > { %2489 = vmatprep.subr.bf16.mxu1 %v2416_v13  ;;  %2417 = vmatprep.subr.bf16.mxu0 %v2416_v13  ;;  %v1175_v53 = vld [vmem:[%s3371_s4 + $0xb0] sm:$0xff]  ;;  %v1176_v54 = vld [vmem:[%s3371_s4 + $0xb8] sm:$0xff]  ;;  %v432_v57 = vld [vmem:[%s2697_s29 + $0x68] sm:$0xff] }
  0x17   : > { %524 = vperm.xlu1 %2550, %v454_v16   ;;  %519 = vperm.xlu0 %2549, %v453_v17   ;;  %v2143_v55 = vld [vmem:[%s3370_s3 + $0x1f8] sm:$0xff]  ;;  %v2142_v56 = vld [vmem:[%s3370_s3 + $0x1f0] sm:$0xff]  ;;  %v431_v58 = vld [vmem:[%s2697_s29 + $0x60] sm:$0xff] }
  0x18   : > { %v460_v59 = vld [vmem:[%s3370_s3 + $0x88] sm:$0xff]  ;;  %v459_v60 = vld [vmem:[%s3370_s3 + $0x80] sm:$0xff]  ;;  %v434_v1 = vld [vmem:[%s2697_s29 + $0x78] sm:$0xff] }
  0x19   : > { %2493 = vmatpush3.bf16.msra.mxu1 %v2416_v13  ;;  %2419 = vmatpush3.bf16.msra.mxu0 %v2416_v13  ;;  %v2121_v61 = vld [vmem:[%s3370_s3 + $0x148] sm:$0xff]  ;;  %v2120_v62 = vld [vmem:[%s3370_s3 + $0x140] sm:$0xff]  ;;  %v433_v2 = vld [vmem:[%s2697_s29 + $0x70] sm:$0xff] }
  0x1a   : > { %2490 = vmatprep.subr.bf16.mxu1 %v2420_v18  ;;  %2421 = vmatprep.subr.bf16.mxu0 %v2420_v18  ;;  %v2145_v63 = vld [vmem:[%s3370_s3 + $0x208] sm:$0xff]  ;;  %v2144_v0 = vld [vmem:[%s3370_s3 + $0x200] sm:$0xff]  ;;  %v462_v3 = vld [vmem:[%s3370_s3 + $0x98] sm:$0xff] }
  0x1b   : > { %697 = vperm.xlu1 %2550, %v2115_v21   ;;  %692 = vperm.xlu0 %2549, %v2114_v22   ;;  %v461_v4 = vld [vmem:[%s3370_s3 + $0x90] sm:$0xff]  ;;  %v2123_v5 = vld [vmem:[%s3370_s3 + $0x158] sm:$0xff]  ;;  %v436_v9 = vld [vmem:[%s2697_s29 + $0x88] sm:$0xff] }
  0x1c   : > { %v2122_v6 = vld [vmem:[%s3370_s3 + $0x150] sm:$0xff]  ;;  %v2147_v7 = vld [vmem:[%s3370_s3 + $0x218] sm:$0xff]  ;;  %v435_v10 = vld [vmem:[%s2697_s29 + $0x80] sm:$0xff] }
  0x1d   : > { %2494 = vmatpush3.bf16.msra.mxu1 %v2420_v18  ;;  %2423 = vmatpush3.bf16.msra.mxu0 %v2420_v18  ;;  %v2146_v8 = vld [vmem:[%s3370_s3 + $0x210] sm:$0xff]  ;;  %v464_v11 = vld [vmem:[%s3370_s3 + $0xa8] sm:$0xff]  ;;  %v463_v12 = vld [vmem:[%s3370_s3 + $0xa0] sm:$0xff] }
  0x1e   : > { %2491 = vmatprep.subr.bf16.mxu1 %v2424_v23  ;;  %2425 = vmatprep.subr.bf16.mxu0 %v2424_v23  ;;  %v2125_v13 = vld [vmem:[%s3370_s3 + $0x168] sm:$0xff]  ;;  %v2124_v14 = vld [vmem:[%s3370_s3 + $0x160] sm:$0xff]  ;;  %v438_v17 = vld [vmem:[%s2697_s29 + $0x98] sm:$0xff] }
  0x1f   : > { %894 = vperm.xlu1 %2550, %v2139_v24   ;;  %889 = vperm.xlu0 %2549, %v2138_v25   ;;  %v2149_v15 = vld [vmem:[%s3370_s3 + $0x228] sm:$0xff]  ;;  %v2148_v16 = vld [vmem:[%s3370_s3 + $0x220] sm:$0xff]  ;;  %v437_v18 = vld [vmem:[%s2697_s29 + $0x90] sm:$0xff] }
  0x20   : > { %v466_v19 = vld [vmem:[%s3370_s3 + $0xb8] sm:$0xff]  ;;  %v465_v20 = vld [vmem:[%s3370_s3 + $0xb0] sm:$0xff]  ;;  %v440_v25 = vld [vmem:[%s2697_s29 + $0xa8] sm:$0xff] }
  0x21   : > { %2495 = vmatpush3.bf16.msra.mxu1 %v2424_v23  ;;  %2427 = vmatpush3.bf16.msra.mxu0 %v2424_v23  ;;  %v2127_v21 = vld [vmem:[%s3370_s3 + $0x178] sm:$0xff]  ;;  %v2126_v22 = vld [vmem:[%s3370_s3 + $0x170] sm:$0xff] }
  0x22   : > { %v2151_v23 = vld [vmem:[%s3370_s3 + $0x238] sm:$0xff]  ;;  %v2150_v24 = vld [vmem:[%s3370_s3 + $0x230] sm:$0xff] }
  0x23   : > { %1056 = vperm.xlu1 %2550, %v428_v27   ;;  %1051 = vperm.xlu0 %2549, %v427_v28   ;;  %v442_v27 = vld [vmem:[%s2697_s29 + $0xb8] sm:$0xff]  ;;  %v441_v28 = vld [vmem:[%s2697_s29 + $0xb0] sm:$0xff] }
  0x24   : > { %2298 = vmatmul.mubr.msk.f32.vlgmr.msra.gmra.mrb[0].mxu1 %vm1177_vm0, %v1162_v26  ;;  %v439_v26 = vld [vmem:[%s2697_s29 + $0xa0] sm:$0xff] }
  0x25   : > { %2300 = vmatprep.mubr.msk.f32.mxu1 %vm1177_vm0, %v1163_v29  ;;  %v1508_v29 = vld [vmem:[%s3375_s8 + $0x8] sm:$0xff] }
  0x27   : > { %534 = vperm.xlu1 %2550, %v456_v31   ;;  %529 = vperm.xlu0 %2549, %v455_v32  }
  0x28   : > { %2301 = vmatmul.mubr.msk.f32.gmra.mrb[2].mxu1 %vm1177_vm0, %v1164_v30  ;;  %v1507_v30 = vld [vmem:[%s3375_s8] sm:$0xff] }
  0x29   : > { %2303 = vmatprep.mubr.msk.f32.mxu1 %vm1177_vm0, %v1165_v33  ;;  %v1510_v33 = vld [vmem:[%s3375_s8 + $0x18] sm:$0xff] }
  0x2b   : > { %707 = vperm.xlu1 %2550, %v2117_v35   ;;  %702 = vperm.xlu0 %2549, %v2116_v36  }
  0x2c   : > { %2304 = vmatmul.mubr.msk.f32.gmra.mrb[4].mxu1 %vm1177_vm0, %v1166_v34  ;;  %v1509_v34 = vld [vmem:[%s3375_s8 + $0x10] sm:$0xff] }
  0x2d   : > { %2306 = vmatprep.mubr.msk.f32.mxu1 %vm1177_vm0, %v1167_v37  ;;  %v1512_v37 = vld [vmem:[%s3375_s8 + $0x28] sm:$0xff] }
  0x2f   : > { %904 = vperm.xlu1 %2550, %v2141_v39   ;;  %899 = vperm.xlu0 %2549, %v2140_v40  }
  0x30   : > { %2307 = vmatmul.mubr.msk.f32.gmra.mrb[6].mxu1 %vm1177_vm0, %v1168_v38  ;;  %v1511_v38 = vld [vmem:[%s3375_s8 + $0x20] sm:$0xff] }
  0x31   : > { %2309 = vmatprep.mubr.msk.f32.mxu1 %vm1177_vm0, %v1169_v41  ;;  %v1514_v41 = vld [vmem:[%s3375_s8 + $0x38] sm:$0xff] }
  0x33   : > { %1066 = vperm.xlu1 %2550, %v430_v43   ;;  %1061 = vperm.xlu0 %2549, %v429_v44  }
  0x34   : > { %2310 = vmatmul.mubr.msk.f32.gmra.mrb[8].mxu1 %vm1177_vm0, %v1170_v42  ;;  %v1513_v42 = vld [vmem:[%s3375_s8 + $0x30] sm:$0xff] }
  0x35   : > { %2312 = vmatprep.mubr.msk.f32.mxu1 %vm1177_vm0, %v1171_v45  ;;  %v444_v45 = vld [vmem:[%s3370_s3 + $0x8] sm:$0xff] }
  0x37   : > { %544 = vperm.xlu1 %2550, %v458_v47   ;;  %539 = vperm.xlu0 %2549, %v457_v48  }
  0x38   : > { %2313 = vmatmul.mubr.msk.f32.gmra.mrb[10].mxu1 %vm1177_vm0, %v1172_v46  ;;  %v443_v46 = vld [vmem:[%s3370_s3] sm:$0xff] }
  0x39   : > { %2315 = vmatprep.mubr.msk.f32.mxu1 %vm1177_vm0, %v1173_v49  ;;  %v2105_v49 = vld [vmem:[%s3370_s3 + $0xc8] sm:$0xff] }
  0x3b   : > { %717 = vperm.xlu1 %2550, %v2119_v51   ;;  %712 = vperm.xlu0 %2549, %v2118_v52   ;;  %v587_v51 = vlaneseq  ;;  %v2104_v52 = vld [vmem:[%s3370_s3 + $0xc0] sm:$0xff] }
  0x3c   : > { %2316 = vmatmul.mubr.msk.f32.gmra.mrb[12].mxu1 %vm1177_vm0, %v1174_v50  ;;  %v1524_v50 = vld [vmem:[%s3372_s5] sm:$0xff] }
  0x3d   : > { %2318 = vmatprep.mubr.msk.f32.mxu1 %vm1177_vm0, %v1175_v53 }
  0x3f   : > { %914 = vperm.xlu1 %2550, %v2143_v55   ;;  %909 = vperm.xlu0 %2549, %v2142_v56   ;;  %v2129_v55 = vld [vmem:[%s3370_s3 + $0x188] sm:$0xff]  ;;  %v588_v56 = vshrl.u32 %v587_v51, 7 }
  0x40   : > { %2319 = vmatmul.mubr.msk.f32.gmra.mrb[14].mxu1 %vm1177_vm0, %v1176_v54  ;;  %v2133_v51 = vld [vmem:[%s3370_s3 + $0x1a8] sm:$0xff] }
  0x41   : > { %2353 = vmatprep.mubr.f32.mxu1 %v1524_v50 }
  0x43   : > { %1076 = vperm.xlu1 %2550, %v432_v57   ;;  %1071 = vperm.xlu0 %2549, %v431_v58   ;;  %v2128_v57 = vld [vmem:[%s3370_s3 + $0x180] sm:$0xff] }
  0x47   : > { %554 = vperm.xlu1 %2550, %v460_v59   ;;  %549 = vperm.xlu0 %2549, %v459_v60   ;;  %v446_v60 = vld [vmem:[%s3370_s3 + $0x18] sm:$0xff] }
  0x4b   : > { %727 = vperm.xlu1 %2550, %v2121_v61   ;;  %722 = vperm.xlu0 %2549, %v2120_v62   ;;  %v589_v61 = vsub.s32 0, %v588_v56  ;;  %v762_v62 = vsub.s32 1, %v588_v56 }
  0x4f   : > { %924 = vperm.xlu1 %2550, %v2145_v63   ;;  %919 = vperm.xlu0 %2549, %v2144_v0   ;;  %v445_v63 = vld [vmem:[%s3370_s3 + $0x10] sm:$0xff]  ;;  %v410_v0 = vld [vmem:[%s389_s20] sm:$0x7] }
  0x53   : > { %1086 = vperm.xlu1 %2550, %v434_v1   ;;  %1081 = vperm.xlu0 %2549, %v433_v2  }
  0x57   : > { %564 = vperm.xlu1 %2550, %v462_v3   ;;  %559 = vperm.xlu0 %2549, %v461_v4   ;;  %v2107_v3 = vld [vmem:[%s3370_s3 + $0xd8] sm:$0xff]  ;;  %v2971_v4 = vrot.slane %v410_v0, %v589_v61 }
  0x5b   : > { %737 = vperm.xlu1 %2550, %v2123_v5   ;;  %732 = vperm.xlu0 %2549, %v2122_v6   ;;  %v2973_v5 = vrot.slane %v410_v0, %v762_v62  ;;  %v959_v6 = vsub.s32 2, %v588_v56 }
  0x5f   : > { %934 = vperm.xlu1 %2550, %v2147_v7   ;;  %929 = vperm.xlu0 %2549, %v2146_v8   ;;  %v2106_v7 = vld [vmem:[%s3370_s3 + $0xd0] sm:$0xff] }
  0x63   : > { %1096 = vperm.xlu1 %2550, %v436_v9   ;;  %1091 = vperm.xlu0 %2549, %v435_v10  }
  0x67   : > { %574 = vperm.xlu1 %2550, %v464_v11   ;;  %569 = vperm.xlu0 %2549, %v463_v12  }
  0x6b   : > { %747 = vperm.xlu1 %2550, %v2125_v13   ;;  %742 = vperm.xlu0 %2549, %v2124_v14   ;;  %v2131_v13 = vld [vmem:[%s3370_s3 + $0x198] sm:$0xff]  ;;  %v2984_v14 = vrot.slane %v410_v0, %v959_v6  ;;  %v449_v0 = vld [vmem:[%s3370_s3 + $0x30] sm:$0xff] }
  0x6c   : > { %v2110_v6 = vld [vmem:[%s3370_s3 + $0xf0] sm:$0xff] }
  0x6f   : > { %944 = vperm.xlu1 %2550, %v2149_v15   ;;  %939 = vperm.xlu0 %2549, %v2148_v16   ;;  %v2130_v16 = vld [vmem:[%s3370_s3 + $0x190] sm:$0xff] }
  0x73   : > { %1106 = vperm.xlu1 %2550, %v438_v17   ;;  %1101 = vperm.xlu0 %2549, %v437_v18  }
  0x77   : > { %584 = vperm.xlu1 %2550, %v466_v19   ;;  %579 = vperm.xlu0 %2549, %v465_v20  }
  0x7b   : > { %757 = vperm.xlu1 %2550, %v2127_v21   ;;  %752 = vperm.xlu0 %2549, %v2126_v22  }
  0x7f   : > { %954 = vperm.xlu1 %2550, %v2151_v23   ;;  %949 = vperm.xlu0 %2549, %v2150_v24   ;;  %v420_v23 = vld [vmem:[%s2697_s29 + $0x8] sm:$0xff]  ;;  %v419_v24 = vld [vmem:[%s2697_s29] sm:$0xff] }
  0x83   : > { %1116 = vperm.xlu1 %2550, %v440_v25   ;;  %1111 = vperm.xlu0 %2549, %v439_v26  }
  0x87   : > { %1126 = vperm.xlu1 %2550, %v442_v27   ;;  %1121 = vperm.xlu0 %2549, %v441_v28   ;;  %v2889_v31 = vpop.permute.xlu1 %682  ;;  %v2891_v32 = vpop.permute.xlu0 %509 }
  0x8b   : > { %1539 = vperm.xlu1 %2550, %v1508_v29   ;;  %1534 = vperm.xlu0 %2549, %v1507_v30   ;;  %v2899_v35 = vpop.permute.xlu1 %687  ;;  %v2901_v36 = vpop.permute.xlu0 %514  ;;  %v448_v29 = vld [vmem:[%s3370_s3 + $0x28] sm:$0xff]  ;;  %v447_v30 = vld [vmem:[%s3370_s3 + $0x20] sm:$0xff] }
  0x8f   : > { %1549 = vperm.xlu1 %2550, %v1510_v33   ;;  %1544 = vperm.xlu0 %2549, %v1509_v34   ;;  %v2909_v39 = vpop.permute.xlu1 %884  ;;  %v2911_v40 = vpop.permute.xlu0 %879 }
  0x93   : > { %1559 = vperm.xlu1 %2550, %v1512_v37   ;;  %1554 = vperm.xlu0 %2549, %v1511_v38   ;;  %v2109_v37 = vld [vmem:[%s3370_s3 + $0xe8] sm:$0xff]  ;;  %v2108_v38 = vld [vmem:[%s3370_s3 + $0xe0] sm:$0xff] }
  0x96   : > { %v2919_v43 = vpop.permute.xlu1 %524  ;;  %v2921_v44 = vpop.permute.xlu0 %519 }
  0x97   : > { %1569 = vperm.xlu1 %2550, %v1514_v41   ;;  %1564 = vperm.xlu0 %2549, %v1513_v42  }
  0x9a   : > { %v2929_v47 = vpop.permute.xlu1 %697  ;;  %v2931_v48 = vpop.permute.xlu0 %692 }
  0x9b   : > { %474 = vperm.xlu1 %2550, %v444_v45   ;;  %469 = vperm.xlu0 %2549, %v443_v46   ;;  %v1516_v45 = vld [vmem:[%s3375_s8 + $0x48] sm:$0xff]  ;;  %v1515_v46 = vld [vmem:[%s3375_s8 + $0x40] sm:$0xff] }
  0x9e   : > { %v2942_v53 = vpop.permute.xlu1 %894  ;;  %v2944_v54 = vpop.permute.xlu0 %889 }
  0x9f   : > { %647 = vperm.xlu1 %2550, %v2105_v49   ;;  %642 = vperm.xlu0 %2549, %v2104_v52   ;;  %v2132_v52 = vld [vmem:[%s3370_s3 + $0x1a0] sm:$0xff] }
  0xa2   : > { %v2953_v58 = vpop.permute.xlu1 %1056  ;;  %v2960_v59 = vpop.permute.xlu0 %1051 }
  0xa3   : > { %844 = vperm.xlu1 %2550, %v2129_v55   ;;  %839 = vperm.xlu0 %2549, %v2128_v57   ;;  %v422_v57 = vld [vmem:[%s2697_s29 + $0x18] sm:$0xff] }
  0xa6   : > { %v535_v1 = vpop.permute.xlu1 %534  ;;  %v530_v2 = vpop.permute.xlu0 %529 }
  0xa7   : > { %484 = vperm.xlu1 %2550, %v446_v60   ;;  %479 = vperm.xlu0 %2549, %v445_v63   ;;  %v604_v9 = vmul.f32 %v2971_v4, %v535_v1  ;;  %v603_v17 = vmul.f32 %v2971_v4, %v530_v2  ;;  %v421_v60 = vld [vmem:[%s2697_s29 + $0x10] sm:$0xff]  ;;  %v450_v63 = vld [vmem:[%s3370_s3 + $0x38] sm:$0xff] }
  0xaa   : > { %v708_v8 = vpop.permute.xlu1 %707  ;;  %v703_v11 = vpop.permute.xlu0 %702 }
  0xab   : > { %v777_v10 = vmul.f32 %v2973_v5, %v708_v8  ;;  %657 = vperm.xlu1 %2550, %v2107_v3   ;;  %v776_v12 = vmul.f32 %v2973_v5, %v703_v11  ;;  %652 = vperm.xlu0 %2549, %v2106_v7   ;;  %v2111_v3 = vld [vmem:[%s3370_s3 + $0xf8] sm:$0xff] }
  0xad   : > { %v801_v15 = vadd.f32 %v777_v10, %v604_v9  ;;  %v800_v21 = vadd.f32 %v776_v12, %v603_v17  ;;  %v1518_v9 = vld [vmem:[%s3375_s8 + $0x58] sm:$0xff]  ;;  %v1517_v10 = vld [vmem:[%s3375_s8 + $0x50] sm:$0xff] }
  0xae   : > { %v905_v18 = vpop.permute.xlu1 %904  ;;  %v900_v20 = vpop.permute.xlu0 %899 }
  0xaf   : > { %v974_v19 = vmul.f32 %v2984_v14, %v905_v18  ;;  %854 = vperm.xlu1 %2550, %v2131_v13   ;;  %v973_v22 = vmul.f32 %v2984_v14, %v900_v20  ;;  %849 = vperm.xlu0 %2549, %v2130_v16   ;;  %v2135_v13 = vld [vmem:[%s3370_s3 + $0x1b8] sm:$0xff]  ;;  %v424_v18 = vld [vmem:[%s2697_s29 + $0x28] sm:$0xff] }
  0xb1   : > { %v2994_v25 = vadd.f32 %v974_v19, %v801_v15  ;;  %v2998_v27 = vadd.f32 %v973_v22, %v800_v21  ;;  %v2134_v15 = vld [vmem:[%s3370_s3 + $0x1b0] sm:$0xff]  ;;  %v423_v19 = vld [vmem:[%s2697_s29 + $0x20] sm:$0xff]  ;;  %v1520_v22 = vld [vmem:[%s3375_s8 + $0x68] sm:$0xff] }
  0xb2   : > { %v2996_v26 = vpop.permute.xlu1 %1066  ;;  %v3000_v28 = vpop.permute.xlu0 %1061 }
  0xb3   : > { %1016 = vperm.xlu1 %2550, %v420_v23   ;;  %1011 = vperm.xlu0 %2549, %v419_v24   ;;  %v1519_v23 = vld [vmem:[%s3375_s8 + $0x60] sm:$0xff] }
  0xb6   : > { %v3008_v33 = vpop.permute.xlu1 %544  ;;  %v3010_v34 = vpop.permute.xlu0 %539 }
  0xb7   : > { %494 = vperm.xlu1 %2550, %v448_v29   ;;  %489 = vperm.xlu0 %2549, %v447_v30   ;;  %v426_v30 = vld [vmem:[%s2697_s29 + $0x38] sm:$0xff] }
  0xba   : > { %v3018_v41 = vpop.permute.xlu1 %717  ;;  %v3020_v42 = vpop.permute.xlu0 %712 }
  0xbb   : > { %667 = vperm.xlu1 %2550, %v2109_v37   ;;  %662 = vperm.xlu0 %2549, %v2108_v38   ;;  %v425_v37 = vld [vmem:[%s2697_s29 + $0x30] sm:$0xff] }
  0xbe   : > { %v3028_v49 = vpop.permute.xlu1 %914  ;;  %v3030_v50 = vpop.permute.xlu0 %909 }
  0xbf   : > { %1716 = vperm.xlu1 %2550, %v1516_v45   ;;  %1711 = vperm.xlu0 %2549, %v1515_v46   ;;  %v1522_v46 = vld [vmem:[%s3375_s8 + $0x78] sm:$0xff] }
  0xc2   : > { %v3038_v55 = vpop.permute.xlu1 %1076  ;;  %v3040_v56 = vpop.permute.xlu0 %1071 }
  0xc3   : > { %864 = vperm.xlu1 %2550, %v2133_v51   ;;  %859 = vperm.xlu0 %2549, %v2132_v52   ;;  %v1521_v51 = vld [vmem:[%s3375_s8 + $0x70] sm:$0xff] }
  0xc6   : > { %v3044_v61 = vpop.permute.xlu1 %554  ;;  %v3046_v62 = vpop.permute.xlu0 %549 }
  0xc7   : > { %1026 = vperm.xlu1 %2550, %v422_v57   ;;  %1021 = vperm.xlu0 %2549, %v421_v60   ;;  %v772_v60 = vmul.f32 %v2973_v5, %v2889_v31  ;;  %v775_v31 = vmul.f32 %v2973_v5, %v2929_v47  ;;  %v601_v47 = vmul.f32 %v2971_v4, %v2921_v44 }
  0xc8   : > { %v606_v44 = vmul.f32 %v2971_v4, %v3008_v33 }
  0xca   : > { %v3054_v1 = vpop.permute.xlu1 %727  ;;  %v3056_v2 = vpop.permute.xlu0 %722 }
  0xcb   : > { %504 = vperm.xlu1 %2550, %v450_v63   ;;  %499 = vperm.xlu0 %2549, %v449_v0   ;;  %v599_v63 = vmul.f32 %v2971_v4, %v2891_v32  ;;  %v773_v0 = vmul.f32 %v2973_v5, %v2899_v35  ;;  %v774_v35 = vmul.f32 %v2973_v5, %v2931_v48 }
  0xcc   : > { %v971_v48 = vmul.f32 %v2984_v14, %v2944_v54  ;;  %v976_v54 = vmul.f32 %v2984_v14, %v3028_v49  ;;  %v608_v49 = vmul.f32 %v2971_v4, %v3044_v61 }
  0xce   : > { %v3064_v7 = vpop.permute.xlu1 %924  ;;  %v3066_v8 = vpop.permute.xlu0 %919 }
  0xcf   : > { %677 = vperm.xlu1 %2550, %v2111_v3   ;;  %672 = vperm.xlu0 %2549, %v2110_v6   ;;  %v600_v3 = vmul.f32 %v2971_v4, %v2901_v36  ;;  %v1523_v6 = vld [vmem:[%s3375_s8 + $0x80] sm:$0x7]  ;;  %v970_v36 = vmul.f32 %v2984_v14, %v2909_v39 }
  0xd1   : > { %v797_v32 = vadd.f32 %v773_v0, %v600_v3  ;;  %v605_v3 = vmul.f32 %v2971_v4, %v3010_v34  ;;  %v607_v34 = vmul.f32 %v2971_v4, %v3046_v62 }
  0xd2   : > { %v3074_v11 = vpop.permute.xlu1 %1086  ;;  %v3076_v12 = vpop.permute.xlu0 %1081 }
  0xd3   : > { %1726 = vperm.xlu1 %2550, %v1518_v9   ;;  %1721 = vperm.xlu0 %2549, %v1517_v10  }
  0xd6   : > { %v3084_v16 = vpop.permute.xlu1 %564  ;;  %v3086_v17 = vpop.permute.xlu0 %559 }
  0xd7   : > { %874 = vperm.xlu1 %2550, %v2135_v13   ;;  %869 = vperm.xlu0 %2549, %v2134_v15   ;;  %v796_v13 = vadd.f32 %v772_v60, %v599_v63  ;;  %v969_v15 = vmul.f32 %v2984_v14, %v2911_v40  ;;  %v779_v40 = vmul.f32 %v2973_v5, %v3018_v41 }
  0xd8   : > { %v781_v63 = vmul.f32 %v2973_v5, %v3054_v1  ;;  %v978_v1 = vmul.f32 %v2984_v14, %v3064_v7 }
  0xda   : > { %v3090_v20 = vpop.permute.xlu1 %737  ;;  %v3092_v21 = vpop.permute.xlu0 %732 }
  0xdb   : > { %1036 = vperm.xlu1 %2550, %v424_v18   ;;  %1031 = vperm.xlu0 %2549, %v423_v19   ;;  %v602_v18 = vmul.f32 %v2971_v4, %v2919_v43  ;;  %v972_v19 = vmul.f32 %v2984_v14, %v2942_v53  ;;  %v993_v43 = vadd.f32 %v969_v15, %v796_v13 }
  0xdc   : > { %v778_v53 = vmul.f32 %v2973_v5, %v3020_v42  ;;  %v975_v42 = vmul.f32 %v2984_v14, %v3030_v50  ;;  %v977_v50 = vmul.f32 %v2984_v14, %v3066_v8  ;;  %v1141_v8 = vadd.f32 %v3040_v56, %v2998_v27 }
  0xdd   : > { %v799_v39 = vadd.f32 %v775_v31, %v602_v18  ;;  %v1137_v33 = vadd.f32 %v2960_v59, %v993_v43  ;;  %v803_v31 = vadd.f32 %v779_v40, %v606_v44  ;;  %v610_v27 = vmul.f32 %v2971_v4, %v3084_v16 }
  0xde   : > { %v3100_v24 = vpop.permute.xlu1 %934  ;;  %v3102_v29 = vpop.permute.xlu0 %929  ;;  %v802_v13 = vadd.f32 %v778_v53, %v605_v3  ;;  %v609_v44 = vmul.f32 %v2971_v4, %v3086_v17 }
  0xdf   : > { %1736 = vperm.xlu1 %2550, %v1520_v22   ;;  %1731 = vperm.xlu0 %2549, %v1519_v23   ;;  %v980_v56 = vmul.f32 %v2984_v14, %v3100_v24  ;;  %v979_v24 = vmul.f32 %v2984_v14, %v3102_v29 }
  0xe2   : > { %v3106_v38 = vpop.permute.xlu1 %1096  ;;  %v3108_v45 = vpop.permute.xlu0 %1091 }
  0xe3   : > { %1046 = vperm.xlu1 %2550, %v426_v30   ;;  %1041 = vperm.xlu0 %2549, %v425_v37   ;;  %v798_v30 = vadd.f32 %v774_v35, %v601_v47  ;;  %v994_v37 = vadd.f32 %v970_v36, %v797_v32  ;;  %v805_v35 = vadd.f32 %v781_v63, %v608_v49 }
  0xe4   : > { %v1000_v36 = vadd.f32 %v976_v54, %v803_v31 }
  0xe5   : > { %v995_v60 = vadd.f32 %v971_v48, %v798_v30  ;;  %v1138_v41 = vadd.f32 %v2953_v58, %v994_v37  ;;  %v1002_v47 = vadd.f32 %v978_v1, %v805_v35 }
  0xe6   : > { %v3116_v52 = vpop.permute.xlu1 %574  ;;  %v3118_v57 = vpop.permute.xlu0 %569  ;;  %v1144_v37 = vadd.f32 %v3074_v11, %v1000_v36 }
  0xe7   : > { %1746 = vperm.xlu1 %2550, %v1522_v46   ;;  %1741 = vperm.xlu0 %2549, %v1521_v51   ;;  %v996_v46 = vadd.f32 %v972_v19, %v799_v39  ;;  %v1139_v59 = vadd.f32 %v3000_v28, %v995_v60  ;;  %v999_v19 = vadd.f32 %v975_v42, %v802_v13 }
  0xe8   : > { %v783_v28 = vmul.f32 %v2973_v5, %v3090_v20  ;;  %v612_v29 = vmul.f32 %v2971_v4, %v3116_v52  ;;  %v1146_v52 = vadd.f32 %v3106_v38, %v1002_v47 }
  0xe9   : > { %v1140_v58 = vadd.f32 %v2996_v26, %v996_v46  ;;  %v1142_v26 = vadd.f32 %v3038_v55, %v2994_v25  ;;  %v782_v25 = vmul.f32 %v2973_v5, %v3092_v21  ;;  %v1143_v63 = vadd.f32 %v3076_v12, %v999_v19 }
  0xea   : > { %v3131_v9 = vpop.permute.xlu1 %747  ;;  %v3133_v10 = vpop.permute.xlu0 %742 }
  0xeb   : > { %1913 = vperm.xlu0 %2549, %v1523_v6   ;;  %v780_v6 = vmul.f32 %v2973_v5, %v3056_v2  ;;  %v806_v42 = vadd.f32 %v782_v25, %v609_v44  ;;  %v785_v17 = vmul.f32 %v2973_v5, %v3131_v9  ;;  %v784_v12 = vmul.f32 %v2973_v5, %v3133_v10 }
  0xed   : > { %v804_v18 = vadd.f32 %v780_v6, %v607_v34 }
  0xee   : > { %v3147_v22 = vpop.permute.xlu1 %944  ;;  %v3153_v23 = vpop.permute.xlu0 %939 }
  0xef   : > { %v1001_v39 = vadd.f32 %v977_v50, %v804_v18  ;;  %v611_v50 = vmul.f32 %v2971_v4, %v3118_v57  ;;  %v982_v35 = vmul.f32 %v2984_v14, %v3147_v22  ;;  %v981_v36 = vmul.f32 %v2984_v14, %v3153_v23 }
  0xf0   : > { %v809_v18 = vadd.f32 %v785_v17, %v612_v29 }
  0xf1   : > { %v1145_v22 = vadd.f32 %v3108_v45, %v1001_v39 }
  0xf2   : > { %v3159_v51 = vpop.permute.xlu1 %1106  ;;  %v3167_v0 = vpop.permute.xlu0 %1101 }
  0xf6   : > { %v3186_v2 = vpop.permute.xlu1 %584  ;;  %v3189_v15 = vpop.permute.xlu0 %579 }
  0xf7   : > { %v2299_v32 = vpop.f32.mrb[0].mxu1  ;;  %v614_v44 = vmul.f32 %v2971_v4, %v3186_v2 }
  0xf8   : > { %v1444_v61 = vadd.f32 %v2299_v32, %v1138_v41  ;;  %v1356_v7 = vpop.f32.mrb[1].mxu1  ;;  %v807_v41 = vadd.f32 %v783_v28, %v610_v27  ;;  %v1003_v28 = vadd.f32 %v979_v24, %v806_v42 }
  0xf9   : > { %v1443_v62 = vadd.f32 %v1356_v7, %v1137_v33 }
  0xfa   : > { %vm1460_vm1 = vcmp.gt.f32.partialorder %v1444_v61, 0.0  ;;  %v1476_v48 = vmul.f32 0.2, %v1444_v61  ;;  %v758_v53 = vpop.permute.xlu1 %757  ;;  %v3206_v54 = vpop.permute.xlu0 %752  ;;  %v1004_v49 = vadd.f32 %v980_v56, %v807_v41  ;;  %v1147_v45 = vadd.f32 %v3167_v0, %v1003_v28 }
  0xfb   : > { %vm1459_vm2 = vcmp.gt.f32.partialorder %v1443_v62, 0.0  ;;  %v1475_v30 = vmul.f32 0.2, %v1443_v62  ;;  %v2302_v40 = vpop.f32.mrb[2].mxu1 }
  0xfc   : > { %v1446_v55 = vadd.f32 %v2302_v40, %v1140_v58  ;;  %v1366_v43 = vpop.f32.mrb[3].mxu1  ;;  %v1492_v46 = vsel %vm1460_vm1, %v1444_v61, %v1476_v48  ;;  %v1006_v40 = vadd.f32 %v982_v35, %v809_v18  ;;  %v1148_v47 = vadd.f32 %v3159_v51, %v1004_v49 }
  0xfd   : > { %v1445_v20 = vadd.f32 %v1366_v43, %v1139_v59  ;;  %v1491_v60 = vsel %vm1459_vm2, %v1443_v62, %v1475_v30  ;;  %v808_v62 = vadd.f32 %v784_v12, %v611_v50  ;;  %v787_v43 = vmul.f32 %v2973_v5, %v758_v53 }
  0xfe   : > { %vm1462_vm3 = vcmp.gt.f32.partialorder %v1446_v55, 0.0  ;;  %v1478_v11 = vmul.f32 0.2, %v1446_v55  ;;  %v2428_v21 = vpack.c.bf16 %v1492_v46, %v1491_v60  ;;  %v955_v32 = vpop.permute.xlu1 %954  ;;  %v950_v10 = vpop.permute.xlu0 %949  ;;  %v613_v53 = vmul.f32 %v2971_v4, %v3189_v15 }
  0xff   : > { %vm1461_vm4 = vcmp.gt.f32.partialorder %v1445_v20, 0.0  ;;  %v1477_v3 = vmul.f32 0.2, %v1445_v20  ;;  %v2305_v16 = vpop.f32.mrb[4].mxu1  ;;  %v983_v42 = vmul.f32 %v2984_v14, %v950_v10 }
 0x100   : > { %v1448_v6 = vadd.f32 %v2305_v16, %v1142_v26  ;;  %v1376_v33 = vpop.f32.mrb[5].mxu1  ;;  %2429 = vmatprep.subr.bf16.mxu1 %v2428_v21  ;;  %v1494_v31 = vsel %vm1462_vm3, %v1446_v55, %v1478_v11  ;;  %v786_v11 = vmul.f32 %v2973_v5, %v3206_v54  ;;  %v811_v16 = vadd.f32 %v787_v43, %v614_v44  ;;  %v1153_v43 = vld [vmem:[%s3371_s4] sm:$0xff] }
 0x101   : > { %v1447_v1 = vadd.f32 %v1376_v33, %v1141_v8  ;;  %2431 = vmatpush3.bf16.msra.mxu1 %v2428_v21  ;;  %v1493_v58 = vsel %vm1461_vm4, %v1445_v20, %v1477_v3  ;;  %2285 = vmatprep.mubr.msk.f32.mxu0 %vm1177_vm0, %v1153_v43  ;;  %v1701_v44 = vld [vmem:[%s3373_s6] sm:$0xff] }
 0x102   : > { %vm1464_vm5 = vcmp.gt.f32.partialorder %v1448_v6, 0.0  ;;  %v1480_v13 = vmul.f32 0.2, %v1448_v6  ;;  %v2432_v34 = vpack.c.bf16 %v1494_v31, %v1493_v58  ;;  %v1117_v46 = vpop.permute.xlu1 %1116  ;;  %v1112_v39 = vpop.permute.xlu0 %1111  ;;  %v810_v31 = vadd.f32 %v786_v11, %v613_v53 }
 0x103   : > { %vm1463_vm6 = vcmp.gt.f32.partialorder %v1447_v1, 0.0  ;;  %v1479_v59 = vmul.f32 0.2, %v1447_v1  ;;  %v2308_v9 = vpop.f32.mrb[6].mxu1 }
 0x104   : > { %v1450_v61 = vadd.f32 %v2308_v9, %v1144_v37  ;;  %v1386_v7 = vpop.f32.mrb[7].mxu1  ;;  %2433 = vmatprep.subr.bf16.mxu1 %v2432_v34  ;;  %v1496_v26 = vsel %vm1464_vm5, %v1448_v6, %v1480_v13  ;;  %v1005_v37 = vadd.f32 %v981_v36, %v808_v62  ;;  %v1150_v6 = vadd.f32 %v1117_v46, %v1006_v40  ;;  %v1526_v40 = vld [vmem:[%s3372_s5 + $0x10] sm:$0xff]  ;;  %v1154_v46 = vld [vmem:[%s3371_s4 + $0x8] sm:$0xff] }
 0x105   : > { %v1449_v19 = vadd.f32 %v1386_v7, %v1143_v63  ;;  %2435 = vmatpush3.bf16.msra.mxu1 %v2432_v34  ;;  %v1495_v57 = vsel %vm1463_vm6, %v1447_v1, %v1479_v59  ;;  %v984_v63 = vmul.f32 %v2984_v14, %v955_v32  ;;  %v1007_v50 = vadd.f32 %v983_v42, %v810_v31 }
 0x106   : > { %vm1466_vm7 = vcmp.gt.f32.partialorder %v1450_v61, 0.0  ;;  %v1482_v8 = vmul.f32 0.2, %v1450_v61  ;;  %v2436_v48 = vpack.c.bf16 %v1496_v26, %v1495_v57  ;;  %v1149_v17 = vadd.f32 %v1112_v39, %v1005_v37  ;;  %v1127_v49 = vpop.permute.xlu1 %1126  ;;  %v1122_v12 = vpop.permute.xlu0 %1121  ;;  %v1527_v37 = vld [vmem:[%s3372_s5 + $0x18] sm:$0xff]  ;;  %2286 = vmatmul.mubr.msk.f32.vlgmr.msra.gmra.mrb[0].mxu0 %vm1177_vm0, %v1154_v46  ;;  %v1158_v39 = vld [vmem:[%s3371_s4 + $0x28] sm:$0xff] }
 0x107   : > { %vm1465_vm8 = vcmp.gt.f32.partialorder %v1449_v19, 0.0  ;;  %v1481_v23 = vmul.f32 0.2, %v1449_v19  ;;  %v2311_v30 = vpop.f32.mrb[8].mxu1  ;;  %v1008_v58 = vadd.f32 %v984_v63, %v811_v16  ;;  %v1151_v10 = vadd.f32 %v1122_v12, %v1007_v50 }
 0x108   : > { %v1452_v25 = vadd.f32 %v2311_v30, %v1146_v52  ;;  %v1396_v55 = vpop.f32.mrb[9].mxu1  ;;  %2437 = vmatprep.subr.bf16.mxu1 %v2436_v48  ;;  %v1498_v38 = vsel %vm1466_vm7, %v1450_v61, %v1482_v8  ;;  %v1525_v30 = vld [vmem:[%s3372_s5 + $0x8] sm:$0xff]  ;;  %v2578_v46 = vmov 0.0  }
 0x109   : > { %v1451_v27 = vadd.f32 %v1396_v55, %v1145_v22  ;;  %2439 = vmatpush3.bf16.msra.mxu1 %v2436_v48  ;;  %v1497_v56 = vsel %vm1465_vm8, %v1449_v19, %v1481_v23  ;;  %v1152_v9 = vadd.f32 %v1127_v49, %v1008_v58  ;;  %v1529_v55 = vld [vmem:[%s3372_s5 + $0x28] sm:$0xff] }
 0x10a   : > { %vm1468_vm9 = vcmp.gt.f32.partialorder %v1452_v25, 0.0  ;;  %v1484_v20 = vmul.f32 0.2, %v1452_v25  ;;  %v2440_v60 = vpack.c.bf16 %v1498_v38, %v1497_v56  ;;  %v1530_v38 = vld [vmem:[%s3372_s5 + $0x30] sm:$0xff]  ;;  %v1156_v56 = vld [vmem:[%s3371_s4 + $0x18] sm:$0xff]  ;;  %v1540_v11 = vpop.permute.xlu1 %1539 }
 0x10b   : > { %vm1467_vm10 = vcmp.gt.f32.partialorder %v1451_v27, 0.0  ;;  %v1483_v51 = vmul.f32 0.2, %v1451_v27  ;;  %v2314_v21 = vpop.f32.mrb[10].mxu1 }
 0x10c   : > { %v1454_v41 = vadd.f32 %v2314_v21, %v1148_v47  ;;  %v1406_v0 = vpop.f32.mrb[11].mxu1  ;;  %2441 = vmatprep.subr.bf16.mxu1 %v2440_v60  ;;  %v1500_v3 = vsel %vm1468_vm9, %v1452_v25, %v1484_v20  ;;  %v1528_v25 = vld [vmem:[%s3372_s5 + $0x20] sm:$0xff]  ;;  %v1531_v47 = vld [vmem:[%s3372_s5 + $0x38] sm:$0xff]  ;;  %v1159_v20 = vld [vmem:[%s3371_s4 + $0x30] sm:$0xff] }
 0x10d   : > { %v1453_v24 = vadd.f32 %v1406_v0, %v1147_v45  ;;  %2443 = vmatpush3.bf16.msra.mxu1 %v2440_v60  ;;  %v1499_v2 = vsel %vm1467_vm10, %v1451_v27, %v1483_v51  ;;  %v1155_v27 = vld [vmem:[%s3371_s4 + $0x10] sm:$0xff]  ;;  %v1157_v45 = vld [vmem:[%s3371_s4 + $0x20] sm:$0xff]  ;;  %v1160_v60 = vld [vmem:[%s3371_s4 + $0x38] sm:$0xff]  ;;  %v1535_v51 = vpop.permute.xlu0 %1534  ;;  %vm2577_vm10 = vmmov 0  }
 0x10e   : > { %vm1470_vm11 = vcmp.gt.f32.partialorder %v1454_v41, 0.0  ;;  %v1486_v54 = vmul.f32 0.2, %v1454_v41  ;;  %v2444_v33 = vpack.c.bf16 %v1500_v3, %v1499_v2  ;;  %2288 = vmatprep.mubr.msk.f32.mxu0 %vm1177_vm0, %v1155_v27  ;;  %v1550_v21 = vpop.permute.xlu1 %1549 }
 0x10f   : > { %vm1469_vm12 = vcmp.gt.f32.partialorder %v1453_v24, 0.0  ;;  %v1485_v15 = vmul.f32 0.2, %v1453_v24  ;;  %v2317_v1 = vpop.f32.mrb[12].mxu1  ;;  %2289 = vmatmul.mubr.msk.f32.gmra.mrb[2].mxu0 %vm1177_vm0, %v1156_v56 }
 0x110   : > { %v1456_v13 = vadd.f32 %v2317_v1, %v1150_v6  ;;  %v1416_v34 = vpop.f32.mrb[13].mxu1  ;;  %2445 = vmatprep.subr.bf16.mxu1 %v2444_v33  ;;  %v1502_v29 = vsel %vm1470_vm11, %v1454_v41, %v1486_v54  ;;  %2291 = vmatprep.mubr.msk.f32.mxu0 %vm1177_vm0, %v1157_v45 }
 0x111   : > { %v1455_v32 = vadd.f32 %v1416_v34, %v1149_v17  ;;  %2447 = vmatpush3.bf16.msra.mxu1 %v2444_v33  ;;  %v1501_v59 = vsel %vm1469_vm12, %v1453_v24, %v1485_v15  ;;  %v1545_v63 = vpop.permute.xlu0 %1544 }
 0x112   : > { %vm1472_vm13 = vcmp.gt.f32.partialorder %v1456_v13, 0.0  ;;  %v1488_v35 = vmul.f32 0.2, %v1456_v13  ;;  %v2448_v36 = vpack.c.bf16 %v1502_v29, %v1501_v59  ;;  %v1560_v33 = vpop.permute.xlu1 %1559 }
 0x113   : > { %vm1471_vm14 = vcmp.gt.f32.partialorder %v1455_v32, 0.0  ;;  %v1487_v61 = vmul.f32 0.2, %v1455_v32  ;;  %v2320_v7 = vpop.f32.mrb[14].mxu1  ;;  %2292 = vmatmul.mubr.msk.f32.gmra.mrb[4].mxu0 %vm1177_vm0, %v1158_v39 }
 0x114   : > { %v1458_v26 = vadd.f32 %v2320_v7, %v1152_v9  ;;  %v1426_v52 = vpop.f32.mrb[15].mxu1  ;;  %2449 = vmatprep.subr.bf16.mxu1 %v2448_v36  ;;  %v1504_v18 = vsel %vm1472_vm13, %v1456_v13, %v1488_v35  ;;  %2294 = vmatprep.mubr.msk.f32.mxu0 %vm1177_vm0, %v1159_v20 }
 0x115   : > { %v1457_v19 = vadd.f32 %v1426_v52, %v1151_v10  ;;  %2451 = vmatpush3.bf16.msra.mxu1 %v2448_v36  ;;  %v1503_v57 = vsel %vm1471_vm14, %v1455_v32, %v1487_v61  ;;  %v1555_v49 = vpop.permute.xlu0 %1554 }
 0x116   : > { %vm1474_vm15 = vcmp.gt.f32.partialorder %v1458_v26, 0.0  ;;  %v1490_v62 = vmul.f32 0.2, %v1458_v26  ;;  %v2452_v8 = vpack.c.bf16 %v1504_v18, %v1503_v57  ;;  %v1570_v35 = vpop.permute.xlu1 %1569 }
 0x117   : > { %vm1473_vm1 = vcmp.gt.f32.partialorder %v1457_v19, 0.0  ;;  %v1489_v48 = vmul.f32 0.2, %v1457_v19  ;;  %2295 = vmatmul.mubr.msk.f32.gmra.mrb[6].mxu0 %vm1177_vm0, %v1160_v60 }
 0x118   : > { %2453 = vmatprep.subr.bf16.mxu1 %v2452_v8  ;;  %v1506_v22 = vsel %vm1474_vm15, %v1458_v26, %v1490_v62  ;;  %2381 = vmatprep.mubr.msk.f32.mxu0 %vm1177_vm0, %v1701_v44 }
 0x119   : > { %2455 = vmatpush3.bf16.msra.mxu1 %v2452_v8  ;;  %v1505_v28 = vsel %vm1473_vm1, %v1457_v19, %v1489_v48  ;;  %v1565_v61 = vpop.permute.xlu0 %1564 }
 0x11a   : > { %v2456_v23 = vpack.c.bf16 %v1506_v22, %v1505_v28  ;;  %v475_v43 = vpop.permute.xlu1 %474 }
 0x11c   : > { %2457 = vmatprep.subr.bf16.mxu1 %v2456_v23 }
 0x11d   : > { %2459 = vmatpush3.bf16.msra.mxu1 %v2456_v23  ;;  %v1702_v23 = vld [vmem:[%s3373_s6 + $0x8] sm:$0xff]  ;;  %v470_v27 = vpop.permute.xlu0 %469 }
 0x11e   : > { %v648_v56 = vpop.permute.xlu1 %647 }
 0x120   : > { %2354 = vmatmul.mubr.f32.vlgmr.msra.gmra.mrb[16].mxu1 %v1525_v30  ;;  %v1703_v30 = vld [vmem:[%s3373_s6 + $0x10] sm:$0xff] }
 0x121   : > { %2356 = vmatprep.mubr.f32.mxu1 %v1526_v40  ;;  %v1704_v40 = vld [vmem:[%s3373_s6 + $0x18] sm:$0xff]  ;;  %v643_v45 = vpop.permute.xlu0 %642 }
 0x122   : > { %v845_v39 = vpop.permute.xlu1 %844 }
 0x124   : > { %2357 = vmatmul.mubr.f32.gmra.mrb[18].mxu1 %v1527_v37  ;;  %v1705_v37 = vld [vmem:[%s3373_s6 + $0x20] sm:$0xff] }
 0x125   : > { %2359 = vmatprep.mubr.f32.mxu1 %v1528_v25  ;;  %v1706_v25 = vld [vmem:[%s3373_s6 + $0x28] sm:$0xff]  ;;  %v840_v20 = vpop.permute.xlu0 %839 }
 0x126   : > { %v485_v60 = vpop.permute.xlu1 %484 }
 0x128   : > { %2360 = vmatmul.mubr.f32.gmra.mrb[20].mxu1 %v1529_v55  ;;  %v1707_v55 = vld [vmem:[%s3373_s6 + $0x30] sm:$0xff] }
 0x129   : > { %2362 = vmatprep.mubr.f32.mxu1 %v1530_v38  ;;  %v1708_v38 = vld [vmem:[%s3373_s6 + $0x38] sm:$0xff]  ;;  %v480_v44 = vpop.permute.xlu0 %479 }
 0x12c   : > { %2363 = vmatmul.mubr.f32.gmra.mrb[22].mxu1 %v1531_v47  ;;  %v2576_v47 = vmov 0.0|0.0  }
 0x1f3   : > { %v2355_v53 = vpop.f32.mrb[16].mxu1 }
 0x1f4   : > { %v1644_v41 = vadd.f32 %v2355_v53, %v1540_v11  ;;  %v1638_v0 = vpop.f32.mrb[17].mxu1  ;;  %v658_v11 = vpop.permute.xlu1 %657 }
 0x1f5   : > { %v1639_v3 = vadd.f32 %v1638_v0, %v1535_v51  ;;  %v653_v51 = vpop.permute.xlu0 %652 }
 0x1f6   : > { %vm1678_vm2 = vcmp.gt.f32.partialorder %v1644_v41, 0.0  ;;  %v1686_v16 = vmul.f32 0.2, %v1644_v41 }
 0x1f7   : > { %vm1677_vm3 = vcmp.gt.f32.partialorder %v1639_v3, 0.0  ;;  %v1685_v42 = vmul.f32 0.2, %v1639_v3  ;;  %v2358_v24 = vpop.f32.mrb[18].mxu1 }
 0x1f8   : > { %v1654_v2 = vadd.f32 %v2358_v24, %v1550_v21  ;;  %v1648_v6 = vpop.f32.mrb[19].mxu1  ;;  %v1694_v54 = vsel %vm1678_vm2, %v1644_v41, %v1686_v16  ;;  %v855_v21 = vpop.permute.xlu1 %854 }
 0x1f9   : > { %v1649_v31 = vadd.f32 %v1648_v6, %v1545_v63  ;;  %v1693_v17 = vsel %vm1677_vm3, %v1639_v3, %v1685_v42  ;;  %v850_v53 = vpop.permute.xlu0 %849 }
 0x1fa   : > { %vm1680_vm4 = vcmp.gt.f32.partialorder %v1654_v2, 0.0  ;;  %v1688_v15 = vmul.f32 0.2, %v1654_v2  ;;  %v2460_v1 = vpack.c.bf16 %v1694_v54, %v1693_v17 }
 0x1fb   : > { %vm1679_vm5 = vcmp.gt.f32.partialorder %v1649_v31, 0.0  ;;  %v1687_v58 = vmul.f32 0.2, %v1649_v31  ;;  %v2361_v12 = vpop.f32.mrb[20].mxu1 }
 0x1fc   : > { %v1664_v13 = vadd.f32 %v2361_v12, %v1560_v33  ;;  %v1658_v34 = vpop.f32.mrb[21].mxu1  ;;  %2461 = vmatprep.subr.bf16.mxu0 %v2460_v1  ;;  %v1696_v29 = vsel %vm1680_vm4, %v1654_v2, %v1688_v15  ;;  %v1017_v63 = vpop.permute.xlu1 %1016 }
 0x1fd   : > { %v1659_v50 = vadd.f32 %v1658_v34, %v1555_v49  ;;  %2463 = vmatpush3.bf16.msra.mxu0 %v2460_v1  ;;  %v1695_v32 = vsel %vm1679_vm5, %v1649_v31, %v1687_v58  ;;  %v1012_v41 = vpop.permute.xlu0 %1011 }
 0x1fe   : > { %vm1682_vm6 = vcmp.gt.f32.partialorder %v1664_v13, 0.0  ;;  %v1690_v59 = vmul.f32 0.2, %v1664_v13  ;;  %v2464_v9 = vpack.c.bf16 %v1696_v29, %v1695_v32  ;;  %v765_v29 = vmul.f32 %v2973_v5, %v648_v56 }
 0x1ff   : > { %vm1681_vm7 = vcmp.gt.f32.partialorder %v1659_v50, 0.0  ;;  %v1689_v36 = vmul.f32 0.2, %v1659_v50  ;;  %v2364_v10 = vpop.f32.mrb[22].mxu1  ;;  %v592_v32 = vmul.f32 %v2971_v4, %v475_v43 }
 0x200   : > { %v1674_v7 = vadd.f32 %v2364_v10, %v1570_v35  ;;  %v1668_v26 = vpop.f32.mrb[23].mxu1  ;;  %2465 = vmatprep.subr.bf16.mxu0 %v2464_v9  ;;  %v1698_v52 = vsel %vm1682_vm6, %v1664_v13, %v1690_v59  ;;  %v495_v0 = vpop.permute.xlu1 %494  ;;  %v962_v59 = vmul.f32 %v2984_v14, %v845_v39  ;;  %v961_v35 = vmul.f32 %v2984_v14, %v840_v20 }
 0x201   : > { %v1669_v18 = vadd.f32 %v1668_v26, %v1565_v61  ;;  %2467 = vmatpush3.bf16.msra.mxu0 %v2464_v9  ;;  %v1697_v19 = vsel %vm1681_vm7, %v1659_v50, %v1689_v36  ;;  %v490_v3 = vpop.permute.xlu0 %489  ;;  %v764_v50 = vmul.f32 %v2973_v5, %v643_v45  ;;  %v591_v9 = vmul.f32 %v2971_v4, %v470_v27 }
 0x202   : > { %vm1684_vm8 = vcmp.gt.f32.partialorder %v1674_v7, 0.0  ;;  %v1692_v57 = vmul.f32 0.2, %v1674_v7  ;;  %v2468_v62 = vpack.c.bf16 %v1698_v52, %v1697_v19  ;;  %v789_v10 = vadd.f32 %v765_v29, %v592_v32 }
 0x203   : > { %vm1683_vm9 = vcmp.gt.f32.partialorder %v1669_v18, 0.0  ;;  %v1691_v8 = vmul.f32 0.2, %v1669_v18  ;;  %v767_v26 = vmul.f32 %v2973_v5, %v658_v11 }
 0x204   : > { %2469 = vmatprep.subr.bf16.mxu0 %v2468_v62  ;;  %v1700_v48 = vsel %vm1684_vm8, %v1674_v7, %v1692_v57  ;;  %v668_v16 = vpop.permute.xlu1 %667  ;;  %v788_v7 = vadd.f32 %v764_v50, %v591_v9  ;;  %v986_v52 = vadd.f32 %v962_v59, %v789_v10 }
 0x205   : > { %2471 = vmatpush3.bf16.msra.mxu0 %v2468_v62  ;;  %v1699_v22 = vsel %vm1683_vm9, %v1669_v18, %v1691_v8  ;;  %v663_v42 = vpop.permute.xlu0 %662  ;;  %v766_v18 = vmul.f32 %v2973_v5, %v653_v51  ;;  %v769_v57 = vmul.f32 %v2973_v5, %v668_v16  ;;  %v594_v8 = vmul.f32 %v2971_v4, %v485_v60 }
 0x206   : > { %v2472_v28 = vpack.c.bf16 %v1700_v48, %v1699_v22  ;;  %v985_v19 = vadd.f32 %v961_v35, %v788_v7  ;;  %v768_v62 = vmul.f32 %v2973_v5, %v663_v42  ;;  %v593_v48 = vmul.f32 %v2971_v4, %v480_v44 }
 0x207   : > { %v964_v22 = vmul.f32 %v2984_v14, %v855_v21 }
 0x208   : > { %2473 = vmatprep.subr.bf16.mxu0 %v2472_v28  ;;  %v1717_v24 = vpop.permute.xlu1 %1716  ;;  %v1129_v27 = vadd.f32 %v1012_v41, %v985_v19 }
 0x209   : > { %2475 = vmatpush3.bf16.msra.mxu0 %v2472_v28  ;;  %v1712_v2 = vpop.permute.xlu0 %1711  ;;  %v963_v28 = vmul.f32 %v2984_v14, %v850_v53 }
 0x20a   : > { %2476 = vmatprep.subr.bf16.mxu0 %v2576_v47  ;;  %v2498_v44 = vadd.f32 %v1712_v2, %v1129_v27 }
 0x20c   : > { %2382 = vmatmul.mubr.msk.f32.vlgmr.msra.gmra.mrb[0].mxu0 %vm1177_vm0, %v1702_v23  ;;  %v865_v6 = vpop.permute.xlu1 %864  ;;  %v596_v23 = vmul.f32 %v2971_v4, %v495_v0 }
 0x20d   : > { %2384 = vmatprep.mubr.msk.f32.mxu0 %vm1177_vm0, %v1703_v30  ;;  %v860_v54 = vpop.permute.xlu0 %859  ;;  %v595_v30 = vmul.f32 %v2971_v4, %v490_v3 }
 0x20e   : > { %v793_v56 = vadd.f32 %v769_v57, %v596_v23 }
 0x20f   : > { %v792_v45 = vadd.f32 %v768_v62, %v595_v30 }
 0x210   : > { %2385 = vmatmul.mubr.msk.f32.gmra.mrb[2].mxu0 %vm1177_vm0, %v1704_v40  ;;  %v1027_v33 = vpop.permute.xlu1 %1026  ;;  %v966_v40 = vmul.f32 %v2984_v14, %v865_v6 }
 0x211   : > { %2387 = vmatprep.mubr.msk.f32.mxu0 %vm1177_vm0, %v1705_v37  ;;  %v1022_v31 = vpop.permute.xlu0 %1021  ;;  %v965_v37 = vmul.f32 %v2984_v14, %v860_v54 }
 0x212   : > { %v990_v51 = vadd.f32 %v966_v40, %v793_v56 }
 0x213   : > { %v989_v21 = vadd.f32 %v965_v37, %v792_v45 }
 0x214   : > { %2388 = vmatmul.mubr.msk.f32.gmra.mrb[4].mxu0 %vm1177_vm0, %v1706_v25  ;;  %v505_v17 = vpop.permute.xlu1 %504 }
 0x215   : > { %2390 = vmatprep.mubr.msk.f32.mxu0 %vm1177_vm0, %v1707_v55  ;;  %v500_v49 = vpop.permute.xlu0 %499  ;;  %v791_v55 = vadd.f32 %v767_v26, %v594_v8  ;;  %v598_v3 = vmul.f32 %v2971_v4, %v505_v17 }
 0x216   : > { %v597_v41 = vmul.f32 %v2971_v4, %v500_v49 }
 0x217   : > { %v988_v20 = vadd.f32 %v964_v22, %v791_v55 }
 0x218   : > { %2391 = vmatmul.mubr.msk.f32.gmra.mrb[6].mxu0 %vm1177_vm0, %v1708_v38  ;;  %v678_v15 = vpop.permute.xlu1 %677  ;;  %v1130_v38 = vadd.f32 %v1017_v63, %v986_v52 }
 0x219   : > { %2409 = vmatprep.mubr.msk.f32.mxu0 %vm2577_vm10, %v2578_v46  ;;  %v673_v1 = vpop.permute.xlu0 %672  ;;  %v790_v46 = vadd.f32 %v766_v18, %v593_v48  ;;  %v771_v60 = vmul.f32 %v2973_v5, %v678_v15  ;;  %v1132_v0 = vadd.f32 %v1027_v33, %v988_v20 }
 0x21a   : > { %v2496_v39 = vadd.f32 %v1717_v24, %v1130_v38  ;;  %v770_v16 = vmul.f32 %v2973_v5, %v673_v1 }
 0x21b   : > { %v987_v11 = vadd.f32 %v963_v28, %v790_v46  ;;  %v795_v15 = vadd.f32 %v771_v60, %v598_v3 }
 0x21c   : > { %v1727_v58 = vpop.permute.xlu1 %1726  ;;  %v794_v1 = vadd.f32 %v770_v16, %v597_v41 }
 0x21d   : > { %v1722_v12 = vpop.permute.xlu0 %1721  ;;  %v1131_v6 = vadd.f32 %v1022_v31, %v987_v11  ;;  %v2500_v2 = vadd.f32 %v1727_v58, %v1132_v0 }
 0x21f   : > { %v2502_v59 = vadd.f32 %v1722_v12, %v1131_v6 }
 0x220   : > { %v875_v13 = vpop.permute.xlu1 %874 }
 0x221   : > { %v870_v34 = vpop.permute.xlu0 %869  ;;  %v968_v24 = vmul.f32 %v2984_v14, %v875_v13 }
 0x222   : > { %v967_v33 = vmul.f32 %v2984_v14, %v870_v34 }
 0x223   : > { %v992_v13 = vadd.f32 %v968_v24, %v795_v15 }
 0x224   : > { %v1037_v36 = vpop.permute.xlu1 %1036  ;;  %v991_v12 = vadd.f32 %v967_v33, %v794_v1 }
 0x225   : > { %v1032_v61 = vpop.permute.xlu0 %1031  ;;  %v1134_v9 = vadd.f32 %v1037_v36, %v990_v51  ;;  %v1910_v51 = vld [vmem:[%s3374_s7] sm:$0x7] }
 0x226   : > { %v1133_v49 = vadd.f32 %v1032_v61, %v989_v21 }
 0x228   : > { %v1737_v25 = vpop.permute.xlu1 %1736 }
 0x229   : > { %v1732_v43 = vpop.permute.xlu0 %1731  ;;  %v2504_v26 = vadd.f32 %v1737_v25, %v1134_v9 }
 0x22a   : > { %v2506_v18 = vadd.f32 %v1732_v43, %v1133_v49 }
 0x22c   : > { %v1047_v54 = vpop.permute.xlu1 %1046 }
 0x22d   : > { %v1042_v50 = vpop.permute.xlu0 %1041  ;;  %v1136_v57 = vadd.f32 %v1047_v54, %v992_v13 }
 0x22e   : > { %v1135_v61 = vadd.f32 %v1042_v50, %v991_v12 }
 0x230   : > { %v1747_v19 = vpop.permute.xlu1 %1746 }
 0x231   : > { %v1742_v62 = vpop.permute.xlu0 %1741  ;;  %v2508_v23 = vadd.f32 %v1747_v19, %v1136_v57 }
 0x232   : > { %v2510_v37 = vadd.f32 %v1742_v62, %v1135_v61 }
 0x235   : > { %v1914_v21 = vpop.permute.xlu0 %1913 }
 0x2df   : > { %v2383_v53 = vpop.f32.mrb[0].mxu0 }
 0x2e0   : > { %v2497_v63 = vadd.f32 %v2496_v39, %v2383_v53  ;;  %v1839_v42 = vpop.f32.mrb[1].mxu0 }
 0x2e1   : > { %v2499_v29 = vadd.f32 %v2498_v44, %v1839_v42 }
 0x2e2   : > { %vm1887_vm11 = vcmp.gt.f32.partialorder %v2497_v63, 0.0  ;;  %v1895_v32 = vmul.f32 0.2, %v2497_v63 }
 0x2e3   : > { %vm1886_vm12 = vcmp.gt.f32.partialorder %v2499_v29, 0.0  ;;  %v1894_v17 = vmul.f32 0.2, %v2499_v29  ;;  %v2386_v5 = vpop.f32.mrb[2].mxu0 }
 0x2e4   : > { %v1903_v31 = vsel %vm1887_vm11, %v2497_v63, %v1895_v32  ;;  %v2501_v35 = vadd.f32 %v2500_v2, %v2386_v5  ;;  %v1849_v4 = vpop.f32.mrb[3].mxu0 }
 0x2e5   : > { %v1902_v10 = vsel %vm1886_vm12, %v2499_v29, %v1894_v17  ;;  %v2503_v7 = vadd.f32 %v2502_v59, %v1849_v4 }
 0x2e6   : > { %v2477_v58 = vpack.c.bf16 %v1903_v31, %v1902_v10  ;;  %vm1889_vm13 = vcmp.gt.f32.partialorder %v2501_v35, 0.0  ;;  %v1897_v52 = vmul.f32 0.2, %v2501_v35 }
 0x2e7   : > { %vm1888_vm14 = vcmp.gt.f32.partialorder %v2503_v7, 0.0  ;;  %v1896_v14 = vmul.f32 0.2, %v2503_v7  ;;  %v2389_v34 = vpop.f32.mrb[4].mxu0 }
 0x2e8   : > { %v1905_v36 = vsel %vm1889_vm13, %v2501_v35, %v1897_v52  ;;  %v2505_v8 = vadd.f32 %v2504_v26, %v2389_v34  ;;  %v1859_v48 = vpop.f32.mrb[5].mxu0  ;;  %2478 = vmatpush3.bf16.msra.mxu0 %v2477_v58 }
 0x2e9   : > { %v1904_v22 = vsel %vm1888_vm14, %v2503_v7, %v1896_v14  ;;  %v2507_v28 = vadd.f32 %v2506_v18, %v1859_v48  ;;  %2479 = vmatprep.subr.bf16.mxu0 %v2576_v47 }
 0x2ea   : > { %v2480_v30 = vpack.c.bf16 %v1905_v36, %v1904_v22  ;;  %vm1891_vm15 = vcmp.gt.f32.partialorder %v2505_v8, 0.0  ;;  %v1899_v40 = vmul.f32 0.2, %v2505_v8 }
 0x2eb   : > { %vm1890_vm1 = vcmp.gt.f32.partialorder %v2507_v28, 0.0  ;;  %v1898_v25 = vmul.f32 0.2, %v2507_v28  ;;  %v2392_v55 = vpop.f32.mrb[6].mxu0 }
 0x2ec   : > { %v1907_v38 = vsel %vm1891_vm15, %v2505_v8, %v1899_v40  ;;  %v2509_v43 = vadd.f32 %v2508_v23, %v2392_v55  ;;  %v1869_v46 = vpop.f32.mrb[7].mxu0  ;;  %2481 = vmatpush3.bf16.msra.mxu0 %v2480_v30 }
 0x2ed   : > { %v1906_v27 = vsel %vm1890_vm1, %v2507_v28, %v1898_v25  ;;  %v2511_v56 = vadd.f32 %v2510_v37, %v1869_v46  ;;  %2482 = vmatprep.subr.bf16.mxu0 %v2576_v47 }
 0x2ee   : > { %v2483_v45 = vpack.c.bf16 %v1907_v38, %v1906_v27  ;;  %vm1893_vm2 = vcmp.gt.f32.partialorder %v2509_v43, 0.0  ;;  %v1901_v39 = vmul.f32 0.2, %v2509_v43 }
 0x2ef   : > { %vm1892_vm3 = vcmp.gt.f32.partialorder %v2511_v56, 0.0  ;;  %v1900_v20 = vmul.f32 0.2, %v2511_v56 }
 0x2f0   : > { %v1909_v60 = vsel %vm1893_vm2, %v2509_v43, %v1901_v39  ;;  %2484 = vmatpush3.bf16.msra.mxu0 %v2483_v45 }
 0x2f1   : > { %v1908_v44 = vsel %vm1892_vm3, %v2511_v56, %v1900_v20  ;;  %2485 = vmatprep.subr.bf16.mxu0 %v2576_v47 }
 0x2f2   : > { %v2486_v11 = vpack.c.bf16 %v1909_v60, %v1908_v44 }
 0x2f4   : > { %2487 = vmatpush3.bf16.msra.mxu0 %v2486_v11 }
 0x2f7   : > { %2410 = vmatmul.mubr.msk.f32.vlgmr.msra.gmra.mrb[8].mxu0 %vm1177_vm0, %v1910_v51 }
 0x3ca   : > { %v1985_v53 = vpop.f32.mrb[8].mxu0 }
 0x3cb   : > { %v1986_v0 = vadd.f32 %v1985_v53, %v1914_v21  ;;  %v2411_v3 = vpop.f32.mrb[9].mxu0 }
 0x3cd   : > { %1989 = vst [vmem:[%s409_s16] sm:$0x7] %v1986_v0 }
 0x3ce PF: > { %s19_s11 = sadd.s32 1, %s2573_s11   ;;  %s3377_s30 = smov %s2569_s10 }
 0x3cf   : > { %p16_p5 = scmp.ge.s32.totalorder %s19_s11, 4   ;;  %s3378_s10 = smov %s3380_s12 }
 0x3d1   :  { %18 = sbr.rel (!%p16_p5) target bundleno = 2 (0x2), region = 94 }

</bundles_post_ra>
